<compile_context>
chip_gen: v7x
topology: tpu7x:2x2x1
jax: 0.10.0
libtpu: 0.0.40
codegen_flags: <defaults>
</compile_context>

<pallas_src>
import functools

import jax
import jax.numpy as jnp
from jax.experimental import pallas as pl
from jax.experimental.pallas import tpu as pltpu


# ----------------------------------------------------------------------------
# helpers
# ----------------------------------------------------------------------------
_BLOCK_PARAM_NAMES = ("ln1_g", "ln1_b", "w_qkv", "b_qkv", "w_out", "b_out",
                      "ln2_g", "ln2_b", "w_fc", "b_fc", "w_proj", "b_proj")

_NT_DIMS = (((1,), (1,)), ((), ()))  # A @ B^T without materializing a transpose


def _rep_spec(shape):
    """Full-array block whose index_map ignores the grid (resident weights)."""
    nd = len(shape)
    return pl.BlockSpec(shape, lambda *_: (0,) * nd)


def _normal(key, shape, std):
    return std * jax.random.normal(key, shape, dtype=jnp.float32)


def _ln(x, g, b):
    """LayerNorm over the last axis (f32), g/b shaped (1, D)."""
    mu = jnp.mean(x, axis=-1, keepdims=True)
    xc = x - mu
    var = jnp.mean(xc * xc, axis=-1, keepdims=True)
    return xc * jax.lax.rsqrt(var + 1e-5) * g + b


def _normalize(f):
    nrm = jnp.sqrt(jnp.sum(f * f, axis=-1, keepdims=True))
    return f / jnp.maximum(nrm, 1e-12), nrm


def _transformer_block(x, n_heads, mask,
                       ln1g, ln1b, wqkv, bqkv, wout, bout,
                       ln2g, ln2b, wfc, bfc, wproj, bproj):
    """One CLIP residual attention block, all operands already in VMEM values."""
    S, D = x.shape
    Dh = D // n_heads
    scale = 1.0 / float(Dh) ** 0.5

    # ---- attention (LN1 fused into the QKV consumer) ------------------------
    h = _ln(x, ln1g, ln1b)
    qkv = jnp.dot(h.astype(jnp.bfloat16), wqkv,
                  preferred_element_type=jnp.float32) + bqkv            # (S, 3D)

    heads = []
    for hh in range(n_heads):                       # static unrolled head loop
        qh = qkv[:, hh * Dh:(hh + 1) * Dh].astype(jnp.bfloat16)
        kh = qkv[:, D + hh * Dh:D + (hh + 1) * Dh].astype(jnp.bfloat16)
        vh = qkv[:, 2 * D + hh * Dh:2 * D + (hh + 1) * Dh].astype(jnp.bfloat16)
        s = jax.lax.dot_general(qh, kh, _NT_DIMS,
                                preferred_element_type=jnp.float32) * scale
        if mask is not None:
            s = s + mask
        s = s - jnp.max(s, axis=-1, keepdims=True)
        p = jnp.exp(s)
        l = jnp.sum(p, axis=-1, keepdims=True)
        o_h = jnp.dot(p.astype(jnp.bfloat16), vh,
                      preferred_element_type=jnp.float32)               # (S, Dh)
        # deferred softmax normalization on the EUP slot
        heads.append(o_h * pl.reciprocal(l, approx=True))
    ctx = jnp.concatenate(heads, axis=-1)                               # (S, D)

    x = x + jnp.dot(ctx.astype(jnp.bfloat16), wout,
                    preferred_element_type=jnp.float32) + bout

    # ---- MLP (LN2 fused into the FC consumer) --------------------------------
    h2 = _ln(x, ln2g, ln2b)
    z = jnp.dot(h2.astype(jnp.bfloat16), wfc,
                preferred_element_type=jnp.float32) + bfc               # (S, 4D)
    z = z * jax.nn.sigmoid(1.702 * z)                                   # QuickGELU
    x = x + jnp.dot(z.astype(jnp.bfloat16), wproj,
                    preferred_element_type=jnp.float32) + bproj
    return x


# ----------------------------------------------------------------------------
# fused vision tower: stem + all blocks + head in ONE pallas_call (grid over B)
# ----------------------------------------------------------------------------
def _vision_tower_kernel(n_heads, n_layers,
                         p_ref, conv_w, cls_emb, pos_emb, lnpre_g, lnpre_b,
                         ln1g, ln1b, wqkv, bqkv, wout, bout,
                         ln2g, ln2b, wfc, bfc, wproj, bproj,
                         lnpost_g, lnpost_b, proj,
                         feat_ref, norm_ref):
    # stem: conv1-as-matmul + CLS + positional embedding + ln_pre
    pe = jnp.dot(p_ref[0], conv_w[...], preferred_element_type=jnp.float32)   # (N, D)
    x = jnp.concatenate([cls_emb[...], pe], axis=0) + pos_emb[...]            # (S, D)
    x = _ln(x, lnpre_g[...], lnpre_b[...])

    for l in range(n_layers):                      # static unrolled layer loop
        x = _transformer_block(
            x, n_heads, None,
            ln1g[l], ln1b[l], wqkv[l], bqkv[l], wout[l], bout[l],
            ln2g[l], ln2b[l], wfc[l], bfc[l], wproj[l], bproj[l])

    # head: ln_post(CLS) @ proj + L2 normalize (raw norm kept, like PyTorch)
    cls_tok = x[0:1, :]                                                       # (1, D)
    h = _ln(cls_tok, lnpost_g[...], lnpost_b[...])
    f = jnp.dot(h.astype(jnp.bfloat16), proj[...],
                preferred_element_type=jnp.float32)
    f_n, nrm = _normalize(f)
    feat_ref[0] = f_n
    norm_ref[0] = nrm


def vision_tower(patches, vp):
    B, N, cpp = patches.shape
    D = vp["width"]
    S = N + 1
    vis_dim = vp["proj"].shape[1]
    blk = vp["blocks"]
    n_layers = blk["w_qkv"].shape[0]
    kernel = functools.partial(_vision_tower_kernel, vp["n_heads"], n_layers)

    feat, nrm = pl.pallas_call(
        kernel,
        out_shape=(jax.ShapeDtypeStruct((B, 1, vis_dim), jnp.float32),
                   jax.ShapeDtypeStruct((B, 1, 1), jnp.float32)),
        grid=(B,),
        in_specs=[pl.BlockSpec((1, N, cpp), lambda b: (b, 0, 0)),
                  _rep_spec(vp["conv_w"].shape), _rep_spec(vp["cls_emb"].shape),
                  _rep_spec(vp["pos_emb"].shape),
                  _rep_spec(vp["ln_pre_g"].shape), _rep_spec(vp["ln_pre_b"].shape)]
                 + [_rep_spec(blk[n].shape) for n in _BLOCK_PARAM_NAMES]
                 + [_rep_spec(vp["ln_post_g"].shape),
                    _rep_spec(vp["ln_post_b"].shape),
                    _rep_spec(vp["proj"].shape)],
        out_specs=(pl.BlockSpec((1, 1, vis_dim), lambda b: (b, 0, 0)),
                   pl.BlockSpec((1, 1, 1), lambda b: (b, 0, 0))),
        compiler_params=pltpu.CompilerParams(dimension_semantics=("parallel",)),
    )(patches, vp["conv_w"], vp["cls_emb"], vp["pos_emb"],
      vp["ln_pre_g"], vp["ln_pre_b"],
      *[blk[n] for n in _BLOCK_PARAM_NAMES],
      vp["ln_post_g"], vp["ln_post_b"], vp["proj"])
    return feat.reshape(B, vis_dim), nrm.reshape(B, 1)


# ----------------------------------------------------------------------------
# fused text tower: pos-emb + all causal blocks + EOT gather + head
# (ONE pallas_call, grid over classes, EOT index via scalar prefetch)
# ----------------------------------------------------------------------------
def _text_tower_kernel(n_heads, n_layers,
                       eot_ref,                       # scalar prefetch, SMEM (n_cls,)
                       x_ref, pos_emb,
                       ln1g, ln1b, wqkv, bqkv, wout, bout,
                       ln2g, ln2b, wfc, bfc, wproj, bproj,
                       lnf_g, lnf_b, tproj,
                       feat_ref, norm_ref):
    x = x_ref[0] + pos_emb[...]                                        # (L, D)
    L, D = x.shape

    # causal mask built ONCE per tower call (hoisted out of the layer loop)
    rows = jax.lax.broadcasted_iota(jnp.int32, (L, L), 0)
    cols = jax.lax.broadcasted_iota(jnp.int32, (L, L), 1)
    neg = jnp.where(cols > rows, -1e9, 0.0).astype(jnp.float32)

    for l in range(n_layers):
        x = _transformer_block(
            x, n_heads, neg,
            ln1g[l], ln1b[l], wqkv[l], bqkv[l], wout[l], bout[l],
            ln2g[l], ln2b[l], wfc[l], bfc[l], wproj[l], bproj[l])

    # EOT row selection: iota mask + sublane reduce (exact, no gather DMA)
    e = eot_ref[pl.program_id(0)]
    sel = jax.lax.broadcasted_iota(jnp.int32, (L, D), 0) == e
    x_eot = jnp.sum(jnp.where(sel, x, 0.0), axis=0, keepdims=True)     # (1, D)

    h = _ln(x_eot, lnf_g[...], lnf_b[...])
    f = jnp.dot(h.astype(jnp.bfloat16), tproj[...],
                preferred_element_type=jnp.float32)
    f_n, nrm = _normalize(f)
    feat_ref[0] = f_n
    norm_ref[0] = nrm


def text_tower(prompts, eot_idx, tp):
    n_cls, L, D = prompts.shape
    vis_dim = tp["text_proj"].shape[1]
    blk = tp["blocks"]
    n_layers = blk["w_qkv"].shape[0]
    kernel = functools.partial(_text_tower_kernel, tp["n_heads"], n_layers)

    grid_spec = pltpu.PrefetchScalarGridSpec(
        num_scalar_prefetch=1, grid=(n_cls,),
        in_specs=[pl.BlockSpec((1, L, D), lambda c, eot: (c, 0, 0)),
                  _rep_spec(tp["pos_emb"].shape)]
                 + [_rep_spec(blk[n].shape) for n in _BLOCK_PARAM_NAMES]
                 + [_rep_spec(tp["lnf_g"].shape), _rep_spec(tp["lnf_b"].shape),
                    _rep_spec(tp["text_proj"].shape)],
        out_specs=(pl.BlockSpec((1, 1, vis_dim), lambda c, eot: (c, 0, 0)),
                   pl.BlockSpec((1, 1, 1), lambda c, eot: (c, 0, 0))))

    feat, nrm = pl.pallas_call(
        kernel,
        out_shape=(jax.ShapeDtypeStruct((n_cls, 1, vis_dim), jnp.float32),
                   jax.ShapeDtypeStruct((n_cls, 1, 1), jnp.float32)),
        grid_spec=grid_spec,
        compiler_params=pltpu.CompilerParams(dimension_semantics=("parallel",)),
    )(eot_idx, prompts, tp["pos_emb"],
      *[blk[n] for n in _BLOCK_PARAM_NAMES],
      tp["lnf_g"], tp["lnf_b"], tp["text_proj"])
    return feat.reshape(n_cls, vis_dim), nrm.reshape(n_cls, 1)


# ----------------------------------------------------------------------------
# model glue (prompt concat, patchify, EOT argmax) — tiny XLA ops
# ----------------------------------------------------------------------------
def prompt_learner_forward(pl_params):
    ctx = pl_params["ctx"]                                   # (n_ctx, D), generic ctx
    n_cls = pl_params["token_prefix"].shape[0]
    ctx = jnp.broadcast_to(ctx[None], (n_cls,) + ctx.shape)  # .unsqueeze/.expand
    return jnp.concatenate(
        [pl_params["token_prefix"], ctx, pl_params["token_suffix"]], axis=1)


def image_encoder(image, vp):
    B, C, H, W = image.shape                                 # NCHW input
    p = vp["patch"]
    gh, gw = H // p, W // p
    patches = image.reshape(B, C, gh, p, gw, p).transpose(0, 2, 4, 1, 3, 5)
    patches = patches.reshape(B, gh * gw, C * p * p).astype(jnp.bfloat16)
    return vision_tower(patches, vp)                         # ((B, vis_dim), (B, 1))


def text_encoder(prompts, tokenized_prompts, tp):
    eot_idx = jnp.argmax(tokenized_prompts, axis=-1).astype(jnp.int32)  # EOT = max id
    return text_tower(prompts, eot_idx, tp)


def custom_clip_forward(params, image, training=True):
    prompts = prompt_learner_forward(params["prompt_learner"])
    image_features, image_norm = image_encoder(image.astype(jnp.float32),
                                               params["visual"])
    text_features, text_norm = text_encoder(prompts, params["tokenized_prompts"],
                                            params["text"])
    if training:   # mirrors `if self.prompt_learner.training:`
        return image_features, text_features, image_norm, text_norm
    return image_features, text_features


# ----------------------------------------------------------------------------
# deterministic synthetic parameters (matmul weights bf16, stacked per layer)
# ----------------------------------------------------------------------------
def init_block_params(key, D):
    hidden = 4 * D
    ks = jax.random.split(key, 4)
    return dict(
        ln1_g=jnp.ones((1, D), jnp.float32), ln1_b=jnp.zeros((1, D), jnp.float32),
        w_qkv=_normal(ks[0], (D, 3 * D), D ** -0.5).astype(jnp.bfloat16),
        b_qkv=jnp.zeros((1, 3 * D), jnp.float32),
        w_out=_normal(ks[1], (D, D), D ** -0.5).astype(jnp.bfloat16),
        b_out=jnp.zeros((1, D), jnp.float32),
        ln2_g=jnp.ones((1, D), jnp.float32), ln2_b=jnp.zeros((1, D), jnp.float32),
        w_fc=_normal(ks[2], (D, hidden), D ** -0.5).astype(jnp.bfloat16),
        b_fc=jnp.zeros((1, hidden), jnp.float32),
        w_proj=_normal(ks[3], (hidden, D), hidden ** -0.5).astype(jnp.bfloat16),
        b_proj=jnp.zeros((1, D), jnp.float32),
    )


def init_tower_blocks(key, D, n_layers):
    blocks = [init_block_params(k, D) for k in jax.random.split(key, n_layers)]
    return {n: jnp.stack([b[n] for b in blocks], axis=0) for n in _BLOCK_PARAM_NAMES}


def init_params(key):
    n_cls, n_ctx, L, vocab = 4, 4, 16, 64
    ctx_dim = width = vis_dim = 128           # lane-dense model width (>=128)
    n_heads, n_layers = 4, 2
    C, img_size, patch = 3, 32, 8
    n_patches = (img_size // patch) ** 2
    seq_v = n_patches + 1

    keys = jax.random.split(key, 16)

    # TODO(synk): clip.tokenize / _Tokenizer and the pretrained CLIP weights
    # are replaced by a deterministic synthetic token table + random params.
    token_table = _normal(keys[0], (vocab, ctx_dim), 0.02)
    SOS, EOT, PLACE = 1, vocab - 1, 3                         # EOT = max id => argmax finds it
    tok = jnp.zeros((n_cls, L), jnp.int32)
    tok = tok.at[:, 0].set(SOS)
    tok = tok.at[:, 1:1 + n_ctx].set(PLACE)
    tok = tok.at[:, 1 + n_ctx].set(jnp.arange(n_cls, dtype=jnp.int32) + 10)
    tok = tok.at[:, 2 + n_ctx].set(EOT)
    embedding = token_table[tok]                              # (n_cls, L, ctx_dim)

    prompt_learner = dict(
        ctx=_normal(keys[1], (n_ctx, ctx_dim), 0.02),         # generic ctx (CSC=False)
        token_prefix=embedding[:, :1, :],                     # SOS embedding
        token_suffix=embedding[:, 1 + n_ctx:, :],             # class + EOT + pad
    )

    text = dict(
        n_heads=n_heads,
        pos_emb=_normal(keys[2], (L, ctx_dim), 0.01),
        blocks=init_tower_blocks(keys[3], ctx_dim, n_layers),
        lnf_g=jnp.ones((1, ctx_dim), jnp.float32),
        lnf_b=jnp.zeros((1, ctx_dim), jnp.float32),
        text_proj=_normal(keys[4], (ctx_dim, vis_dim),
                          ctx_dim ** -0.5).astype(jnp.bfloat16),
    )

    cpp = C * patch * patch
    visual = dict(
        n_heads=n_heads, patch=patch, width=width,
        conv_w=_normal(keys[5], (cpp, width), cpp ** -0.5).astype(jnp.bfloat16),
        cls_emb=_normal(keys[6], (1, width), width ** -0.5),
        pos_emb=_normal(keys[7], (seq_v, width), width ** -0.5),
        ln_pre_g=jnp.ones((1, width), jnp.float32),
        ln_pre_b=jnp.zeros((1, width), jnp.float32),
        blocks=init_tower_blocks(keys[8], width, n_layers),
        ln_post_g=jnp.ones((1, width), jnp.float32),
        ln_post_b=jnp.zeros((1, width), jnp.float32),
        proj=_normal(keys[9], (width, vis_dim), width ** -0.5).astype(jnp.bfloat16),
    )

    return dict(prompt_learner=prompt_learner, tokenized_prompts=tok,
                text=text, visual=visual)


# ----------------------------------------------------------------------------
if __name__ == "__main__":
    key = jax.random.PRNGKey(0)
    k_params, k_img = jax.random.split(key)
    params = init_params(k_params)

    image = jax.random.normal(k_img, (2, 3, 32, 32), dtype=jnp.float32)   # NCHW

    img_f, txt_f, img_n, txt_n = jax.block_until_ready(
        custom_clip_forward(params, image, training=True))

    assert img_f.shape == (2, 128) and txt_f.shape == (4, 128)
    assert img_n.shape == (2, 1) and txt_n.shape == (4, 1)
    assert bool(jnp.all(jnp.isfinite(img_f))) and bool(jnp.all(jnp.isfinite(txt_f)))
    assert bool(jnp.all(jnp.isfinite(img_n))) and bool(jnp.all(jnp.isfinite(txt_n)))
    # normalized features must be unit norm
    assert bool(jnp.allclose(jnp.linalg.norm(img_f, axis=-1), 1.0, atol=1e-4))
    assert bool(jnp.allclose(jnp.linalg.norm(txt_f, axis=-1), 1.0, atol=1e-4))

    print("KERNEL_OK")
</pallas_src>

<mosaic_0001>
module attributes {stable_mosaic.version = 11 : i64} {
  func.func @_vision_tower_kernel(%arg0: i32, %arg1: memref<1x16x192xbf16, #tpu.memory_space<vmem>>, %arg2: memref<192x128xbf16, #tpu.memory_space<vmem>>, %arg3: memref<1x128xf32, #tpu.memory_space<vmem>>, %arg4: memref<17x128xf32, #tpu.memory_space<vmem>>, %arg5: memref<1x128xf32, #tpu.memory_space<vmem>>, %arg6: memref<1x128xf32, #tpu.memory_space<vmem>>, %arg7: memref<2x1x128xf32, #tpu.memory_space<vmem>>, %arg8: memref<2x1x128xf32, #tpu.memory_space<vmem>>, %arg9: memref<2x128x384xbf16, #tpu.memory_space<vmem>>, %arg10: memref<2x1x384xf32, #tpu.memory_space<vmem>>, %arg11: memref<2x128x128xbf16, #tpu.memory_space<vmem>>, %arg12: memref<2x1x128xf32, #tpu.memory_space<vmem>>, %arg13: memref<2x1x128xf32, #tpu.memory_space<vmem>>, %arg14: memref<2x1x128xf32, #tpu.memory_space<vmem>>, %arg15: memref<2x128x512xbf16, #tpu.memory_space<vmem>>, %arg16: memref<2x1x512xf32, #tpu.memory_space<vmem>>, %arg17: memref<2x512x128xbf16, #tpu.memory_space<vmem>>, %arg18: memref<2x1x128xf32, #tpu.memory_space<vmem>>, %arg19: memref<1x128xf32, #tpu.memory_space<vmem>>, %arg20: memref<1x128xf32, #tpu.memory_space<vmem>>, %arg21: memref<128x128xbf16, #tpu.memory_space<vmem>>, %arg22: memref<1x1x128xf32, #tpu.memory_space<vmem>>, %arg23: memref<1x1x1xf32, #tpu.memory_space<vmem>>) attributes {dimension_semantics = [#tpu.dimension_semantics<parallel>], iteration_bounds = array<i64: 2>, scalar_prefetch = 0 : i64, scratch_operands = 0 : i64, tpu.core_type = #tpu.core_type<tc>, window_params = [{transform_indices = @transform_0, window_bounds = array<i64: 1, 16, 192>}, {pipeline_mode = #tpu.pipeline_mode<synchronous>, transform_indices = @transform_1, window_bounds = array<i64: 192, 128>}, {pipeline_mode = #tpu.pipeline_mode<synchronous>, transform_indices = @transform_2, window_bounds = array<i64: 1, 128>}, {pipeline_mode = #tpu.pipeline_mode<synchronous>, transform_indices = @transform_3, window_bounds = array<i64: 17, 128>}, {pipeline_mode = #tpu.pipeline_mode<synchronous>, transform_indices = @transform_4, window_bounds = array<i64: 1, 128>}, {pipeline_mode = #tpu.pipeline_mode<synchronous>, transform_indices = @transform_5, window_bounds = array<i64: 1, 128>}, {pipeline_mode = #tpu.pipeline_mode<synchronous>, transform_indices = @transform_6, window_bounds = array<i64: 2, 1, 128>}, {pipeline_mode = #tpu.pipeline_mode<synchronous>, transform_indices = @transform_7, window_bounds = array<i64: 2, 1, 128>}, {pipeline_mode = #tpu.pipeline_mode<synchronous>, transform_indices = @transform_8, window_bounds = array<i64: 2, 128, 384>}, {pipeline_mode = #tpu.pipeline_mode<synchronous>, transform_indices = @transform_9, window_bounds = array<i64: 2, 1, 384>}, {pipeline_mode = #tpu.pipeline_mode<synchronous>, transform_indices = @transform_10, window_bounds = array<i64: 2, 128, 128>}, {pipeline_mode = #tpu.pipeline_mode<synchronous>, transform_indices = @transform_11, window_bounds = array<i64: 2, 1, 128>}, {pipeline_mode = #tpu.pipeline_mode<synchronous>, transform_indices = @transform_12, window_bounds = array<i64: 2, 1, 128>}, {pipeline_mode = #tpu.pipeline_mode<synchronous>, transform_indices = @transform_13, window_bounds = array<i64: 2, 1, 128>}, {pipeline_mode = #tpu.pipeline_mode<synchronous>, transform_indices = @transform_14, window_bounds = array<i64: 2, 128, 512>}, {pipeline_mode = #tpu.pipeline_mode<synchronous>, transform_indices = @transform_15, window_bounds = array<i64: 2, 1, 512>}, {pipeline_mode = #tpu.pipeline_mode<synchronous>, transform_indices = @transform_16, window_bounds = array<i64: 2, 512, 128>}, {pipeline_mode = #tpu.pipeline_mode<synchronous>, transform_indices = @transform_17, window_bounds = array<i64: 2, 1, 128>}, {pipeline_mode = #tpu.pipeline_mode<synchronous>, transform_indices = @transform_18, window_bounds = array<i64: 1, 128>}, {pipeline_mode = #tpu.pipeline_mode<synchronous>, transform_indices = @transform_19, window_bounds = array<i64: 1, 128>}, {pipeline_mode = #tpu.pipeline_mode<synchronous>, transform_indices = @transform_20, window_bounds = array<i64: 128, 128>}, {transform_indices = @transform_21, window_bounds = array<i64: 1, 1, 128>}, {transform_indices = @transform_22, window_bounds = array<i64: 1, 1, 1>}]} {
    %c0 = arith.constant 0 : index
    %c0_0 = arith.constant 0 : index
    %c0_1 = arith.constant 0 : index
    %0 = vector.load %arg1[%c0, %c0_0, %c0_1] : memref<1x16x192xbf16, #tpu.memory_space<vmem>>, vector<1x16x192xbf16>
    %1 = vector.shape_cast %0 : vector<1x16x192xbf16> to vector<16x192xbf16>
    %c0_2 = arith.constant 0 : index
    %c0_3 = arith.constant 0 : index
    %2 = vector.load %arg2[%c0_2, %c0_3] : memref<192x128xbf16, #tpu.memory_space<vmem>>, vector<192x128xbf16>
    %cst = arith.constant dense<0.000000e+00> : vector<16x128xf32>
    %3 = tpu.matmul %1, %2, %cst {dimension_numbers = #tpu.dot_dimension_numbers<[1], [0], [0], [1], [0, 0, 1, 1], [], []>} : vector<16x192xbf16>, vector<192x128xbf16>, vector<16x128xf32> -> vector<16x128xf32>
    %c0_4 = arith.constant 0 : index
    %c0_5 = arith.constant 0 : index
    %4 = vector.load %arg3[%c0_4, %c0_5] : memref<1x128xf32, #tpu.memory_space<vmem>>, vector<1x128xf32>
    %5 = tpu.concatenate %4, %3 in 0 : vector<1x128xf32>, vector<16x128xf32> -> vector<17x128xf32>
    %c0_6 = arith.constant 0 : index
    %c0_7 = arith.constant 0 : index
    %6 = vector.load %arg4[%c0_6, %c0_7] : memref<17x128xf32, #tpu.memory_space<vmem>>, vector<17x128xf32>
    %7 = arith.addf %5, %6 : vector<17x128xf32>
    %c0_8 = arith.constant 0 : index
    %c0_9 = arith.constant 0 : index
    %8 = vector.load %arg5[%c0_8, %c0_9] : memref<1x128xf32, #tpu.memory_space<vmem>>, vector<1x128xf32>
    %c0_10 = arith.constant 0 : index
    %c0_11 = arith.constant 0 : index
    %9 = vector.load %arg6[%c0_10, %c0_11] : memref<1x128xf32, #tpu.memory_space<vmem>>, vector<1x128xf32>
    %cst_12 = arith.constant dense<0.000000e+00> : vector<17xf32>
    %10 = vector.multi_reduction <add>, %7, %cst_12 [1] : vector<17x128xf32> to vector<17xf32>
    %11 = vector.shape_cast %10 : vector<17xf32> to vector<17x1xf32>
    %cst_13 = arith.constant 1.280000e+02 : f32
    %12 = vector.broadcast %cst_13 : f32 to vector<17x1xf32>
    %13 = arith.divf %11, %12 : vector<17x1xf32>
    %14 = vector.broadcast %13 : vector<17x1xf32> to vector<17x128xf32>
    %15 = arith.subf %7, %14 : vector<17x128xf32>
    %16 = arith.mulf %15, %15 : vector<17x128xf32>
    %cst_14 = arith.constant dense<0.000000e+00> : vector<17xf32>
    %17 = vector.multi_reduction <add>, %16, %cst_14 [1] : vector<17x128xf32> to vector<17xf32>
    %18 = vector.shape_cast %17 : vector<17xf32> to vector<17x1xf32>
    %cst_15 = arith.constant 1.280000e+02 : f32
    %19 = vector.broadcast %cst_15 : f32 to vector<17x1xf32>
    %20 = arith.divf %18, %19 : vector<17x1xf32>
    %cst_16 = arith.constant 9.99999974E-6 : f32
    %21 = vector.broadcast %cst_16 : f32 to vector<17x1xf32>
    %22 = arith.addf %20, %21 : vector<17x1xf32>
    %23 = math.rsqrt %22 : vector<17x1xf32>
    %24 = vector.broadcast %23 : vector<17x1xf32> to vector<17x128xf32>
    %25 = arith.mulf %15, %24 : vector<17x128xf32>
    %26 = vector.broadcast %8 : vector<1x128xf32> to vector<17x128xf32>
    %27 = arith.mulf %25, %26 : vector<17x128xf32>
    %28 = vector.broadcast %9 : vector<1x128xf32> to vector<17x128xf32>
    %29 = arith.addf %27, %28 : vector<17x128xf32>
    %c0_17 = arith.constant 0 : index
    %c0_18 = arith.constant 0 : index
    %c0_19 = arith.constant 0 : index
    %30 = vector.load %arg7[%c0_17, %c0_18, %c0_19] : memref<2x1x128xf32, #tpu.memory_space<vmem>>, vector<1x1x128xf32>
    %31 = vector.shape_cast %30 : vector<1x1x128xf32> to vector<1x128xf32>
    %c0_20 = arith.constant 0 : index
    %c0_21 = arith.constant 0 : index
    %c0_22 = arith.constant 0 : index
    %32 = vector.load %arg8[%c0_20, %c0_21, %c0_22] : memref<2x1x128xf32, #tpu.memory_space<vmem>>, vector<1x1x128xf32>
    %33 = vector.shape_cast %32 : vector<1x1x128xf32> to vector<1x128xf32>
    %c0_23 = arith.constant 0 : index
    %c0_24 = arith.constant 0 : index
    %c0_25 = arith.constant 0 : index
    %34 = vector.load %arg9[%c0_23, %c0_24, %c0_25] : memref<2x128x384xbf16, #tpu.memory_space<vmem>>, vector<1x128x384xbf16>
    %35 = vector.shape_cast %34 : vector<1x128x384xbf16> to vector<128x384xbf16>
    %c0_26 = arith.constant 0 : index
    %c0_27 = arith.constant 0 : index
    %c0_28 = arith.constant 0 : index
    %36 = vector.load %arg10[%c0_26, %c0_27, %c0_28] : memref<2x1x384xf32, #tpu.memory_space<vmem>>, vector<1x1x384xf32>
    %37 = vector.shape_cast %36 : vector<1x1x384xf32> to vector<1x384xf32>
    %c0_29 = arith.constant 0 : index
    %c0_30 = arith.constant 0 : index
    %c0_31 = arith.constant 0 : index
    %38 = vector.load %arg11[%c0_29, %c0_30, %c0_31] : memref<2x128x128xbf16, #tpu.memory_space<vmem>>, vector<1x128x128xbf16>
    %39 = vector.shape_cast %38 : vector<1x128x128xbf16> to vector<128x128xbf16>
    %c0_32 = arith.constant 0 : index
    %c0_33 = arith.constant 0 : index
    %c0_34 = arith.constant 0 : index
    %40 = vector.load %arg12[%c0_32, %c0_33, %c0_34] : memref<2x1x128xf32, #tpu.memory_space<vmem>>, vector<1x1x128xf32>
    %41 = vector.shape_cast %40 : vector<1x1x128xf32> to vector<1x128xf32>
    %c0_35 = arith.constant 0 : index
    %c0_36 = arith.constant 0 : index
    %c0_37 = arith.constant 0 : index
    %42 = vector.load %arg13[%c0_35, %c0_36, %c0_37] : memref<2x1x128xf32, #tpu.memory_space<vmem>>, vector<1x1x128xf32>
    %43 = vector.shape_cast %42 : vector<1x1x128xf32> to vector<1x128xf32>
    %c0_38 = arith.constant 0 : index
    %c0_39 = arith.constant 0 : index
    %c0_40 = arith.constant 0 : index
    %44 = vector.load %arg14[%c0_38, %c0_39, %c0_40] : memref<2x1x128xf32, #tpu.memory_space<vmem>>, vector<1x1x128xf32>
    %45 = vector.shape_cast %44 : vector<1x1x128xf32> to vector<1x128xf32>
    %c0_41 = arith.constant 0 : index
    %c0_42 = arith.constant 0 : index
    %c0_43 = arith.constant 0 : index
    %46 = vector.load %arg15[%c0_41, %c0_42, %c0_43] : memref<2x128x512xbf16, #tpu.memory_space<vmem>>, vector<1x128x512xbf16>
    %47 = vector.shape_cast %46 : vector<1x128x512xbf16> to vector<128x512xbf16>
    %c0_44 = arith.constant 0 : index
    %c0_45 = arith.constant 0 : index
    %c0_46 = arith.constant 0 : index
    %48 = vector.load %arg16[%c0_44, %c0_45, %c0_46] : memref<2x1x512xf32, #tpu.memory_space<vmem>>, vector<1x1x512xf32>
    %49 = vector.shape_cast %48 : vector<1x1x512xf32> to vector<1x512xf32>
    %c0_47 = arith.constant 0 : index
    %c0_48 = arith.constant 0 : index
    %c0_49 = arith.constant 0 : index
    %50 = vector.load %arg17[%c0_47, %c0_48, %c0_49] : memref<2x512x128xbf16, #tpu.memory_space<vmem>>, vector<1x512x128xbf16>
    %51 = vector.shape_cast %50 : vector<1x512x128xbf16> to vector<512x128xbf16>
    %c0_50 = arith.constant 0 : index
    %c0_51 = arith.constant 0 : index
    %c0_52 = arith.constant 0 : index
    %52 = vector.load %arg18[%c0_50, %c0_51, %c0_52] : memref<2x1x128xf32, #tpu.memory_space<vmem>>, vector<1x1x128xf32>
    %53 = vector.shape_cast %52 : vector<1x1x128xf32> to vector<1x128xf32>
    %cst_53 = arith.constant dense<0.000000e+00> : vector<17xf32>
    %54 = vector.multi_reduction <add>, %29, %cst_53 [1] : vector<17x128xf32> to vector<17xf32>
    %55 = vector.shape_cast %54 : vector<17xf32> to vector<17x1xf32>
    %cst_54 = arith.constant 1.280000e+02 : f32
    %56 = vector.broadcast %cst_54 : f32 to vector<17x1xf32>
    %57 = arith.divf %55, %56 : vector<17x1xf32>
    %58 = vector.broadcast %57 : vector<17x1xf32> to vector<17x128xf32>
    %59 = arith.subf %29, %58 : vector<17x128xf32>
    %60 = arith.mulf %59, %59 : vector<17x128xf32>
    %cst_55 = arith.constant dense<0.000000e+00> : vector<17xf32>
    %61 = vector.multi_reduction <add>, %60, %cst_55 [1] : vector<17x128xf32> to vector<17xf32>
    %62 = vector.shape_cast %61 : vector<17xf32> to vector<17x1xf32>
    %cst_56 = arith.constant 1.280000e+02 : f32
    %63 = vector.broadcast %cst_56 : f32 to vector<17x1xf32>
    %64 = arith.divf %62, %63 : vector<17x1xf32>
    %cst_57 = arith.constant 9.99999974E-6 : f32
    %65 = vector.broadcast %cst_57 : f32 to vector<17x1xf32>
    %66 = arith.addf %64, %65 : vector<17x1xf32>
    %67 = math.rsqrt %66 : vector<17x1xf32>
    %68 = vector.broadcast %67 : vector<17x1xf32> to vector<17x128xf32>
    %69 = arith.mulf %59, %68 : vector<17x128xf32>
    %70 = vector.broadcast %31 : vector<1x128xf32> to vector<17x128xf32>
    %71 = arith.mulf %69, %70 : vector<17x128xf32>
    %72 = vector.broadcast %33 : vector<1x128xf32> to vector<17x128xf32>
    %73 = arith.addf %71, %72 : vector<17x128xf32>
    %74 = arith.truncf %73 : vector<17x128xf32> to vector<17x128xbf16>
    %cst_58 = arith.constant dense<0.000000e+00> : vector<17x384xf32>
    %75 = tpu.matmul %74, %35, %cst_58 {dimension_numbers = #tpu.dot_dimension_numbers<[1], [0], [0], [1], [0, 0, 1, 1], [], []>} : vector<17x128xbf16>, vector<128x384xbf16>, vector<17x384xf32> -> vector<17x384xf32>
    %76 = vector.broadcast %37 : vector<1x384xf32> to vector<17x384xf32>
    %77 = arith.addf %75, %76 : vector<17x384xf32>
    %78 = vector.extract_strided_slice %77 {offsets = [0, 0], sizes = [17, 32], strides = [1, 1]} : vector<17x384xf32> to vector<17x32xf32>
    %79 = arith.truncf %78 : vector<17x32xf32> to vector<17x32xbf16>
    %80 = vector.extract_strided_slice %77 {offsets = [0, 128], sizes = [17, 32], strides = [1, 1]} : vector<17x384xf32> to vector<17x32xf32>
    %81 = arith.truncf %80 : vector<17x32xf32> to vector<17x32xbf16>
    %82 = vector.extract_strided_slice %77 {offsets = [0, 256], sizes = [17, 32], strides = [1, 1]} : vector<17x384xf32> to vector<17x32xf32>
    %83 = arith.truncf %82 : vector<17x32xf32> to vector<17x32xbf16>
    %cst_59 = arith.constant dense<0.000000e+00> : vector<17x17xf32>
    %84 = tpu.matmul %79, %81, %cst_59 {dimension_numbers = #tpu.dot_dimension_numbers<[1], [1], [0], [0], [0, 0, 1, 0], [], []>} : vector<17x32xbf16>, vector<17x32xbf16>, vector<17x17xf32> -> vector<17x17xf32>
    %cst_60 = arith.constant 0.176776692 : f32
    %85 = vector.broadcast %cst_60 : f32 to vector<17x17xf32>
    %86 = arith.mulf %84, %85 : vector<17x17xf32>
    %cst_61 = arith.constant dense<0xFF800000> : vector<17xf32>
    %87 = vector.multi_reduction <maximumf>, %86, %cst_61 [1] : vector<17x17xf32> to vector<17xf32>
    %88 = vector.shape_cast %87 : vector<17xf32> to vector<17x1xf32>
    %89 = vector.broadcast %88 : vector<17x1xf32> to vector<17x17xf32>
    %90 = arith.subf %86, %89 : vector<17x17xf32>
    %91 = math.exp %90 : vector<17x17xf32>
    %cst_62 = arith.constant dense<0.000000e+00> : vector<17xf32>
    %92 = vector.multi_reduction <add>, %91, %cst_62 [1] : vector<17x17xf32> to vector<17xf32>
    %93 = vector.shape_cast %92 : vector<17xf32> to vector<17x1xf32>
    %94 = arith.truncf %91 : vector<17x17xf32> to vector<17x17xbf16>
    %cst_63 = arith.constant dense<0.000000e+00> : vector<17x32xf32>
    %95 = tpu.matmul %94, %83, %cst_63 {dimension_numbers = #tpu.dot_dimension_numbers<[1], [0], [0], [1], [0, 0, 1, 1], [], []>} : vector<17x17xbf16>, vector<17x32xbf16>, vector<17x32xf32> -> vector<17x32xf32>
    %96 = tpu.reciprocal %93 {approx = true} : vector<17x1xf32> -> vector<17x1xf32>
    %97 = vector.broadcast %96 : vector<17x1xf32> to vector<17x32xf32>
    %98 = arith.mulf %95, %97 : vector<17x32xf32>
    %99 = vector.extract_strided_slice %77 {offsets = [0, 32], sizes = [17, 32], strides = [1, 1]} : vector<17x384xf32> to vector<17x32xf32>
    %100 = arith.truncf %99 : vector<17x32xf32> to vector<17x32xbf16>
    %101 = vector.extract_strided_slice %77 {offsets = [0, 160], sizes = [17, 32], strides = [1, 1]} : vector<17x384xf32> to vector<17x32xf32>
    %102 = arith.truncf %101 : vector<17x32xf32> to vector<17x32xbf16>
    %103 = vector.extract_strided_slice %77 {offsets = [0, 288], sizes = [17, 32], strides = [1, 1]} : vector<17x384xf32> to vector<17x32xf32>
    %104 = arith.truncf %103 : vector<17x32xf32> to vector<17x32xbf16>
    %cst_64 = arith.constant dense<0.000000e+00> : vector<17x17xf32>
    %105 = tpu.matmul %100, %102, %cst_64 {dimension_numbers = #tpu.dot_dimension_numbers<[1], [1], [0], [0], [0, 0, 1, 0], [], []>} : vector<17x32xbf16>, vector<17x32xbf16>, vector<17x17xf32> -> vector<17x17xf32>
    %cst_65 = arith.constant 0.176776692 : f32
    %106 = vector.broadcast %cst_65 : f32 to vector<17x17xf32>
    %107 = arith.mulf %105, %106 : vector<17x17xf32>
    %cst_66 = arith.constant dense<0xFF800000> : vector<17xf32>
    %108 = vector.multi_reduction <maximumf>, %107, %cst_66 [1] : vector<17x17xf32> to vector<17xf32>
    %109 = vector.shape_cast %108 : vector<17xf32> to vector<17x1xf32>
    %110 = vector.broadcast %109 : vector<17x1xf32> to vector<17x17xf32>
    %111 = arith.subf %107, %110 : vector<17x17xf32>
    %112 = math.exp %111 : vector<17x17xf32>
    %cst_67 = arith.constant dense<0.000000e+00> : vector<17xf32>
    %113 = vector.multi_reduction <add>, %112, %cst_67 [1] : vector<17x17xf32> to vector<17xf32>
    %114 = vector.shape_cast %113 : vector<17xf32> to vector<17x1xf32>
    %115 = arith.truncf %112 : vector<17x17xf32> to vector<17x17xbf16>
    %cst_68 = arith.constant dense<0.000000e+00> : vector<17x32xf32>
    %116 = tpu.matmul %115, %104, %cst_68 {dimension_numbers = #tpu.dot_dimension_numbers<[1], [0], [0], [1], [0, 0, 1, 1], [], []>} : vector<17x17xbf16>, vector<17x32xbf16>, vector<17x32xf32> -> vector<17x32xf32>
    %117 = tpu.reciprocal %114 {approx = true} : vector<17x1xf32> -> vector<17x1xf32>
    %118 = vector.broadcast %117 : vector<17x1xf32> to vector<17x32xf32>
    %119 = arith.mulf %116, %118 : vector<17x32xf32>
    %120 = vector.extract_strided_slice %77 {offsets = [0, 64], sizes = [17, 32], strides = [1, 1]} : vector<17x384xf32> to vector<17x32xf32>
    %121 = arith.truncf %120 : vector<17x32xf32> to vector<17x32xbf16>
    %122 = vector.extract_strided_slice %77 {offsets = [0, 192], sizes = [17, 32], strides = [1, 1]} : vector<17x384xf32> to vector<17x32xf32>
    %123 = arith.truncf %122 : vector<17x32xf32> to vector<17x32xbf16>
    %124 = vector.extract_strided_slice %77 {offsets = [0, 320], sizes = [17, 32], strides = [1, 1]} : vector<17x384xf32> to vector<17x32xf32>
    %125 = arith.truncf %124 : vector<17x32xf32> to vector<17x32xbf16>
    %cst_69 = arith.constant dense<0.000000e+00> : vector<17x17xf32>
    %126 = tpu.matmul %121, %123, %cst_69 {dimension_numbers = #tpu.dot_dimension_numbers<[1], [1], [0], [0], [0, 0, 1, 0], [], []>} : vector<17x32xbf16>, vector<17x32xbf16>, vector<17x17xf32> -> vector<17x17xf32>
    %cst_70 = arith.constant 0.176776692 : f32
    %127 = vector.broadcast %cst_70 : f32 to vector<17x17xf32>
    %128 = arith.mulf %126, %127 : vector<17x17xf32>
    %cst_71 = arith.constant dense<0xFF800000> : vector<17xf32>
    %129 = vector.multi_reduction <maximumf>, %128, %cst_71 [1] : vector<17x17xf32> to vector<17xf32>
    %130 = vector.shape_cast %129 : vector<17xf32> to vector<17x1xf32>
    %131 = vector.broadcast %130 : vector<17x1xf32> to vector<17x17xf32>
    %132 = arith.subf %128, %131 : vector<17x17xf32>
    %133 = math.exp %132 : vector<17x17xf32>
    %cst_72 = arith.constant dense<0.000000e+00> : vector<17xf32>
    %134 = vector.multi_reduction <add>, %133, %cst_72 [1] : vector<17x17xf32> to vector<17xf32>
    %135 = vector.shape_cast %134 : vector<17xf32> to vector<17x1xf32>
    %136 = arith.truncf %133 : vector<17x17xf32> to vector<17x17xbf16>
    %cst_73 = arith.constant dense<0.000000e+00> : vector<17x32xf32>
    %137 = tpu.matmul %136, %125, %cst_73 {dimension_numbers = #tpu.dot_dimension_numbers<[1], [0], [0], [1], [0, 0, 1, 1], [], []>} : vector<17x17xbf16>, vector<17x32xbf16>, vector<17x32xf32> -> vector<17x32xf32>
    %138 = tpu.reciprocal %135 {approx = true} : vector<17x1xf32> -> vector<17x1xf32>
    %139 = vector.broadcast %138 : vector<17x1xf32> to vector<17x32xf32>
    %140 = arith.mulf %137, %139 : vector<17x32xf32>
    %141 = vector.extract_strided_slice %77 {offsets = [0, 96], sizes = [17, 32], strides = [1, 1]} : vector<17x384xf32> to vector<17x32xf32>
    %142 = arith.truncf %141 : vector<17x32xf32> to vector<17x32xbf16>
    %143 = vector.extract_strided_slice %77 {offsets = [0, 224], sizes = [17, 32], strides = [1, 1]} : vector<17x384xf32> to vector<17x32xf32>
    %144 = arith.truncf %143 : vector<17x32xf32> to vector<17x32xbf16>
    %145 = vector.extract_strided_slice %77 {offsets = [0, 352], sizes = [17, 32], strides = [1, 1]} : vector<17x384xf32> to vector<17x32xf32>
    %146 = arith.truncf %145 : vector<17x32xf32> to vector<17x32xbf16>
    %cst_74 = arith.constant dense<0.000000e+00> : vector<17x17xf32>
    %147 = tpu.matmul %142, %144, %cst_74 {dimension_numbers = #tpu.dot_dimension_numbers<[1], [1], [0], [0], [0, 0, 1, 0], [], []>} : vector<17x32xbf16>, vector<17x32xbf16>, vector<17x17xf32> -> vector<17x17xf32>
    %cst_75 = arith.constant 0.176776692 : f32
    %148 = vector.broadcast %cst_75 : f32 to vector<17x17xf32>
    %149 = arith.mulf %147, %148 : vector<17x17xf32>
    %cst_76 = arith.constant dense<0xFF800000> : vector<17xf32>
    %150 = vector.multi_reduction <maximumf>, %149, %cst_76 [1] : vector<17x17xf32> to vector<17xf32>
    %151 = vector.shape_cast %150 : vector<17xf32> to vector<17x1xf32>
    %152 = vector.broadcast %151 : vector<17x1xf32> to vector<17x17xf32>
    %153 = arith.subf %149, %152 : vector<17x17xf32>
    %154 = math.exp %153 : vector<17x17xf32>
    %cst_77 = arith.constant dense<0.000000e+00> : vector<17xf32>
    %155 = vector.multi_reduction <add>, %154, %cst_77 [1] : vector<17x17xf32> to vector<17xf32>
    %156 = vector.shape_cast %155 : vector<17xf32> to vector<17x1xf32>
    %157 = arith.truncf %154 : vector<17x17xf32> to vector<17x17xbf16>
    %cst_78 = arith.constant dense<0.000000e+00> : vector<17x32xf32>
    %158 = tpu.matmul %157, %146, %cst_78 {dimension_numbers = #tpu.dot_dimension_numbers<[1], [0], [0], [1], [0, 0, 1, 1], [], []>} : vector<17x17xbf16>, vector<17x32xbf16>, vector<17x32xf32> -> vector<17x32xf32>
    %159 = tpu.reciprocal %156 {approx = true} : vector<17x1xf32> -> vector<17x1xf32>
    %160 = vector.broadcast %159 : vector<17x1xf32> to vector<17x32xf32>
    %161 = arith.mulf %158, %160 : vector<17x32xf32>
    %162 = tpu.concatenate %98, %119, %140, %161 in 1 : vector<17x32xf32>, vector<17x32xf32>, vector<17x32xf32>, vector<17x32xf32> -> vector<17x128xf32>
    %163 = arith.truncf %162 : vector<17x128xf32> to vector<17x128xbf16>
    %cst_79 = arith.constant dense<0.000000e+00> : vector<17x128xf32>
    %164 = tpu.matmul %163, %39, %cst_79 {dimension_numbers = #tpu.dot_dimension_numbers<[1], [0], [0], [1], [0, 0, 1, 1], [], []>} : vector<17x128xbf16>, vector<128x128xbf16>, vector<17x128xf32> -> vector<17x128xf32>
    %165 = arith.addf %29, %164 : vector<17x128xf32>
    %166 = vector.broadcast %41 : vector<1x128xf32> to vector<17x128xf32>
    %167 = arith.addf %165, %166 : vector<17x128xf32>
    %cst_80 = arith.constant dense<0.000000e+00> : vector<17xf32>
    %168 = vector.multi_reduction <add>, %167, %cst_80 [1] : vector<17x128xf32> to vector<17xf32>
    %169 = vector.shape_cast %168 : vector<17xf32> to vector<17x1xf32>
    %cst_81 = arith.constant 1.280000e+02 : f32
    %170 = vector.broadcast %cst_81 : f32 to vector<17x1xf32>
    %171 = arith.divf %169, %170 : vector<17x1xf32>
    %172 = vector.broadcast %171 : vector<17x1xf32> to vector<17x128xf32>
    %173 = arith.subf %167, %172 : vector<17x128xf32>
    %174 = arith.mulf %173, %173 : vector<17x128xf32>
    %cst_82 = arith.constant dense<0.000000e+00> : vector<17xf32>
    %175 = vector.multi_reduction <add>, %174, %cst_82 [1] : vector<17x128xf32> to vector<17xf32>
    %176 = vector.shape_cast %175 : vector<17xf32> to vector<17x1xf32>
    %cst_83 = arith.constant 1.280000e+02 : f32
    %177 = vector.broadcast %cst_83 : f32 to vector<17x1xf32>
    %178 = arith.divf %176, %177 : vector<17x1xf32>
    %cst_84 = arith.constant 9.99999974E-6 : f32
    %179 = vector.broadcast %cst_84 : f32 to vector<17x1xf32>
    %180 = arith.addf %178, %179 : vector<17x1xf32>
    %181 = math.rsqrt %180 : vector<17x1xf32>
    %182 = vector.broadcast %181 : vector<17x1xf32> to vector<17x128xf32>
    %183 = arith.mulf %173, %182 : vector<17x128xf32>
    %184 = vector.broadcast %43 : vector<1x128xf32> to vector<17x128xf32>
    %185 = arith.mulf %183, %184 : vector<17x128xf32>
    %186 = vector.broadcast %45 : vector<1x128xf32> to vector<17x128xf32>
    %187 = arith.addf %185, %186 : vector<17x128xf32>
    %188 = arith.truncf %187 : vector<17x128xf32> to vector<17x128xbf16>
    %cst_85 = arith.constant dense<0.000000e+00> : vector<17x512xf32>
    %189 = tpu.matmul %188, %47, %cst_85 {dimension_numbers = #tpu.dot_dimension_numbers<[1], [0], [0], [1], [0, 0, 1, 1], [], []>} : vector<17x128xbf16>, vector<128x512xbf16>, vector<17x512xf32> -> vector<17x512xf32>
    %190 = vector.broadcast %49 : vector<1x512xf32> to vector<17x512xf32>
    %191 = arith.addf %189, %190 : vector<17x512xf32>
    %cst_86 = arith.constant 1.702000e+00 : f32
    %192 = vector.broadcast %cst_86 : f32 to vector<17x512xf32>
    %193 = arith.mulf %192, %191 : vector<17x512xf32>
    %194 = arith.negf %193 : vector<17x512xf32>
    %195 = math.exp %194 : vector<17x512xf32>
    %cst_87 = arith.constant 1.000000e+00 : f32
    %196 = vector.broadcast %cst_87 : f32 to vector<17x512xf32>
    %197 = arith.addf %196, %195 : vector<17x512xf32>
    %198 = arith.divf %196, %197 : vector<17x512xf32>
    %199 = arith.mulf %191, %198 : vector<17x512xf32>
    %200 = arith.truncf %199 : vector<17x512xf32> to vector<17x512xbf16>
    %cst_88 = arith.constant dense<0.000000e+00> : vector<17x128xf32>
    %201 = tpu.matmul %200, %51, %cst_88 {dimension_numbers = #tpu.dot_dimension_numbers<[1], [0], [0], [1], [0, 0, 1, 1], [], []>} : vector<17x512xbf16>, vector<512x128xbf16>, vector<17x128xf32> -> vector<17x128xf32>
    %202 = arith.addf %167, %201 : vector<17x128xf32>
    %203 = vector.broadcast %53 : vector<1x128xf32> to vector<17x128xf32>
    %204 = arith.addf %202, %203 : vector<17x128xf32>
    %c1 = arith.constant 1 : index
    %c0_89 = arith.constant 0 : index
    %c0_90 = arith.constant 0 : index
    %205 = vector.load %arg7[%c1, %c0_89, %c0_90] : memref<2x1x128xf32, #tpu.memory_space<vmem>>, vector<1x1x128xf32>
    %206 = vector.shape_cast %205 : vector<1x1x128xf32> to vector<1x128xf32>
    %c1_91 = arith.constant 1 : index
    %c0_92 = arith.constant 0 : index
    %c0_93 = arith.constant 0 : index
    %207 = vector.load %arg8[%c1_91, %c0_92, %c0_93] : memref<2x1x128xf32, #tpu.memory_space<vmem>>, vector<1x1x128xf32>
    %208 = vector.shape_cast %207 : vector<1x1x128xf32> to vector<1x128xf32>
    %c1_94 = arith.constant 1 : index
    %c0_95 = arith.constant 0 : index
    %c0_96 = arith.constant 0 : index
    %209 = vector.load %arg9[%c1_94, %c0_95, %c0_96] : memref<2x128x384xbf16, #tpu.memory_space<vmem>>, vector<1x128x384xbf16>
    %210 = vector.shape_cast %209 : vector<1x128x384xbf16> to vector<128x384xbf16>
    %c1_97 = arith.constant 1 : index
    %c0_98 = arith.constant 0 : index
    %c0_99 = arith.constant 0 : index
    %211 = vector.load %arg10[%c1_97, %c0_98, %c0_99] : memref<2x1x384xf32, #tpu.memory_space<vmem>>, vector<1x1x384xf32>
    %212 = vector.shape_cast %211 : vector<1x1x384xf32> to vector<1x384xf32>
    %c1_100 = arith.constant 1 : index
    %c0_101 = arith.constant 0 : index
    %c0_102 = arith.constant 0 : index
    %213 = vector.load %arg11[%c1_100, %c0_101, %c0_102] : memref<2x128x128xbf16, #tpu.memory_space<vmem>>, vector<1x128x128xbf16>
    %214 = vector.shape_cast %213 : vector<1x128x128xbf16> to vector<128x128xbf16>
    %c1_103 = arith.constant 1 : index
    %c0_104 = arith.constant 0 : index
    %c0_105 = arith.constant 0 : index
    %215 = vector.load %arg12[%c1_103, %c0_104, %c0_105] : memref<2x1x128xf32, #tpu.memory_space<vmem>>, vector<1x1x128xf32>
    %216 = vector.shape_cast %215 : vector<1x1x128xf32> to vector<1x128xf32>
    %c1_106 = arith.constant 1 : index
    %c0_107 = arith.constant 0 : index
    %c0_108 = arith.constant 0 : index
    %217 = vector.load %arg13[%c1_106, %c0_107, %c0_108] : memref<2x1x128xf32, #tpu.memory_space<vmem>>, vector<1x1x128xf32>
    %218 = vector.shape_cast %217 : vector<1x1x128xf32> to vector<1x128xf32>
    %c1_109 = arith.constant 1 : index
    %c0_110 = arith.constant 0 : index
    %c0_111 = arith.constant 0 : index
    %219 = vector.load %arg14[%c1_109, %c0_110, %c0_111] : memref<2x1x128xf32, #tpu.memory_space<vmem>>, vector<1x1x128xf32>
    %220 = vector.shape_cast %219 : vector<1x1x128xf32> to vector<1x128xf32>
    %c1_112 = arith.constant 1 : index
    %c0_113 = arith.constant 0 : index
    %c0_114 = arith.constant 0 : index
    %221 = vector.load %arg15[%c1_112, %c0_113, %c0_114] : memref<2x128x512xbf16, #tpu.memory_space<vmem>>, vector<1x128x512xbf16>
    %222 = vector.shape_cast %221 : vector<1x128x512xbf16> to vector<128x512xbf16>
    %c1_115 = arith.constant 1 : index
    %c0_116 = arith.constant 0 : index
    %c0_117 = arith.constant 0 : index
    %223 = vector.load %arg16[%c1_115, %c0_116, %c0_117] : memref<2x1x512xf32, #tpu.memory_space<vmem>>, vector<1x1x512xf32>
    %224 = vector.shape_cast %223 : vector<1x1x512xf32> to vector<1x512xf32>
    %c1_118 = arith.constant 1 : index
    %c0_119 = arith.constant 0 : index
    %c0_120 = arith.constant 0 : index
    %225 = vector.load %arg17[%c1_118, %c0_119, %c0_120] : memref<2x512x128xbf16, #tpu.memory_space<vmem>>, vector<1x512x128xbf16>
    %226 = vector.shape_cast %225 : vector<1x512x128xbf16> to vector<512x128xbf16>
    %c1_121 = arith.constant 1 : index
    %c0_122 = arith.constant 0 : index
    %c0_123 = arith.constant 0 : index
    %227 = vector.load %arg18[%c1_121, %c0_122, %c0_123] : memref<2x1x128xf32, #tpu.memory_space<vmem>>, vector<1x1x128xf32>
    %228 = vector.shape_cast %227 : vector<1x1x128xf32> to vector<1x128xf32>
    %cst_124 = arith.constant dense<0.000000e+00> : vector<17xf32>
    %229 = vector.multi_reduction <add>, %204, %cst_124 [1] : vector<17x128xf32> to vector<17xf32>
    %230 = vector.shape_cast %229 : vector<17xf32> to vector<17x1xf32>
    %cst_125 = arith.constant 1.280000e+02 : f32
    %231 = vector.broadcast %cst_125 : f32 to vector<17x1xf32>
    %232 = arith.divf %230, %231 : vector<17x1xf32>
    %233 = vector.broadcast %232 : vector<17x1xf32> to vector<17x128xf32>
    %234 = arith.subf %204, %233 : vector<17x128xf32>
    %235 = arith.mulf %234, %234 : vector<17x128xf32>
    %cst_126 = arith.constant dense<0.000000e+00> : vector<17xf32>
    %236 = vector.multi_reduction <add>, %235, %cst_126 [1] : vector<17x128xf32> to vector<17xf32>
    %237 = vector.shape_cast %236 : vector<17xf32> to vector<17x1xf32>
    %cst_127 = arith.constant 1.280000e+02 : f32
    %238 = vector.broadcast %cst_127 : f32 to vector<17x1xf32>
    %239 = arith.divf %237, %238 : vector<17x1xf32>
    %cst_128 = arith.constant 9.99999974E-6 : f32
    %240 = vector.broadcast %cst_128 : f32 to vector<17x1xf32>
    %241 = arith.addf %239, %240 : vector<17x1xf32>
    %242 = math.rsqrt %241 : vector<17x1xf32>
    %243 = vector.broadcast %242 : vector<17x1xf32> to vector<17x128xf32>
    %244 = arith.mulf %234, %243 : vector<17x128xf32>
    %245 = vector.broadcast %206 : vector<1x128xf32> to vector<17x128xf32>
    %246 = arith.mulf %244, %245 : vector<17x128xf32>
    %247 = vector.broadcast %208 : vector<1x128xf32> to vector<17x128xf32>
    %248 = arith.addf %246, %247 : vector<17x128xf32>
    %249 = arith.truncf %248 : vector<17x128xf32> to vector<17x128xbf16>
    %cst_129 = arith.constant dense<0.000000e+00> : vector<17x384xf32>
    %250 = tpu.matmul %249, %210, %cst_129 {dimension_numbers = #tpu.dot_dimension_numbers<[1], [0], [0], [1], [0, 0, 1, 1], [], []>} : vector<17x128xbf16>, vector<128x384xbf16>, vector<17x384xf32> -> vector<17x384xf32>
    %251 = vector.broadcast %212 : vector<1x384xf32> to vector<17x384xf32>
    %252 = arith.addf %250, %251 : vector<17x384xf32>
    %253 = vector.extract_strided_slice %252 {offsets = [0, 0], sizes = [17, 32], strides = [1, 1]} : vector<17x384xf32> to vector<17x32xf32>
    %254 = arith.truncf %253 : vector<17x32xf32> to vector<17x32xbf16>
    %255 = vector.extract_strided_slice %252 {offsets = [0, 128], sizes = [17, 32], strides = [1, 1]} : vector<17x384xf32> to vector<17x32xf32>
    %256 = arith.truncf %255 : vector<17x32xf32> to vector<17x32xbf16>
    %257 = vector.extract_strided_slice %252 {offsets = [0, 256], sizes = [17, 32], strides = [1, 1]} : vector<17x384xf32> to vector<17x32xf32>
    %258 = arith.truncf %257 : vector<17x32xf32> to vector<17x32xbf16>
    %cst_130 = arith.constant dense<0.000000e+00> : vector<17x17xf32>
    %259 = tpu.matmul %254, %256, %cst_130 {dimension_numbers = #tpu.dot_dimension_numbers<[1], [1], [0], [0], [0, 0, 1, 0], [], []>} : vector<17x32xbf16>, vector<17x32xbf16>, vector<17x17xf32> -> vector<17x17xf32>
    %cst_131 = arith.constant 0.176776692 : f32
    %260 = vector.broadcast %cst_131 : f32 to vector<17x17xf32>
    %261 = arith.mulf %259, %260 : vector<17x17xf32>
    %cst_132 = arith.constant dense<0xFF800000> : vector<17xf32>
    %262 = vector.multi_reduction <maximumf>, %261, %cst_132 [1] : vector<17x17xf32> to vector<17xf32>
    %263 = vector.shape_cast %262 : vector<17xf32> to vector<17x1xf32>
    %264 = vector.broadcast %263 : vector<17x1xf32> to vector<17x17xf32>
    %265 = arith.subf %261, %264 : vector<17x17xf32>
    %266 = math.exp %265 : vector<17x17xf32>
    %cst_133 = arith.constant dense<0.000000e+00> : vector<17xf32>
    %267 = vector.multi_reduction <add>, %266, %cst_133 [1] : vector<17x17xf32> to vector<17xf32>
    %268 = vector.shape_cast %267 : vector<17xf32> to vector<17x1xf32>
    %269 = arith.truncf %266 : vector<17x17xf32> to vector<17x17xbf16>
    %cst_134 = arith.constant dense<0.000000e+00> : vector<17x32xf32>
    %270 = tpu.matmul %269, %258, %cst_134 {dimension_numbers = #tpu.dot_dimension_numbers<[1], [0], [0], [1], [0, 0, 1, 1], [], []>} : vector<17x17xbf16>, vector<17x32xbf16>, vector<17x32xf32> -> vector<17x32xf32>
    %271 = tpu.reciprocal %268 {approx = true} : vector<17x1xf32> -> vector<17x1xf32>
    %272 = vector.broadcast %271 : vector<17x1xf32> to vector<17x32xf32>
    %273 = arith.mulf %270, %272 : vector<17x32xf32>
    %274 = vector.extract_strided_slice %252 {offsets = [0, 32], sizes = [17, 32], strides = [1, 1]} : vector<17x384xf32> to vector<17x32xf32>
    %275 = arith.truncf %274 : vector<17x32xf32> to vector<17x32xbf16>
    %276 = vector.extract_strided_slice %252 {offsets = [0, 160], sizes = [17, 32], strides = [1, 1]} : vector<17x384xf32> to vector<17x32xf32>
    %277 = arith.truncf %276 : vector<17x32xf32> to vector<17x32xbf16>
    %278 = vector.extract_strided_slice %252 {offsets = [0, 288], sizes = [17, 32], strides = [1, 1]} : vector<17x384xf32> to vector<17x32xf32>
    %279 = arith.truncf %278 : vector<17x32xf32> to vector<17x32xbf16>
    %cst_135 = arith.constant dense<0.000000e+00> : vector<17x17xf32>
    %280 = tpu.matmul %275, %277, %cst_135 {dimension_numbers = #tpu.dot_dimension_numbers<[1], [1], [0], [0], [0, 0, 1, 0], [], []>} : vector<17x32xbf16>, vector<17x32xbf16>, vector<17x17xf32> -> vector<17x17xf32>
    %cst_136 = arith.constant 0.176776692 : f32
    %281 = vector.broadcast %cst_136 : f32 to vector<17x17xf32>
    %282 = arith.mulf %280, %281 : vector<17x17xf32>
    %cst_137 = arith.constant dense<0xFF800000> : vector<17xf32>
    %283 = vector.multi_reduction <maximumf>, %282, %cst_137 [1] : vector<17x17xf32> to vector<17xf32>
    %284 = vector.shape_cast %283 : vector<17xf32> to vector<17x1xf32>
    %285 = vector.broadcast %284 : vector<17x1xf32> to vector<17x17xf32>
    %286 = arith.subf %282, %285 : vector<17x17xf32>
    %287 = math.exp %286 : vector<17x17xf32>
    %cst_138 = arith.constant dense<0.000000e+00> : vector<17xf32>
    %288 = vector.multi_reduction <add>, %287, %cst_138 [1] : vector<17x17xf32> to vector<17xf32>
    %289 = vector.shape_cast %288 : vector<17xf32> to vector<17x1xf32>
    %290 = arith.truncf %287 : vector<17x17xf32> to vector<17x17xbf16>
    %cst_139 = arith.constant dense<0.000000e+00> : vector<17x32xf32>
    %291 = tpu.matmul %290, %279, %cst_139 {dimension_numbers = #tpu.dot_dimension_numbers<[1], [0], [0], [1], [0, 0, 1, 1], [], []>} : vector<17x17xbf16>, vector<17x32xbf16>, vector<17x32xf32> -> vector<17x32xf32>
    %292 = tpu.reciprocal %289 {approx = true} : vector<17x1xf32> -> vector<17x1xf32>
    %293 = vector.broadcast %292 : vector<17x1xf32> to vector<17x32xf32>
    %294 = arith.mulf %291, %293 : vector<17x32xf32>
    %295 = vector.extract_strided_slice %252 {offsets = [0, 64], sizes = [17, 32], strides = [1, 1]} : vector<17x384xf32> to vector<17x32xf32>
    %296 = arith.truncf %295 : vector<17x32xf32> to vector<17x32xbf16>
    %297 = vector.extract_strided_slice %252 {offsets = [0, 192], sizes = [17, 32], strides = [1, 1]} : vector<17x384xf32> to vector<17x32xf32>
    %298 = arith.truncf %297 : vector<17x32xf32> to vector<17x32xbf16>
    %299 = vector.extract_strided_slice %252 {offsets = [0, 320], sizes = [17, 32], strides = [1, 1]} : vector<17x384xf32> to vector<17x32xf32>
    %300 = arith.truncf %299 : vector<17x32xf32> to vector<17x32xbf16>
    %cst_140 = arith.constant dense<0.000000e+00> : vector<17x17xf32>
    %301 = tpu.matmul %296, %298, %cst_140 {dimension_numbers = #tpu.dot_dimension_numbers<[1], [1], [0], [0], [0, 0, 1, 0], [], []>} : vector<17x32xbf16>, vector<17x32xbf16>, vector<17x17xf32> -> vector<17x17xf32>
    %cst_141 = arith.constant 0.176776692 : f32
    %302 = vector.broadcast %cst_141 : f32 to vector<17x17xf32>
    %303 = arith.mulf %301, %302 : vector<17x17xf32>
    %cst_142 = arith.constant dense<0xFF800000> : vector<17xf32>
    %304 = vector.multi_reduction <maximumf>, %303, %cst_142 [1] : vector<17x17xf32> to vector<17xf32>
    %305 = vector.shape_cast %304 : vector<17xf32> to vector<17x1xf32>
    %306 = vector.broadcast %305 : vector<17x1xf32> to vector<17x17xf32>
    %307 = arith.subf %303, %306 : vector<17x17xf32>
    %308 = math.exp %307 : vector<17x17xf32>
    %cst_143 = arith.constant dense<0.000000e+00> : vector<17xf32>
    %309 = vector.multi_reduction <add>, %308, %cst_143 [1] : vector<17x17xf32> to vector<17xf32>
    %310 = vector.shape_cast %309 : vector<17xf32> to vector<17x1xf32>
    %311 = arith.truncf %308 : vector<17x17xf32> to vector<17x17xbf16>
    %cst_144 = arith.constant dense<0.000000e+00> : vector<17x32xf32>
    %312 = tpu.matmul %311, %300, %cst_144 {dimension_numbers = #tpu.dot_dimension_numbers<[1], [0], [0], [1], [0, 0, 1, 1], [], []>} : vector<17x17xbf16>, vector<17x32xbf16>, vector<17x32xf32> -> vector<17x32xf32>
    %313 = tpu.reciprocal %310 {approx = true} : vector<17x1xf32> -> vector<17x1xf32>
    %314 = vector.broadcast %313 : vector<17x1xf32> to vector<17x32xf32>
    %315 = arith.mulf %312, %314 : vector<17x32xf32>
    %316 = vector.extract_strided_slice %252 {offsets = [0, 96], sizes = [17, 32], strides = [1, 1]} : vector<17x384xf32> to vector<17x32xf32>
    %317 = arith.truncf %316 : vector<17x32xf32> to vector<17x32xbf16>
    %318 = vector.extract_strided_slice %252 {offsets = [0, 224], sizes = [17, 32], strides = [1, 1]} : vector<17x384xf32> to vector<17x32xf32>
    %319 = arith.truncf %318 : vector<17x32xf32> to vector<17x32xbf16>
    %320 = vector.extract_strided_slice %252 {offsets = [0, 352], sizes = [17, 32], strides = [1, 1]} : vector<17x384xf32> to vector<17x32xf32>
    %321 = arith.truncf %320 : vector<17x32xf32> to vector<17x32xbf16>
    %cst_145 = arith.constant dense<0.000000e+00> : vector<17x17xf32>
    %322 = tpu.matmul %317, %319, %cst_145 {dimension_numbers = #tpu.dot_dimension_numbers<[1], [1], [0], [0], [0, 0, 1, 0], [], []>} : vector<17x32xbf16>, vector<17x32xbf16>, vector<17x17xf32> -> vector<17x17xf32>
    %cst_146 = arith.constant 0.176776692 : f32
    %323 = vector.broadcast %cst_146 : f32 to vector<17x17xf32>
    %324 = arith.mulf %322, %323 : vector<17x17xf32>
    %cst_147 = arith.constant dense<0xFF800000> : vector<17xf32>
    %325 = vector.multi_reduction <maximumf>, %324, %cst_147 [1] : vector<17x17xf32> to vector<17xf32>
    %326 = vector.shape_cast %325 : vector<17xf32> to vector<17x1xf32>
    %327 = vector.broadcast %326 : vector<17x1xf32> to vector<17x17xf32>
    %328 = arith.subf %324, %327 : vector<17x17xf32>
    %329 = math.exp %328 : vector<17x17xf32>
    %cst_148 = arith.constant dense<0.000000e+00> : vector<17xf32>
    %330 = vector.multi_reduction <add>, %329, %cst_148 [1] : vector<17x17xf32> to vector<17xf32>
    %331 = vector.shape_cast %330 : vector<17xf32> to vector<17x1xf32>
    %332 = arith.truncf %329 : vector<17x17xf32> to vector<17x17xbf16>
    %cst_149 = arith.constant dense<0.000000e+00> : vector<17x32xf32>
    %333 = tpu.matmul %332, %321, %cst_149 {dimension_numbers = #tpu.dot_dimension_numbers<[1], [0], [0], [1], [0, 0, 1, 1], [], []>} : vector<17x17xbf16>, vector<17x32xbf16>, vector<17x32xf32> -> vector<17x32xf32>
    %334 = tpu.reciprocal %331 {approx = true} : vector<17x1xf32> -> vector<17x1xf32>
    %335 = vector.broadcast %334 : vector<17x1xf32> to vector<17x32xf32>
    %336 = arith.mulf %333, %335 : vector<17x32xf32>
    %337 = tpu.concatenate %273, %294, %315, %336 in 1 : vector<17x32xf32>, vector<17x32xf32>, vector<17x32xf32>, vector<17x32xf32> -> vector<17x128xf32>
    %338 = arith.truncf %337 : vector<17x128xf32> to vector<17x128xbf16>
    %cst_150 = arith.constant dense<0.000000e+00> : vector<17x128xf32>
    %339 = tpu.matmul %338, %214, %cst_150 {dimension_numbers = #tpu.dot_dimension_numbers<[1], [0], [0], [1], [0, 0, 1, 1], [], []>} : vector<17x128xbf16>, vector<128x128xbf16>, vector<17x128xf32> -> vector<17x128xf32>
    %340 = arith.addf %204, %339 : vector<17x128xf32>
    %341 = vector.broadcast %216 : vector<1x128xf32> to vector<17x128xf32>
    %342 = arith.addf %340, %341 : vector<17x128xf32>
    %cst_151 = arith.constant dense<0.000000e+00> : vector<17xf32>
    %343 = vector.multi_reduction <add>, %342, %cst_151 [1] : vector<17x128xf32> to vector<17xf32>
    %344 = vector.shape_cast %343 : vector<17xf32> to vector<17x1xf32>
    %cst_152 = arith.constant 1.280000e+02 : f32
    %345 = vector.broadcast %cst_152 : f32 to vector<17x1xf32>
    %346 = arith.divf %344, %345 : vector<17x1xf32>
    %347 = vector.broadcast %346 : vector<17x1xf32> to vector<17x128xf32>
    %348 = arith.subf %342, %347 : vector<17x128xf32>
    %349 = arith.mulf %348, %348 : vector<17x128xf32>
    %cst_153 = arith.constant dense<0.000000e+00> : vector<17xf32>
    %350 = vector.multi_reduction <add>, %349, %cst_153 [1] : vector<17x128xf32> to vector<17xf32>
    %351 = vector.shape_cast %350 : vector<17xf32> to vector<17x1xf32>
    %cst_154 = arith.constant 1.280000e+02 : f32
    %352 = vector.broadcast %cst_154 : f32 to vector<17x1xf32>
    %353 = arith.divf %351, %352 : vector<17x1xf32>
    %cst_155 = arith.constant 9.99999974E-6 : f32
    %354 = vector.broadcast %cst_155 : f32 to vector<17x1xf32>
    %355 = arith.addf %353, %354 : vector<17x1xf32>
    %356 = math.rsqrt %355 : vector<17x1xf32>
    %357 = vector.broadcast %356 : vector<17x1xf32> to vector<17x128xf32>
    %358 = arith.mulf %348, %357 : vector<17x128xf32>
    %359 = vector.broadcast %218 : vector<1x128xf32> to vector<17x128xf32>
    %360 = arith.mulf %358, %359 : vector<17x128xf32>
    %361 = vector.broadcast %220 : vector<1x128xf32> to vector<17x128xf32>
    %362 = arith.addf %360, %361 : vector<17x128xf32>
    %363 = arith.truncf %362 : vector<17x128xf32> to vector<17x128xbf16>
    %cst_156 = arith.constant dense<0.000000e+00> : vector<17x512xf32>
    %364 = tpu.matmul %363, %222, %cst_156 {dimension_numbers = #tpu.dot_dimension_numbers<[1], [0], [0], [1], [0, 0, 1, 1], [], []>} : vector<17x128xbf16>, vector<128x512xbf16>, vector<17x512xf32> -> vector<17x512xf32>
    %365 = vector.broadcast %224 : vector<1x512xf32> to vector<17x512xf32>
    %366 = arith.addf %364, %365 : vector<17x512xf32>
    %cst_157 = arith.constant 1.702000e+00 : f32
    %367 = vector.broadcast %cst_157 : f32 to vector<17x512xf32>
    %368 = arith.mulf %367, %366 : vector<17x512xf32>
    %369 = arith.negf %368 : vector<17x512xf32>
    %370 = math.exp %369 : vector<17x512xf32>
    %cst_158 = arith.constant 1.000000e+00 : f32
    %371 = vector.broadcast %cst_158 : f32 to vector<17x512xf32>
    %372 = arith.addf %371, %370 : vector<17x512xf32>
    %373 = arith.divf %371, %372 : vector<17x512xf32>
    %374 = arith.mulf %366, %373 : vector<17x512xf32>
    %375 = arith.truncf %374 : vector<17x512xf32> to vector<17x512xbf16>
    %cst_159 = arith.constant dense<0.000000e+00> : vector<17x128xf32>
    %376 = tpu.matmul %375, %226, %cst_159 {dimension_numbers = #tpu.dot_dimension_numbers<[1], [0], [0], [1], [0, 0, 1, 1], [], []>} : vector<17x512xbf16>, vector<512x128xbf16>, vector<17x128xf32> -> vector<17x128xf32>
    %377 = arith.addf %342, %376 : vector<17x128xf32>
    %378 = vector.broadcast %228 : vector<1x128xf32> to vector<17x128xf32>
    %379 = arith.addf %377, %378 : vector<17x128xf32>
    %380 = vector.extract_strided_slice %379 {offsets = [0, 0], sizes = [1, 128], strides = [1, 1]} : vector<17x128xf32> to vector<1x128xf32>
    %c0_160 = arith.constant 0 : index
    %c0_161 = arith.constant 0 : index
    %381 = vector.load %arg19[%c0_160, %c0_161] : memref<1x128xf32, #tpu.memory_space<vmem>>, vector<1x128xf32>
    %c0_162 = arith.constant 0 : index
    %c0_163 = arith.constant 0 : index
    %382 = vector.load %arg20[%c0_162, %c0_163] : memref<1x128xf32, #tpu.memory_space<vmem>>, vector<1x128xf32>
    %cst_164 = arith.constant dense<0.000000e+00> : vector<1xf32>
    %383 = vector.multi_reduction <add>, %380, %cst_164 [1] : vector<1x128xf32> to vector<1xf32>
    %384 = vector.shape_cast %383 : vector<1xf32> to vector<1x1xf32>
    %cst_165 = arith.constant 1.280000e+02 : f32
    %385 = vector.broadcast %cst_165 : f32 to vector<1x1xf32>
    %386 = arith.divf %384, %385 : vector<1x1xf32>
    %387 = vector.broadcast %386 : vector<1x1xf32> to vector<1x128xf32>
    %388 = arith.subf %380, %387 : vector<1x128xf32>
    %389 = arith.mulf %388, %388 : vector<1x128xf32>
    %cst_166 = arith.constant dense<0.000000e+00> : vector<1xf32>
    %390 = vector.multi_reduction <add>, %389, %cst_166 [1] : vector<1x128xf32> to vector<1xf32>
    %391 = vector.shape_cast %390 : vector<1xf32> to vector<1x1xf32>
    %cst_167 = arith.constant 1.280000e+02 : f32
    %392 = vector.broadcast %cst_167 : f32 to vector<1x1xf32>
    %393 = arith.divf %391, %392 : vector<1x1xf32>
    %cst_168 = arith.constant 9.99999974E-6 : f32
    %394 = vector.broadcast %cst_168 : f32 to vector<1x1xf32>
    %395 = arith.addf %393, %394 : vector<1x1xf32>
    %396 = math.rsqrt %395 : vector<1x1xf32>
    %397 = vector.broadcast %396 : vector<1x1xf32> to vector<1x128xf32>
    %398 = arith.mulf %388, %397 : vector<1x128xf32>
    %399 = arith.mulf %398, %381 : vector<1x128xf32>
    %400 = arith.addf %399, %382 : vector<1x128xf32>
    %401 = arith.truncf %400 : vector<1x128xf32> to vector<1x128xbf16>
    %c0_169 = arith.constant 0 : index
    %c0_170 = arith.constant 0 : index
    %402 = vector.load %arg21[%c0_169, %c0_170] : memref<128x128xbf16, #tpu.memory_space<vmem>>, vector<128x128xbf16>
    %cst_171 = arith.constant dense<0.000000e+00> : vector<1x128xf32>
    %403 = tpu.matmul %401, %402, %cst_171 {dimension_numbers = #tpu.dot_dimension_numbers<[1], [0], [0], [1], [0, 0, 1, 1], [], []>} : vector<1x128xbf16>, vector<128x128xbf16>, vector<1x128xf32> -> vector<1x128xf32>
    %404 = arith.mulf %403, %403 : vector<1x128xf32>
    %cst_172 = arith.constant dense<0.000000e+00> : vector<1xf32>
    %405 = vector.multi_reduction <add>, %404, %cst_172 [1] : vector<1x128xf32> to vector<1xf32>
    %406 = vector.shape_cast %405 : vector<1xf32> to vector<1x1xf32>
    %407 = math.sqrt %406 : vector<1x1xf32>
    %cst_173 = arith.constant 9.99999996E-13 : f32
    %408 = vector.broadcast %cst_173 : f32 to vector<1x1xf32>
    %409 = arith.maximumf %407, %408 : vector<1x1xf32>
    %410 = vector.broadcast %409 : vector<1x1xf32> to vector<1x128xf32>
    %411 = arith.divf %403, %410 : vector<1x128xf32>
    %c0_174 = arith.constant 0 : index
    %c0_175 = arith.constant 0 : index
    %c0_176 = arith.constant 0 : index
    %412 = vector.load %arg22[%c0_174, %c0_175, %c0_176] : memref<1x1x128xf32, #tpu.memory_space<vmem>>, vector<1x1x128xf32>
    %413 = vector.shape_cast %412 : vector<1x1x128xf32> to vector<1x128xf32>
    %414 = vector.shape_cast %411 : vector<1x128xf32> to vector<1x1x128xf32>
    tpu.vector_store %arg22[%c0_174, %c0_175, %c0_176], %414 {strides = array<i32>} : memref<1x1x128xf32, #tpu.memory_space<vmem>>, vector<1x1x128xf32>,
    %c0_177 = arith.constant 0 : index
    %c0_178 = arith.constant 0 : index
    %c0_179 = arith.constant 0 : index
    %415 = vector.load %arg23[%c0_177, %c0_178, %c0_179] : memref<1x1x1xf32, #tpu.memory_space<vmem>>, vector<1x1x1xf32>
    %416 = vector.shape_cast %415 : vector<1x1x1xf32> to vector<1x1xf32>
    %417 = vector.shape_cast %407 : vector<1x1xf32> to vector<1x1x1xf32>
    tpu.vector_store %arg23[%c0_177, %c0_178, %c0_179], %417 {strides = array<i32>} : memref<1x1x1xf32, #tpu.memory_space<vmem>>, vector<1x1x1xf32>,
    return
  }
  func.func @transform_0(%arg0: i32) -> (i32, i32, i32) {
    %c0_i32 = arith.constant 0 : i32
    %c0_i32_0 = arith.constant 0 : i32
    %c0_i32_1 = arith.constant 0 : i32
    return %arg0, %c0_i32, %c0_i32_0 : i32, i32, i32
  }
  func.func @transform_1(%arg0: i32) -> (i32, i32) {
    %c0_i32 = arith.constant 0 : i32
    %c0_i32_0 = arith.constant 0 : i32
    %c0_i32_1 = arith.constant 0 : i32
    return %c0_i32, %c0_i32_0 : i32, i32
  }
  func.func @transform_2(%arg0: i32) -> (i32, i32) {
    %c0_i32 = arith.constant 0 : i32
    %c0_i32_0 = arith.constant 0 : i32
    %c0_i32_1 = arith.constant 0 : i32
    return %c0_i32, %c0_i32_0 : i32, i32
  }
  func.func @transform_3(%arg0: i32) -> (i32, i32) {
    %c0_i32 = arith.constant 0 : i32
    %c0_i32_0 = arith.constant 0 : i32
    %c0_i32_1 = arith.constant 0 : i32
    return %c0_i32, %c0_i32_0 : i32, i32
  }
  func.func @transform_4(%arg0: i32) -> (i32, i32) {
    %c0_i32 = arith.constant 0 : i32
    %c0_i32_0 = arith.constant 0 : i32
    %c0_i32_1 = arith.constant 0 : i32
    return %c0_i32, %c0_i32_0 : i32, i32
  }
  func.func @transform_5(%arg0: i32) -> (i32, i32) {
    %c0_i32 = arith.constant 0 : i32
    %c0_i32_0 = arith.constant 0 : i32
    %c0_i32_1 = arith.constant 0 : i32
    return %c0_i32, %c0_i32_0 : i32, i32
  }
  func.func @transform_6(%arg0: i32) -> (i32, i32, i32) {
    %c0_i32 = arith.constant 0 : i32
    %c0_i32_0 = arith.constant 0 : i32
    %c0_i32_1 = arith.constant 0 : i32
    %c0_i32_2 = arith.constant 0 : i32
    return %c0_i32, %c0_i32_0, %c0_i32_1 : i32, i32, i32
  }
  func.func @transform_7(%arg0: i32) -> (i32, i32, i32) {
    %c0_i32 = arith.constant 0 : i32
    %c0_i32_0 = arith.constant 0 : i32
    %c0_i32_1 = arith.constant 0 : i32
    %c0_i32_2 = arith.constant 0 : i32
    return %c0_i32, %c0_i32_0, %c0_i32_1 : i32, i32, i32
  }
  func.func @transform_8(%arg0: i32) -> (i32, i32, i32) {
    %c0_i32 = arith.constant 0 : i32
    %c0_i32_0 = arith.constant 0 : i32
    %c0_i32_1 = arith.constant 0 : i32
    %c0_i32_2 = arith.constant 0 : i32
    return %c0_i32, %c0_i32_0, %c0_i32_1 : i32, i32, i32
  }
  func.func @transform_9(%arg0: i32) -> (i32, i32, i32) {
    %c0_i32 = arith.constant 0 : i32
    %c0_i32_0 = arith.constant 0 : i32
    %c0_i32_1 = arith.constant 0 : i32
    %c0_i32_2 = arith.constant 0 : i32
    return %c0_i32, %c0_i32_0, %c0_i32_1 : i32, i32, i32
  }
  func.func @transform_10(%arg0: i32) -> (i32, i32, i32) {
    %c0_i32 = arith.constant 0 : i32
    %c0_i32_0 = arith.constant 0 : i32
    %c0_i32_1 = arith.constant 0 : i32
    %c0_i32_2 = arith.constant 0 : i32
    return %c0_i32, %c0_i32_0, %c0_i32_1 : i32, i32, i32
  }
  func.func @transform_11(%arg0: i32) -> (i32, i32, i32) {
    %c0_i32 = arith.constant 0 : i32
    %c0_i32_0 = arith.constant 0 : i32
    %c0_i32_1 = arith.constant 0 : i32
    %c0_i32_2 = arith.constant 0 : i32
    return %c0_i32, %c0_i32_0, %c0_i32_1 : i32, i32, i32
  }
  func.func @transform_12(%arg0: i32) -> (i32, i32, i32) {
    %c0_i32 = arith.constant 0 : i32
    %c0_i32_0 = arith.constant 0 : i32
    %c0_i32_1 = arith.constant 0 : i32
    %c0_i32_2 = arith.constant 0 : i32
    return %c0_i32, %c0_i32_0, %c0_i32_1 : i32, i32, i32
  }
  func.func @transform_13(%arg0: i32) -> (i32, i32, i32) {
    %c0_i32 = arith.constant 0 : i32
    %c0_i32_0 = arith.constant 0 : i32
    %c0_i32_1 = arith.constant 0 : i32
    %c0_i32_2 = arith.constant 0 : i32
    return %c0_i32, %c0_i32_0, %c0_i32_1 : i32, i32, i32
  }
  func.func @transform_14(%arg0: i32) -> (i32, i32, i32) {
    %c0_i32 = arith.constant 0 : i32
    %c0_i32_0 = arith.constant 0 : i32
    %c0_i32_1 = arith.constant 0 : i32
    %c0_i32_2 = arith.constant 0 : i32
    return %c0_i32, %c0_i32_0, %c0_i32_1 : i32, i32, i32
  }
  func.func @transform_15(%arg0: i32) -> (i32, i32, i32) {
    %c0_i32 = arith.constant 0 : i32
    %c0_i32_0 = arith.constant 0 : i32
    %c0_i32_1 = arith.constant 0 : i32
    %c0_i32_2 = arith.constant 0 : i32
    return %c0_i32, %c0_i32_0, %c0_i32_1 : i32, i32, i32
  }
  func.func @transform_16(%arg0: i32) -> (i32, i32, i32) {
    %c0_i32 = arith.constant 0 : i32
    %c0_i32_0 = arith.constant 0 : i32
    %c0_i32_1 = arith.constant 0 : i32
    %c0_i32_2 = arith.constant 0 : i32
    return %c0_i32, %c0_i32_0, %c0_i32_1 : i32, i32, i32
  }
  func.func @transform_17(%arg0: i32) -> (i32, i32, i32) {
    %c0_i32 = arith.constant 0 : i32
    %c0_i32_0 = arith.constant 0 : i32
    %c0_i32_1 = arith.constant 0 : i32
    %c0_i32_2 = arith.constant 0 : i32
    return %c0_i32, %c0_i32_0, %c0_i32_1 : i32, i32, i32
  }
  func.func @transform_18(%arg0: i32) -> (i32, i32) {
    %c0_i32 = arith.constant 0 : i32
    %c0_i32_0 = arith.constant 0 : i32
    %c0_i32_1 = arith.constant 0 : i32
    return %c0_i32, %c0_i32_0 : i32, i32
  }
  func.func @transform_19(%arg0: i32) -> (i32, i32) {
    %c0_i32 = arith.constant 0 : i32
    %c0_i32_0 = arith.constant 0 : i32
    %c0_i32_1 = arith.constant 0 : i32
    return %c0_i32, %c0_i32_0 : i32, i32
  }
  func.func @transform_20(%arg0: i32) -> (i32, i32) {
    %c0_i32 = arith.constant 0 : i32
    %c0_i32_0 = arith.constant 0 : i32
    %c0_i32_1 = arith.constant 0 : i32
    return %c0_i32, %c0_i32_0 : i32, i32
  }
  func.func @transform_21(%arg0: i32) -> (i32, i32, i32) {
    %c0_i32 = arith.constant 0 : i32
    %c0_i32_0 = arith.constant 0 : i32
    %c0_i32_1 = arith.constant 0 : i32
    return %arg0, %c0_i32, %c0_i32_0 : i32, i32, i32
  }
  func.func @transform_22(%arg0: i32) -> (i32, i32, i32) {
    %c0_i32 = arith.constant 0 : i32
    %c0_i32_0 = arith.constant 0 : i32
    %c0_i32_1 = arith.constant 0 : i32
    return %arg0, %c0_i32, %c0_i32_0 : i32, i32, i32
  }
}

</mosaic_0001>

<bundles_post_ra>
// kernel: tpu_custom_call.1
= control target key start
LH: loop header
LB: loop body
LE: loop exit
PB: predicated region body
PF: predicated region fallthrough
CT: control target
= control target key end

     0   :  { %s9122_s0 = inlined_call_operand.hbm [shape: bf16[2,16,192], index: 0, kind: input, shape index: {}]   ;;  %s9123_s1 = inlined_call_operand.hbm [shape: bf16[192,128], index: 1, kind: input, shape index: {}]   ;;  %s9124_s2 = inlined_call_operand.vmem [shape: f32[1,128], index: 2, kind: input, shape index: {}]   ;;  %s9125_s3 = inlined_call_operand.hbm [shape: f32[17,128], index: 3, kind: input, shape index: {}]   ;;  %s9126_s4 = inlined_call_operand.hbm [shape: f32[1,128], index: 4, kind: input, shape index: {}]   ;;  %s9127_s5 = inlined_call_operand.hbm [shape: f32[1,128], index: 5, kind: input, shape index: {}]   ;;  %s9128_s6 = inlined_call_operand.vmem [shape: f32[2,1,128], index: 6, kind: input, shape index: {}]   ;;  %s9129_s7 = inlined_call_operand.hbm [shape: f32[2,1,128], index: 7, kind: input, shape index: {}]   ;;  %s9130_s8 = inlined_call_operand.hbm [shape: bf16[2,128,384], index: 8, kind: input, shape index: {}]   ;;  %s9131_s9 = inlined_call_operand.hbm [shape: f32[2,1,384], index: 9, kind: input, shape index: {}]   ;;  %s9132_s10 = inlined_call_operand.hbm [shape: bf16[2,128,128], index: 10, kind: input, shape index: {}]   ;;  %s9133_s11 = inlined_call_operand.hbm [shape: f32[2,1,128], index: 11, kind: input, shape index: {}]   ;;  %s9134_s12 = inlined_call_operand.hbm [shape: f32[2,1,128], index: 12, kind: input, shape index: {}]   ;;  %s9135_s13 = inlined_call_operand.hbm [shape: f32[2,1,128], index: 13, kind: input, shape index: {}]   ;;  %s9136_s14 = inlined_call_operand.hbm [shape: bf16[2,128,512], index: 14, kind: input, shape index: {}]   ;;  %s9137_s15 = inlined_call_operand.vmem [shape: f32[2,1,512], index: 15, kind: input, shape index: {}]   ;;  %s9138_s16 = inlined_call_operand.hbm [shape: bf16[2,512,128], index: 16, kind: input, shape index: {}]   ;;  %s9139_s17 = inlined_call_operand.hbm [shape: f32[2,1,128], index: 17, kind: input, shape index: {}]   ;;  %s9140_s18 = inlined_call_operand.hbm [shape: f32[1,128], index: 18, kind: input, shape index: {}]   ;;  %s9141_s19 = inlined_call_operand.hbm [shape: f32[1,128], index: 19, kind: input, shape index: {}]   ;;  %s9142_s20 = inlined_call_operand.vmem [shape: bf16[128,128], index: 20, kind: input, shape index: {}]   ;;  %s9143_s21 = inlined_call_operand.hbm [shape: f32[2,1,128], index: 21, kind: output, shape index: {0}]   ;;  %s9144_s22 = inlined_call_operand.vmem [shape: f32[2,1,1], index: 22, kind: output, shape index: {1}]  }
   0x1   :  { %9175 = sst [smem:[#allocation45_spill]] %s9122_s0 }
   0x2   :  { %9176 = sst [smem:[#allocation46_spill]] %s9123_s1 }
   0x3   :  { %9177 = sst [smem:[#allocation47_spill]] %s9124_s2 }
   0x4   :  { %9178 = sst [smem:[#allocation48_spill]] %s9125_s3 }
   0x5   :  { %9179 = sst [smem:[#allocation49_spill]] %s9126_s4 }
   0x6   :  { %9180 = sst [smem:[#allocation50_spill]] %s9127_s5 }
   0x7   :  { %9181 = sst [smem:[#allocation51_spill]] %s9128_s6 }
   0x8   :  { %9182 = sst [smem:[#allocation52_spill]] %s9129_s7 }
   0x9   :  { %9183 = sst [smem:[#allocation53_spill]] %s9131_s9 }
   0xa   :  { %9184 = sst [smem:[#allocation54_spill]] %s9133_s11 }
   0xb   :  { %9185 = sst [smem:[#allocation55_spill]] %s9135_s13 }
   0xc   :  { %9186 = sst [smem:[#allocation56_spill]] %s9137_s15 }
   0xd   :  { %9187 = sst [smem:[#allocation57_spill]] %s9138_s16 }
   0xe   :  { %9188 = sst [smem:[#allocation58_spill]] %s9140_s18 }
   0xf   :  { %9189 = sst [smem:[#allocation59_spill]] %s9142_s20 }
  0x10   :  { %9190 = sst [smem:[#allocation60_spill]] %s9143_s21 }
  0x11   :  { %9191 = sst [smem:[#allocation61_spill]] %s9144_s22 }
  0x12   :  { %28 = vsyncpa [#allocation3], 0 }
  0x13   :  { %30 = vsyncpa [#allocation3 + $0x1], 0 }
  0x14   :  { %31 = vsyncpa [#allocation6], 0 }
  0x15   :  { %32 = vsyncpa [#allocation9], 0 }
  0x16   :  { %33 = vsyncpa [#allocation12], 0 }
  0x17   :  { %34 = vsyncpa [#allocation15], 0 }
  0x18   :  { %35 = vsyncpa [#allocation18], 0 }
  0x19   :  { %36 = vsyncpa [#allocation21], 0 }
  0x1a   :  { %37 = vsyncpa [#allocation24], 0 }
  0x1b   :  { %38 = vsyncpa [#allocation27], 0 }
  0x1c   :  { %39 = vsyncpa [#allocation4], 0 }
  0x1d   :  { %41 = vsyncpa [#allocation4 + $0x1], 0  ;;  %s7874_s3 = smov 0   ;;  %s7876_s28 = smov 0  }
  0x1e   :  { %s7878_s29 = smov 0   ;;  %s7880_s30 = smov 0  }
  0x1f LB: > { %9192 = sst [smem:[#allocation40_spill]] %s7710_s3  ;;  %s7724_s4 = smov [#allocation5]   ;;  %s7722_s30 = sphi %s7880_s30, %s9259_s30   ;;  %s7718_s29 = sphi %s7878_s29, %s9258_s29   ;;  %s7714_s28 = sphi %s7876_s28, %s9257_s28   ;;  %s7710_s3 = sphi %s7874_s3, %s9256_s3  }
  0x20   : > { %9193 = sst [smem:[#allocation41_spill]] %s7714_s28  ;;  %s562_s0 = sshll.u32 %s7724_s4, 4  ;;  %s7900_s0 = int_to_ptr.vmem [resolvable:$true] %s562_s0 }
  0x21   : > { %9194 = sst [smem:[#allocation42_spill]] %s7718_s29  ;;  %s7895_s23 = sadd.s32 4294967295, %s7722_s30  }
  0x22   : > { %9195 = sst [smem:[#allocation43_spill]] %s7895_s23  ;;  %p5602_p0 = scmp.ge.s32.totalorder %s7722_s30, 1 }
  0x23   : > { %p9164_p1 = scmp.eq.s32.totalorder %s7895_s23, 0  ;;  %p550_p2 = scmp.lt.s32.totalorder %s7722_s30, 3 }
  0x24   : > { %s7725_s5 = smov [#allocation8]   ;;  %s7726_s25 = smov [#allocation11]  }
  0x25   : > { %p7902_p3 = pnand %p5602_p0, %p550_p2  ;;  %s592_s24 = sshll.u32 %s7725_s5, 4  ;;  %s7915_s24 = int_to_ptr.vmem [resolvable:$true] %s592_s24 }
  0x26   : > { %s616_s26 = sshll.u32 %s7726_s25, 4  ;;  %s9199_s4 = sld [smem:[#allocation46_spill]]  ;;  %s7917_s26 = int_to_ptr.vmem [resolvable:$true] %s616_s26 }
  0x27   : > { %s9196_s1 = scalar_select %p7902_p3, 1, 0 }
  0x28   : > { %p6469_p5 = pneg %p7902_p3 }
  0x29   : > { %9197 = sst [smem:[#allocation44_spill]] %s9196_s1 }
  0x2a   : > { %p7911_p6 = pnand %p6469_p5, %p9164_p1 }
  0x2c   : > { %s7146_s21 = scalar_lea.hbm %s9199_s4, 1536  ;;  %p7927_p8 = pneg %p7911_p6 }
  0x2d   : > { %p7147_p7 = scmp.ne.s32.totalorder %s9199_s4, %s7146_s21  ;;  %p7153_p11 = scmp.lt.u32.totalorder %s7146_s21, %s9199_s4 }
  0x2f   : > { %p7149_p9 = pnand %p7927_p8, %p7147_p7 }
  0x31   : > { %p7150_p10 = pneg %p7149_p9 }
  0x33   : > { %p7155_p12 = pnand %p7153_p11, %p7150_p10 }
  0x35   : > { %7158 = shalt.err (!%p7155_p12)
}
  0x36   : > { %s7159_s20 = scalar_lea.vmem %s7900_s0, 1536  ;;  %p7167_p5 = scmp.lt.s32.totalorder %s7900_s0, %s7900_s0 }
  0x37   : > { %p7160_p13 = scmp.ne.s32.totalorder %s7900_s0, %s7159_s20  ;;  %p7168_p4 = scmp.lt.s32.totalorder %s7159_s20, %s7159_s20 }
  0x39   : > { %p7162_p0 = pnand %p7160_p13, %p7927_p8  ;;  %p7169_p7 = por %p7168_p4, %p7167_p5 }
  0x3b   : > { %p7163_p2 = pneg %p7162_p0 }
  0x3d   : > { %p7170_p9 = pnand %p7169_p7, %p7163_p2 }
  0x3f   : > { %7173 = shalt.err (!%p7170_p9)
}
  0x40   : > { %s9160_s22 = smov 64   ;;  %s9162_s15 = smov 4  }
  0x41   : > { %6472 = dma.hbm_to_vmem [thread:$0]  (!%p7911_p6), %s9199_s4, 1536, %s7900_s0, [#allocation6], %s9160_s22, %s9160_s22, %s9162_s15  }
  0x42   : > { %s9201_s1 = sld [smem:[#allocation49_spill]] }
  0x48   : > { %s7174_s20 = scalar_lea.hbm %s9201_s1, 16 }
  0x49   : > { %p7175_p4 = scmp.ne.s32.totalorder %s9201_s1, %s7174_s20  ;;  %p7181_p12 = scmp.lt.u32.totalorder %s7174_s20, %s9201_s1 }
  0x4b   : > { %p7177_p10 = pnand %p7175_p4, %p7927_p8 }
  0x4d   : > { %p7178_p11 = pneg %p7177_p10 }
  0x4f   : > { %p7183_p13 = pnand %p7181_p12, %p7178_p11 }
  0x51   : > { %7186 = shalt.err (!%p7183_p13)
}
  0x52   : > { %s7187_s0 = scalar_lea.vmem %s7915_s24, 16  ;;  %s7194_s3 = scalar_lea.vmem %s7915_s24, 32 }
  0x53   : > { %p7188_p0 = scmp.ne.s32.totalorder %s7915_s24, %s7187_s0  ;;  %p7195_p7 = scmp.lt.s32.totalorder %s7915_s24, %s7915_s24 }
  0x54   : > { %p7196_p9 = scmp.lt.s32.totalorder %s7194_s3, %s7187_s0 }
  0x55   : > { %p7190_p2 = pnand %p7188_p0, %p7927_p8 }
  0x56   : > { %p7197_p4 = por %p7196_p9, %p7195_p7 }
  0x57   : > { %p7191_p5 = pneg %p7190_p2 }
  0x59   : > { %p7198_p10 = pnand %p7197_p4, %p7191_p5 }
  0x5b   : > { %7201 = shalt.err (!%p7198_p10)
}
  0x5c   : > { %6478 = dma.hbm_to_vmem [thread:$0]  (!%p7911_p6), %s9201_s1, 16, %s7915_s24, [#allocation9]  }
  0x5d   : > { %s9202_s7 = sld [smem:[#allocation52_spill]] }
  0x63   : > { %s7202_s2 = scalar_lea.hbm %s9202_s7, 32 }
  0x64   : > { %p7203_p11 = scmp.ne.s32.totalorder %s9202_s7, %s7202_s2  ;;  %p7209_p0 = scmp.lt.u32.totalorder %s7202_s2, %s9202_s7 }
  0x66   : > { %p7205_p12 = pnand %p7203_p11, %p7927_p8 }
  0x68   : > { %p7206_p13 = pneg %p7205_p12 }
  0x6a   : > { %p7211_p2 = pnand %p7209_p0, %p7206_p13 }
  0x6c   : > { %7214 = shalt.err (!%p7211_p2)
}
  0x6d   : > { %s7215_s24 = scalar_lea.vmem %s7917_s26, 32  ;;  %p7223_p4 = scmp.lt.s32.totalorder %s7917_s26, %s7917_s26 }
  0x6e   : > { %p7216_p5 = scmp.ne.s32.totalorder %s7917_s26, %s7215_s24  ;;  %p7224_p10 = scmp.lt.s32.totalorder %s7215_s24, %s7215_s24 }
  0x70   : > { %p7218_p7 = pnand %p7216_p5, %p7927_p8  ;;  %p7225_p11 = por %p7224_p10, %p7223_p4 }
  0x72   : > { %p7219_p9 = pneg %p7218_p7 }
  0x74   : > { %p7226_p12 = pnand %p7225_p11, %p7219_p9 }
  0x76   : > { %7229 = shalt.err (!%p7226_p12)
}
  0x77   : > { %s9166_s3 = smov 16   ;;  %s9168_s28 = smov 1  }
  0x78   : > { %6484 = dma.hbm_to_vmem [thread:$0]  (!%p7911_p6), %s9202_s7, 32, %s7917_s26, [#allocation12], %s9166_s3, %s9166_s3, %s9168_s28  }
  0x79   : > { %s7731_s21 = smov [#allocation14]   ;;  %s9203_s9 = sld [smem:[#allocation53_spill]] }
  0x7a   : > { %s642_s2 = sshll.u32 %s7731_s21, 4  ;;  %s643_s2 = int_to_ptr.vmem [resolvable:$true] %s642_s2 }
  0x7f   : > { %s7230_s20 = scalar_lea.hbm %s9203_s9, 96 }
  0x80   : > { %p7231_p13 = scmp.ne.s32.totalorder %s9203_s9, %s7230_s20  ;;  %p7237_p5 = scmp.lt.u32.totalorder %s7230_s20, %s9203_s9 }
  0x82   : > { %p7233_p0 = pnand %p7231_p13, %p7927_p8 }
  0x84   : > { %p7234_p2 = pneg %p7233_p0 }
  0x86   : > { %p7239_p7 = pnand %p7237_p5, %p7234_p2 }
  0x88   : > { %7242 = shalt.err (!%p7239_p7)
}
  0x89   : > { %s7243_s26 = scalar_lea.vmem %s643_s2, 96  ;;  %p7251_p11 = scmp.lt.s32.totalorder %s643_s2, %s643_s2 }
  0x8a   : > { %p7244_p9 = scmp.ne.s32.totalorder %s643_s2, %s7243_s26  ;;  %p7252_p12 = scmp.lt.s32.totalorder %s7243_s26, %s7243_s26 }
  0x8c   : > { %p7246_p4 = pnand %p7244_p9, %p7927_p8  ;;  %p7253_p1 = por %p7252_p12, %p7251_p11 }
  0x8e   : > { %p7247_p10 = pneg %p7246_p4 }
  0x90   : > { %p7254_p3 = pnand %p7253_p1, %p7247_p10 }
  0x92   : > { %7257 = shalt.err (!%p7254_p3)
}
  0x93   : > { %s7732_s29 = smov 48   ;;  %s7733_s23 = smov 3  }
  0x94   : > { %6490 = dma.hbm_to_vmem [thread:$0]  (!%p7911_p6), %s9203_s9, 96, %s643_s2, [#allocation15], %s7732_s29, %s7732_s29, %s7733_s23  }
  0x95   : > { %s7734_s21 = smov [#allocation17]   ;;  %s7735_s25 = smov [#allocation20]  }
  0x96   : > { %s668_s27 = sshll.u32 %s7734_s21, 4  ;;  %s694_s20 = sshll.u32 %s7735_s25, 4  ;;  %s669_s27 = int_to_ptr.vmem [resolvable:$true] %s668_s27  ;;  %s8019_s20 = int_to_ptr.vmem [resolvable:$true] %s694_s20 }
  0x97   : > { %s9204_s11 = sld [smem:[#allocation54_spill]] }
  0x9d   : > { %s7258_s26 = scalar_lea.hbm %s9204_s11, 32 }
  0x9e   : > { %p7259_p1 = scmp.ne.s32.totalorder %s9204_s11, %s7258_s26  ;;  %p7265_p0 = scmp.lt.u32.totalorder %s7258_s26, %s9204_s11 }
  0xa0   : > { %p7261_p3 = pnand %p7259_p1, %p7927_p8 }
  0xa2   : > { %p7262_p13 = pneg %p7261_p3 }
  0xa4   : > { %p7267_p2 = pnand %p7265_p0, %p7262_p13 }
  0xa6   : > { %7270 = shalt.err (!%p7267_p2)
}
  0xa7   : > { %s7271_s29 = scalar_lea.vmem %s669_s27, 32  ;;  %p7279_p4 = scmp.lt.s32.totalorder %s669_s27, %s669_s27 }
  0xa8   : > { %p7272_p5 = scmp.ne.s32.totalorder %s669_s27, %s7271_s29  ;;  %p7280_p10 = scmp.lt.s32.totalorder %s7271_s29, %s7271_s29 }
  0xaa   : > { %p7274_p7 = pnand %p7272_p5, %p7927_p8  ;;  %p7281_p11 = por %p7280_p10, %p7279_p4 }
  0xac   : > { %p7275_p9 = pneg %p7274_p7 }
  0xae   : > { %p7282_p12 = pnand %p7281_p11, %p7275_p9 }
  0xb0   : > { %7285 = shalt.err (!%p7282_p12)
}
  0xb1   : > { %s9205_s3 = smov 1   ;;  %s9206_s28 = smov 16  }
  0xb2   : > { %6496 = dma.hbm_to_vmem [thread:$0]  (!%p7911_p6), %s9204_s11, 32, %s669_s27, [#allocation18], %s9206_s28, %s9206_s28, %s9205_s3  }
  0xb3   : > { %s9207_s13 = sld [smem:[#allocation55_spill]] }
  0xb9   : > { %s7286_s0 = scalar_lea.hbm %s9207_s13, 32 }
  0xba   : > { %p7287_p1 = scmp.ne.s32.totalorder %s9207_s13, %s7286_s0  ;;  %p7293_p0 = scmp.lt.u32.totalorder %s7286_s0, %s9207_s13 }
  0xbc   : > { %p7289_p3 = pnand %p7287_p1, %p7927_p8 }
  0xbe   : > { %p7290_p13 = pneg %p7289_p3 }
  0xc0   : > { %p7295_p2 = pnand %p7293_p0, %p7290_p13 }
  0xc2   : > { %7298 = shalt.err (!%p7295_p2)
}
  0xc3   : > { %s7299_s27 = scalar_lea.vmem %s8019_s20, 32  ;;  %p7307_p4 = scmp.lt.s32.totalorder %s8019_s20, %s8019_s20 }
  0xc4   : > { %p7300_p5 = scmp.ne.s32.totalorder %s8019_s20, %s7299_s27  ;;  %p7308_p10 = scmp.lt.s32.totalorder %s7299_s27, %s7299_s27 }
  0xc6   : > { %p7302_p7 = pnand %p7300_p5, %p7927_p8  ;;  %p7309_p11 = por %p7308_p10, %p7307_p4 }
  0xc8   : > { %p7303_p9 = pneg %p7302_p7 }
  0xca   : > { %p7310_p12 = pnand %p7309_p11, %p7303_p9 }
  0xcc   : > { %7313 = shalt.err (!%p7310_p12)
}
  0xcd   : > { %6502 = dma.hbm_to_vmem [thread:$0]  (!%p7911_p6), %s9207_s13, 32, %s8019_s20, [#allocation21], %s9206_s28, %s9206_s28, %s9205_s3  }
  0xce   : > { %s7736_s15 = smov [#allocation23]   ;;  %s7737_s25 = smov [#allocation26]  }
  0xcf   : > { %s723_s21 = sshll.u32 %s7736_s15, 4  ;;  %s750_s0 = sshll.u32 %s7737_s25, 4  ;;  %s724_s21 = int_to_ptr.vmem [resolvable:$true] %s723_s21  ;;  %s8068_s0 = int_to_ptr.vmem [resolvable:$true] %s750_s0 }
  0xd0   : > { %s9208_s16 = sld [smem:[#allocation57_spill]] }
  0xd6   : > { %s7314_s22 = scalar_lea.hbm %s9208_s16, 8192 }
  0xd7   : > { %p7315_p1 = scmp.ne.s32.totalorder %s9208_s16, %s7314_s22  ;;  %p7321_p0 = scmp.lt.u32.totalorder %s7314_s22, %s9208_s16 }
  0xd9   : > { %p7317_p3 = pnand %p7315_p1, %p7927_p8 }
  0xdb   : > { %p7318_p13 = pneg %p7317_p3 }
  0xdd   : > { %p7323_p2 = pnand %p7321_p0, %p7318_p13 }
  0xdf   : > { %7326 = shalt.err (!%p7323_p2)
}
  0xe0   : > { %s7327_s23 = scalar_lea.vmem %s724_s21, 8192  ;;  %p7335_p4 = scmp.lt.s32.totalorder %s724_s21, %s724_s21 }
  0xe1   : > { %p7328_p5 = scmp.ne.s32.totalorder %s724_s21, %s7327_s23  ;;  %p7336_p10 = scmp.lt.s32.totalorder %s7327_s23, %s7327_s23 }
  0xe3   : > { %p7330_p7 = pnand %p7328_p5, %p7927_p8  ;;  %p7337_p11 = por %p7336_p10, %p7335_p4 }
  0xe5   : > { %p7331_p9 = pneg %p7330_p7 }
  0xe7   : > { %p7338_p12 = pnand %p7337_p11, %p7331_p9 }
  0xe9   : > { %7341 = shalt.err (!%p7338_p12)
}
  0xea   : > { %s9209_s15 = smov 4   ;;  %s9210_s25 = smov 64  }
  0xeb   : > { %6508 = dma.hbm_to_vmem [thread:$0]  (!%p7911_p6), %s9208_s16, 8192, %s724_s21, [#allocation24], %s9210_s25, %s9210_s25, %s9209_s15  }
  0xec   : > { %s9211_s18 = sld [smem:[#allocation58_spill]] }
  0xf2   : > { %s7342_s27 = scalar_lea.hbm %s9211_s18, 16 }
  0xf3   : > { %p7343_p1 = scmp.ne.s32.totalorder %s9211_s18, %s7342_s27  ;;  %p7349_p0 = scmp.lt.u32.totalorder %s7342_s27, %s9211_s18 }
  0xf5   : > { %p7345_p3 = pnand %p7343_p1, %p7927_p8 }
  0xf7   : > { %p7346_p13 = pneg %p7345_p3 }
  0xf9   : > { %p7351_p2 = pnand %p7349_p0, %p7346_p13 }
  0xfb   : > { %7354 = shalt.err (!%p7351_p2)
}
  0xfc   : > { %s7355_s21 = scalar_lea.vmem %s8068_s0, 16  ;;  %s7362_s24 = scalar_lea.vmem %s8068_s0, 32 }
  0xfd   : > { %p7356_p5 = scmp.ne.s32.totalorder %s8068_s0, %s7355_s21  ;;  %p7363_p4 = scmp.lt.s32.totalorder %s8068_s0, %s8068_s0 }
  0xfe   : > { %p7364_p10 = scmp.lt.s32.totalorder %s7362_s24, %s7355_s21 }
  0xff   : > { %p7358_p7 = pnand %p7356_p5, %p7927_p8 }
 0x100   : > { %p7365_p11 = por %p7364_p10, %p7363_p4 }
 0x101   : > { %p7359_p9 = pneg %p7358_p7 }
 0x103   : > { %p7366_p12 = pnand %p7365_p11, %p7359_p9 }
 0x105   : > { %7369 = shalt.err (!%p7366_p12)
}
 0x106   : > { %6514 = dma.hbm_to_vmem [thread:$0]  (!%p7911_p6), %s9211_s18, 16, %s8068_s0, [#allocation27]  }
 0x107   : > { %s7738_s22 = smov [#allocation7]   ;;  %s9212_s20 = sld [smem:[#allocation48_spill]] }
 0x108   : > { %s578_s2 = sshll.u32 %s7738_s22, 4  ;;  %s579_s2 = int_to_ptr.vmem [resolvable:$true] %s578_s2 }
 0x10d   : > { %s7370_s23 = scalar_lea.hbm %s9212_s20, 384 }
 0x10e   : > { %p7371_p1 = scmp.ne.s32.totalorder %s9212_s20, %s7370_s23  ;;  %p7377_p0 = scmp.lt.u32.totalorder %s7370_s23, %s9212_s20 }
 0x110   : > { %p7373_p3 = pnand %p7371_p1, %p7927_p8 }
 0x112   : > { %p7374_p13 = pneg %p7373_p3 }
 0x114   : > { %p7379_p2 = pnand %p7377_p0, %p7374_p13 }
 0x116   : > { %7382 = shalt.err (!%p7379_p2)
}
 0x117   : > { %s7383_s0 = scalar_lea.vmem %s579_s2, 384  ;;  %p7391_p4 = scmp.lt.s32.totalorder %s579_s2, %s579_s2 }
 0x118   : > { %p7384_p5 = scmp.ne.s32.totalorder %s579_s2, %s7383_s0  ;;  %p7392_p10 = scmp.lt.s32.totalorder %s7383_s0, %s7383_s0 }
 0x11a   : > { %p7386_p7 = pnand %p7384_p5, %p7927_p8  ;;  %p7393_p11 = por %p7392_p10, %p7391_p4 }
 0x11c   : > { %p7387_p9 = pneg %p7386_p7 }
 0x11e   : > { %p7394_p12 = pnand %p7393_p11, %p7387_p9 }
 0x120   : > { %7397 = shalt.err (!%p7394_p12)
}
 0x121   : > { %s9172_s4 = smov 128   ;;  %s9173_s1 = smov 8  }
 0x122   : > { %6475 = dma.hbm_to_vmem [thread:$0]  (!%p7911_p6), %s9212_s20, 384, %s579_s2, [#allocation6], %s9172_s4, %s9172_s4, %s9173_s1  }
 0x123   : > { %s7741_s22 = smov [#allocation10]   ;;  %s7742_s29 = smov [#allocation13]  }
 0x124   : > { %s603_s27 = sshll.u32 %s7741_s22, 4  ;;  %s629_s23 = sshll.u32 %s7742_s29, 4  ;;  %s604_s27 = int_to_ptr.vmem [resolvable:$true] %s603_s27  ;;  %s630_s23 = int_to_ptr.vmem [resolvable:$true] %s629_s23 }
 0x125   : > { %s9213_s0 = sld [smem:[#allocation50_spill]] }
 0x12b   : > { %s7398_s9 = scalar_lea.hbm %s9213_s0, 16 }
 0x12c   : > { %p7399_p1 = scmp.ne.s32.totalorder %s9213_s0, %s7398_s9  ;;  %p7405_p0 = scmp.lt.u32.totalorder %s7398_s9, %s9213_s0 }
 0x12e   : > { %p7401_p3 = pnand %p7399_p1, %p7927_p8 }
 0x130   : > { %p7402_p13 = pneg %p7401_p3 }
 0x132   : > { %p7407_p2 = pnand %p7405_p0, %p7402_p13 }
 0x134   : > { %7410 = shalt.err (!%p7407_p2)
}
 0x135   : > { %s7411_s2 = scalar_lea.vmem %s604_s27, 16  ;;  %s7418_s7 = scalar_lea.vmem %s604_s27, 32 }
 0x136   : > { %p7412_p5 = scmp.ne.s32.totalorder %s604_s27, %s7411_s2  ;;  %p7419_p4 = scmp.lt.s32.totalorder %s604_s27, %s604_s27 }
 0x137   : > { %p7420_p10 = scmp.lt.s32.totalorder %s7418_s7, %s7411_s2 }
 0x138   : > { %p7414_p7 = pnand %p7412_p5, %p7927_p8 }
 0x139   : > { %p7421_p11 = por %p7420_p10, %p7419_p4 }
 0x13a   : > { %p7415_p9 = pneg %p7414_p7 }
 0x13c   : > { %p7422_p12 = pnand %p7421_p11, %p7415_p9 }
 0x13e   : > { %7425 = shalt.err (!%p7422_p12)
}
 0x13f   : > { %6481 = dma.hbm_to_vmem [thread:$0]  (!%p7911_p6), %s9213_s0, 16, %s604_s27, [#allocation9]  }
 0x140   : > { %s7426_s18 = scalar_lea.hbm %s9130_s8, 6144 }
 0x141   : > { %p7427_p1 = scmp.ne.s32.totalorder %s9130_s8, %s7426_s18  ;;  %p7433_p0 = scmp.lt.u32.totalorder %s7426_s18, %s9130_s8 }
 0x143   : > { %p7429_p3 = pnand %p7427_p1, %p7927_p8 }
 0x145   : > { %p7430_p13 = pneg %p7429_p3 }
 0x147   : > { %p7435_p2 = pnand %p7433_p0, %p7430_p13 }
 0x149   : > { %7438 = shalt.err (!%p7435_p2)
}
 0x14a   : > { %s7439_s24 = scalar_lea.vmem %s630_s23, 6144  ;;  %p7447_p4 = scmp.lt.s32.totalorder %s630_s23, %s630_s23 }
 0x14b   : > { %p7440_p5 = scmp.ne.s32.totalorder %s630_s23, %s7439_s24  ;;  %p7448_p10 = scmp.lt.s32.totalorder %s7439_s24, %s7439_s24 }
 0x14d   : > { %p7442_p7 = pnand %p7440_p5, %p7927_p8  ;;  %p7449_p11 = por %p7448_p10, %p7447_p4 }
 0x14f   : > { %p7443_p9 = pneg %p7442_p7 }
 0x151   : > { %p7450_p12 = pnand %p7449_p11, %p7443_p9 }
 0x153   : > { %7453 = shalt.err (!%p7450_p12)
}
 0x154   : > { %s7743_s27 = smov 192   ;;  %s7744_s2 = smov 12  }
 0x155   : > { %6487 = dma.hbm_to_vmem [thread:$0]  (!%p7911_p6), %s9130_s8, 6144, %s630_s23, [#allocation12], %s7743_s27, %s7743_s27, %s7744_s2  }
 0x156   : > { %s7745_s13 = smov [#allocation16]   ;;  %s7746_s16 = smov [#allocation19]  }
 0x157   : > { %s655_s9 = sshll.u32 %s7745_s13, 4  ;;  %s681_s18 = sshll.u32 %s7746_s16, 4  ;;  %s656_s9 = int_to_ptr.vmem [resolvable:$true] %s655_s9  ;;  %s682_s18 = int_to_ptr.vmem [resolvable:$true] %s681_s18 }
 0x158   : > { %s7454_s29 = scalar_lea.hbm %s9132_s10, 2048 }
 0x159   : > { %p7455_p1 = scmp.ne.s32.totalorder %s9132_s10, %s7454_s29  ;;  %p7461_p0 = scmp.lt.u32.totalorder %s7454_s29, %s9132_s10 }
 0x15b   : > { %p7457_p3 = pnand %p7455_p1, %p7927_p8 }
 0x15d   : > { %p7458_p13 = pneg %p7457_p3 }
 0x15f   : > { %p7463_p2 = pnand %p7461_p0, %p7458_p13 }
 0x161   : > { %7466 = shalt.err (!%p7463_p2)
}
 0x162   : > { %s7467_s23 = scalar_lea.vmem %s656_s9, 2048  ;;  %p7475_p4 = scmp.lt.s32.totalorder %s656_s9, %s656_s9 }
 0x163   : > { %p7468_p5 = scmp.ne.s32.totalorder %s656_s9, %s7467_s23  ;;  %p7476_p10 = scmp.lt.s32.totalorder %s7467_s23, %s7467_s23 }
 0x165   : > { %p7470_p7 = pnand %p7468_p5, %p7927_p8  ;;  %p7477_p11 = por %p7476_p10, %p7475_p4 }
 0x167   : > { %p7471_p9 = pneg %p7470_p7 }
 0x169   : > { %p7478_p12 = pnand %p7477_p11, %p7471_p9 }
 0x16b   : > { %7481 = shalt.err (!%p7478_p12)
}
 0x16c   : > { %6493 = dma.hbm_to_vmem [thread:$0]  (!%p7911_p6), %s9132_s10, 2048, %s656_s9, [#allocation15], %s9210_s25, %s9210_s25, %s9209_s15  }
 0x16d   : > { %s7482_s7 = scalar_lea.hbm %s9134_s12, 32 }
 0x16e   : > { %p7483_p1 = scmp.ne.s32.totalorder %s9134_s12, %s7482_s7  ;;  %p7489_p0 = scmp.lt.u32.totalorder %s7482_s7, %s9134_s12 }
 0x170   : > { %p7485_p3 = pnand %p7483_p1, %p7927_p8 }
 0x172   : > { %p7486_p13 = pneg %p7485_p3 }
 0x174   : > { %p7491_p2 = pnand %p7489_p0, %p7486_p13 }
 0x176   : > { %7494 = shalt.err (!%p7491_p2)
}
 0x177   : > { %s7495_s22 = scalar_lea.vmem %s682_s18, 32  ;;  %p7503_p4 = scmp.lt.s32.totalorder %s682_s18, %s682_s18 }
 0x178   : > { %p7496_p5 = scmp.ne.s32.totalorder %s682_s18, %s7495_s22  ;;  %p7504_p10 = scmp.lt.s32.totalorder %s7495_s22, %s7495_s22 }
 0x17a   : > { %p7498_p7 = pnand %p7496_p5, %p7927_p8  ;;  %p7505_p11 = por %p7504_p10, %p7503_p4 }
 0x17c   : > { %p7499_p9 = pneg %p7498_p7 }
 0x17e   : > { %p7506_p12 = pnand %p7505_p11, %p7499_p9 }
 0x180   : > { %7509 = shalt.err (!%p7506_p12)
}
 0x181   : > { %6499 = dma.hbm_to_vmem [thread:$0]  (!%p7911_p6), %s9134_s12, 32, %s682_s18, [#allocation18], %s9206_s28, %s9206_s28, %s9205_s3  }
 0x182   : > { %s7747_s9 = smov [#allocation22]   ;;  %s7510_s23 = scalar_lea.hbm %s9136_s14, 8192 }
 0x183   : > { %s707_s29 = sshll.u32 %s7747_s9, 4  ;;  %p7511_p1 = scmp.ne.s32.totalorder %s9136_s14, %s7510_s23  ;;  %s708_s29 = int_to_ptr.vmem [resolvable:$true] %s707_s29 }
 0x184   : > { %p7517_p0 = scmp.lt.u32.totalorder %s7510_s23, %s9136_s14 }
 0x185   : > { %p7513_p3 = pnand %p7511_p1, %p7927_p8 }
 0x187   : > { %p7514_p13 = pneg %p7513_p3 }
 0x189   : > { %p7519_p2 = pnand %p7517_p0, %p7514_p13 }
 0x18b   : > { %7522 = shalt.err (!%p7519_p2)
}
 0x18c   : > { %s7523_s18 = scalar_lea.vmem %s708_s29, 8192  ;;  %p7531_p4 = scmp.lt.s32.totalorder %s708_s29, %s708_s29 }
 0x18d   : > { %p7524_p5 = scmp.ne.s32.totalorder %s708_s29, %s7523_s18  ;;  %p7532_p10 = scmp.lt.s32.totalorder %s7523_s18, %s7523_s18 }
 0x18f   : > { %p7526_p7 = pnand %p7524_p5, %p7927_p8  ;;  %p7533_p11 = por %p7532_p10, %p7531_p4 }
 0x191   : > { %p7527_p9 = pneg %p7526_p7 }
 0x193   : > { %p7534_p12 = pnand %p7533_p11, %p7527_p9 }
 0x195   : > { %7537 = shalt.err (!%p7534_p12)
}
 0x196   : > { %s7748_s7 = smov 256   ;;  %s7749_s16 = smov [#allocation25]  }
 0x197   : > { %6505 = dma.hbm_to_vmem [thread:$0]  (!%p7911_p6), %s9136_s14, 8192, %s708_s29, [#allocation21], %s7748_s7, %s7748_s7, %s9206_s28  }
 0x198   : > { %s736_s26 = sshll.u32 %s7749_s16, 4  ;;  %s7750_s22 = smov [#allocation28]   ;;  %s737_s26 = int_to_ptr.vmem [resolvable:$true] %s736_s26 }
 0x199   : > { %s761_s15 = sshll.u32 %s7750_s22, 4  ;;  %s7538_s21 = scalar_lea.hbm %s9139_s17, 32  ;;  %s762_s15 = int_to_ptr.vmem [resolvable:$true] %s761_s15 }
 0x19a   : > { %p7539_p1 = scmp.ne.s32.totalorder %s9139_s17, %s7538_s21  ;;  %p7545_p0 = scmp.lt.u32.totalorder %s7538_s21, %s9139_s17 }
 0x19c   : > { %p7541_p3 = pnand %p7539_p1, %p7927_p8 }
 0x19e   : > { %p7542_p13 = pneg %p7541_p3 }
 0x1a0   : > { %p7547_p2 = pnand %p7545_p0, %p7542_p13 }
 0x1a2   : > { %7550 = shalt.err (!%p7547_p2)
}
 0x1a3   : > { %s7551_s29 = scalar_lea.vmem %s737_s26, 32  ;;  %p7559_p4 = scmp.lt.s32.totalorder %s737_s26, %s737_s26 }
 0x1a4   : > { %p7552_p5 = scmp.ne.s32.totalorder %s737_s26, %s7551_s29  ;;  %p7560_p10 = scmp.lt.s32.totalorder %s7551_s29, %s7551_s29 }
 0x1a6   : > { %p7554_p7 = pnand %p7552_p5, %p7927_p8  ;;  %p7561_p11 = por %p7560_p10, %p7559_p4 }
 0x1a8   : > { %p7555_p9 = pneg %p7554_p7 }
 0x1aa   : > { %p7562_p12 = pnand %p7561_p11, %p7555_p9 }
 0x1ac   : > { %7565 = shalt.err (!%p7562_p12)
}
 0x1ad   : > { %6511 = dma.hbm_to_vmem [thread:$0]  (!%p7911_p6), %s9139_s17, 32, %s737_s26, [#allocation24], %s9206_s28, %s9206_s28, %s9205_s3  }
 0x1ae   : > { %s7566_s11 = scalar_lea.hbm %s9141_s19, 16 }
 0x1af   : > { %p7567_p1 = scmp.ne.s32.totalorder %s9141_s19, %s7566_s11  ;;  %p7573_p0 = scmp.lt.u32.totalorder %s7566_s11, %s9141_s19 }
 0x1b1   : > { %p7569_p3 = pnand %p7567_p1, %p7927_p8 }
 0x1b3   : > { %p7570_p13 = pneg %p7569_p3 }
 0x1b5   : > { %p7575_p2 = pnand %p7573_p0, %p7570_p13 }
 0x1b7   : > { %7578 = shalt.err (!%p7575_p2)
}
 0x1b8   : > { %s7579_s9 = scalar_lea.vmem %s762_s15, 16  ;;  %s7586_s3 = scalar_lea.vmem %s762_s15, 32 }
 0x1b9   : > { %p7580_p5 = scmp.ne.s32.totalorder %s762_s15, %s7579_s9  ;;  %p7587_p4 = scmp.lt.s32.totalorder %s762_s15, %s762_s15 }
 0x1ba   : > { %p7588_p10 = scmp.lt.s32.totalorder %s7586_s3, %s7579_s9 }
 0x1bb   : > { %p7582_p7 = pnand %p7580_p5, %p7927_p8 }
 0x1bc   : > { %p7589_p11 = por %p7588_p10, %p7587_p4 }
 0x1bd   : > { %p7583_p9 = pneg %p7582_p7 }
 0x1bf   : > { %p7590_p12 = pnand %p7589_p11, %p7583_p9 }
 0x1c1   : > { %7593 = shalt.err (!%p7590_p12)
}
 0x1c2   : > { %s9214_s21 = sld [smem:[#allocation42_spill]]  ;;  %s9215_s24 = sld [smem:[#allocation41_spill]] }
 0x1c3   : > { %s9216_s5 = sld [smem:[#allocation40_spill]]  ;;  %s9217_s23 = sld [smem:[#allocation43_spill]] }
 0x1c4   : > { %6517 = dma.hbm_to_vmem [thread:$0]  (!%p7911_p6), %s9141_s19, 16, %s762_s15, [#allocation27]  }
 0x1c5   : > { %s5601_s4 = sadd.s32 4294967294, %s7722_s30   ;;  %s8274_s6 = sadd.s32 1, %s7722_s30  }
 0x1c6   : > { %s51_s29 = ssub.s32 %s7722_s30, %s8274_s6  ;;  %p62_p3 = scmp.eq.s32.totalorder %s7722_s30, 0 }
 0x1c7   : > { %p52_p1 = scmp.eq.s32.totalorder %s51_s29, 0  ;;  %p517_p9 = scmp.eq.s32.totalorder %s5601_s4, 1 }
 0x1c8   : > { %s54_s1 = sadd.s32 1, %s9214_s21  ;;  %p61_p8 = scmp.ne.s32.totalorder %s9214_s21, %s9215_s24 }
 0x1c9   : > { %p67_p13 = scmp.ne.s32.totalorder %s9215_s24, %s9216_s5  ;;  %p511_p0 = scmp.eq.s32.totalorder %s9217_s23, 1 }
 0x1ca   : > { %s8286_s27 = scalar_select %p52_p1, %s9214_s21, %s54_s1  }
 0x1cb   : > { %p63_p2 = por %p62_p3, %p61_p8  ;;  %p9218_p5 = scmp.eq.s32.totalorder %s9217_s23, 0 }
 0x1cc   : > { %p8294_p6 = por %p511_p0, %p61_p8  ;;  %p6542_p4 = scmp.lt.s32.totalorder %s7722_s30, 2 }
 0x1cd   : > { %p8290_p7 = por %p9218_p5, %p67_p13  ;;  %s775_s18 = sand.u32 1, %s9214_s21  }
 0x1ce   : > { %s9220_s15 = scalar_select %p8294_p6, 1, 0 }
 0x1cf   : > { %p8300_p10 = por %p517_p9, %p67_p13  ;;  %s5620_s11 = sshll.u32 %s775_s18, 4 }
 0x1d0   : > { %s5931_s13 = sshll.u32 %s7722_s30, 8  ;;  %s9222_s25 = sld [smem:[#allocation45_spill]] }
 0x1d1   : > { %s9221_s7 = scalar_select %p8300_p10, 1, 0 }
 0x1d2   : > { %s779_s3 = scalar_lea.vmem [#allocation2], %s5620_s11  ;;  %p8310_p11 = pnand %p6542_p4, %p63_p2 }
 0x1d3   : > { %s786_s28 = sshll.u32 %s779_s3, 4  ;;  %s8316_s21 = scalar_lea.sflag [#allocation3], %s775_s18  ;;  %s8314_s28 = int_to_ptr.vmem [resolvable:$true] %s786_s28 }
 0x1d4   : > { %p7596_p8 = pneg %p8310_p11 }
 0x1d6   : > { %s8308_s9 = scalar_lea.hbm %s9222_s25, %s5931_s13  ;;  %s7599_s4 = scalar_lea.hbm %s9222_s25, 512 }
 0x1d7   : > { %s7594_s24 = scalar_lea.hbm %s8308_s9, 256  ;;  %p7600_p13 = scmp.lt.u32.totalorder %s8308_s9, %s9222_s25 }
 0x1d8   : > { %p7595_p12 = scmp.ne.s32.totalorder %s8308_s9, %s7594_s24  ;;  %p7601_p0 = scmp.lt.u32.totalorder %s7599_s4, %s7594_s24 }
 0x1d9   : > { %p7603_p5 = scmp.lt.u32.totalorder %s7594_s24, %s8308_s9 }
 0x1da   : > { %p7597_p1 = pnand %p7596_p8, %p7595_p12  ;;  %p7602_p2 = por %p7601_p0, %p7600_p13 }
 0x1dc   : > { %p7598_p3 = pneg %p7597_p1  ;;  %p7604_p9 = por %p7603_p5, %p7602_p2 }
 0x1de   : > { %p7605_p4 = pnand %p7604_p9, %p7598_p3 }
 0x1e0   : > { %7608 = shalt.err (!%p7605_p4)
}
 0x1e1   : > { %s7609_s18 = scalar_lea.vmem %s8314_s28, 256  ;;  %s7751_s11 = smov [#allocation2]  }
 0x1e2   : > { %p7610_p12 = scmp.ne.s32.totalorder %s8314_s28, %s7609_s18  ;;  %s7614_s13 = sshll.u32 %s7751_s11, 4  ;;  %s7615_s13 = int_to_ptr.vmem [resolvable:$false] %s7614_s13 }
 0x1e3   : > { %s7616_s16 = scalar_lea.vmem %s7615_s13, 512  ;;  %p7617_p6 = scmp.lt.s32.totalorder %s8314_s28, %s7615_s13 }
 0x1e4   : > { %p7612_p1 = pnand %p7610_p12, %p7596_p8  ;;  %p7618_p13 = scmp.lt.s32.totalorder %s7616_s16, %s7609_s18 }
 0x1e6   : > { %p7613_p10 = pneg %p7612_p1  ;;  %p7619_p0 = por %p7618_p13, %p7617_p6 }
 0x1e8   : > { %p7620_p2 = pnand %p7619_p0, %p7613_p10 }
 0x1ea   : > { %7623 = shalt.err (!%p7620_p2)
}
 0x1eb   : > { %s9224_s22 = smov 8   ;;  %s9225_s3 = smov 128  }
 0x1ec   : > { %6521 = dma.hbm_to_vmem [thread:$0]  (!%p8310_p11), %s8308_s9, 256, %s8314_s28, %s8316_s21, %s9225_s3, %s9225_s3, %s9224_s22  }
 0x1ed   : > { %s9226_s24 = sld [smem:[#allocation44_spill]] }
 0x1f3   : > { %p9227_p8 = scmp.ne.s32.totalorder %s9226_s24, 0 }
 0x1f4   : > { %s9228_s5 = sld [smem:[#allocation41_spill]] (!%p9227_p8) }
 0x1f5   : > { %798 = sbr.rel (%p9227_p8) target bundleno = 8484 (0x2124), region = 104 }
 0x1fa   : > { %s8350_s23 = sand.u32 (!%p9227_p8), 1, %s9228_s5  }
 0x1fb   : > { %s5624_s4 = sshll.u32 (!%p9227_p8), %s8350_s23, 4  ;;  %s801_s1 = scalar_lea.sflag (!%p9227_p8), [#allocation3], %s8350_s23 }
 0x1fc   : > { %s8354_s29 = scalar_lea.vmem [#allocation2], %s5624_s4 }
 0x1fd   : > { %7669 = dma.done.wait (%p8290_p7), %s801_s1, 256  }
 0x1fe   : > { %7671 = vsyncadd (%p8290_p7), %s801_s1, 4294967040  ;;  %s9229_s26 = sld [smem:[#allocation43_spill]] }
 0x204   : > { %p9230_p6 = scmp.eq.s32.totalorder %s9229_s26, 0 }
 0x206   : > { %7673 = dma.done.wait (%p9230_p6), [#allocation6], 1920   ;;  %p9231_p10 = pmov %p9230_p6 }
 0x207   : > { %p9232_p11 = pmov %p9230_p6 }
 0x208   : > { %7675 = vsyncadd (%p9231_p10), [#allocation6], 4294965376 }
 0x209   : > { %7677 = dma.done.wait (%p9232_p11), [#allocation9], 32   ;;  %p9233_p3 = pmov %p9230_p6 }
 0x20b   : > { %7679 = vsyncadd (%p9233_p3), [#allocation9], 4294967264  ;;  %p9234_p5 = pmov %p9233_p3 }
 0x20c   : > { %p9235_p9 = pmov %p9233_p3 }
 0x20d   : > { %7681 = dma.done.wait (%p9234_p5), [#allocation12], 6176  }
 0x20e   : > { %7683 = vsyncadd (%p9235_p9), [#allocation12], 4294961120  ;;  %p9236_p7 = pmov %p9233_p3 }
 0x20f   : > { %p9237_p4 = pmov %p9233_p3 }
 0x210   : > { %7685 = dma.done.wait (%p9236_p7), [#allocation15], 2144  }
 0x211   : > { %7687 = vsyncadd (%p9237_p4), [#allocation15], 4294965152  ;;  %p9238_p12 = pmov %p9233_p3 }
 0x212   : > { %p9239_p1 = pmov %p9233_p3 }
 0x213   : > { %7689 = dma.done.wait (%p9238_p12), [#allocation18], 64  }
 0x214   : > { %7691 = vsyncadd (%p9239_p1), [#allocation18], 4294967232  ;;  %p9240_p13 = pmov %p9239_p1 }
 0x215   : > { %p9241_p0 = pmov %p9239_p1 }
 0x216   : > { %7693 = dma.done.wait (%p9240_p13), [#allocation21], 8224  }
 0x217   : > { %7695 = vsyncadd (%p9241_p0), [#allocation21], 4294959072  ;;  %p9242_p2 = pmov %p9241_p0 }
 0x218   : > { %p9243_p8 = pmov %p9241_p0 }
 0x219   : > { %7697 = dma.done.wait (%p9242_p2), [#allocation24], 8224  }
 0x21a   : > { %7699 = vsyncadd (%p9243_p8), [#allocation24], 4294959072  ;;  %p9244_p6 = pmov %p9241_p0 }
 0x21b   : > { %p9245_p10 = pmov %p9241_p0 }
 0x21c   : > { %7701 = dma.done.wait (%p9244_p6), [#allocation27], 32  }
 0x21d   : > { %7703 = vsyncadd (%p9245_p10), [#allocation27], 4294967264  ;;  %v7752_v0 = vmov 0   ;;  %v6655_v1 = vld [vmem:[#allocation5] sm:$0xff]   ;;  %v6656_v2 = vld [vmem:[#allocation5 + $0x8] sm:$0xff]   ;;  %vm1042_vm0 = vcmask 523264  }
 0x21e   : > { %1046 = vmatprep.subr.bf16.mxu0 %v7752_v0  ;;  %1543 = vmatprep.mubr.bf16.mxu1 %v7752_v0  ;;  %v6657_v3 = vld [vmem:[#allocation5 + $0x10] sm:$0xff]   ;;  %v6658_v4 = vld [vmem:[#allocation5 + $0x18] sm:$0xff]   ;;  %v6659_v5 = vld [vmem:[#allocation5 + $0x20] sm:$0xff]   ;;  %s9246_s28 = sld [smem:[#allocation47_spill]]  ;;  %vm1090_vm1 = vcmask 1040384   ;;  %s9247_s11 = sld [smem:[#allocation51_spill]] }
 0x21f   : > { %1047 = vmatpush1.bf16.msra.mxu0 %v6655_v1  ;;  %v6669_v6 = vld [vmem:[%s8354_s29 + $0x4] ss:$8 sps:$4 sm:$0xff]   ;;  %v6667_v14 = vld [vmem:[%s8354_s29] ss:$8 sps:$4 sm:$0xff]   ;;  %vm1616_vm2 = vcmask 261120   ;;  %s7753_s13 = smov 96  }
 0x220   : > { %1048 = vmatprep.subr.bf16.mxu0 %v7752_v0  ;;  %5655 = vmatprep.mubr.msk.bf16.mxu0 %vm1042_vm0, %v6669_v6  ;;  %v6660_v7 = vld [vmem:[#allocation5 + $0x28] sm:$0xff]   ;;  %v6661_v8 = vld [vmem:[#allocation5 + $0x30] sm:$0xff]   ;;  %v6662_v9 = vld [vmem:[#allocation5 + $0x38] sm:$0xff]   ;;  %vm1687_vm3 = vcmask 131072   ;;  %vm1680_vm4 = vcmask 138240   ;;  %s7754_s16 = smov 64  }
 0x221   : > { %v6663_v10 = vld [vmem:[#allocation5 + $0x40] sm:$0xff]   ;;  %v6664_v11 = vld [vmem:[#allocation5 + $0x48] sm:$0xff]   ;;  %v6665_v12 = vld [vmem:[#allocation5 + $0x50] sm:$0xff]   ;;  %s7755_s22 = smov 32   ;;  %vm2328_vm5 = vcmask 785408   ;;  %s9248_s5 = sld [smem:[#allocation56_spill]] }
 0x222   : > { %v6666_v13 = vld [vmem:[#allocation5 + $0x58] sm:$0xff]   ;;  %v1098_v19 = vld [vmem:[#allocation7] sm:$0xff]  ;;  %v1100_v21 = vld [vmem:[#allocation7 + $0x10] sm:$0x1]  ;;  %s9249_s21 = sld [smem:[#allocation59_spill]]  ;;  %vm7757_vm6 = vmmov 0  }
 0x223   : > { %1049 = vmatpush1.bf16.msra.mxu0 %v6656_v2  ;;  %v1099_v28 = vld [vmem:[#allocation7 + $0x8] sm:$0xff]  ;;  %v5656_v54 = vld [vmem:[#allocation8] ss:$0 sm:$0xff]  ;;  %v5657_v56 = vld [vmem:[#allocation10] ss:$0 sm:$0xff]  ;;  %p931_p11 = scmp.lt.s32.totalorder %s9229_s26, 1 }
 0x224   : > { %1050 = vmatprep.subr.bf16.mxu0 %v7752_v0  ;;  %v1087_v16 = vld [vmem:[%s9246_s28] sm:$0x1]  ;;  %s9250_s24 = sld [smem:[#allocation61_spill]]  ;;  %vm5343_vm7 = vcmask 0   ;;  %s5928_s1 = sshll.u32 %s9229_s26, 4 }
 0x225   : > { %v6672_v6 = vld [vmem:[#allocation13] ss:$12 sps:$4 sm:$0xff]   ;;  %s925_s29 = scalar_lea.vmem [#allocation29], %s8350_s23  ;;  %s9251_s18 = sld [smem:[#allocation60_spill]] }
 0x226   : > { %s5361_s2 = sshll.u32 %s925_s29, 4  ;;  %p9252_p5 = scmp.ne.s32.totalorder %s9220_s15, 0  ;;  %s9080_s2 = int_to_ptr.vmem [resolvable:$true] %s5361_s2 }
 0x227   : > { %1051 = vmatpush1.bf16.msra.mxu0 %v6657_v3 }
 0x228   : > { %1052 = vmatprep.subr.bf16.mxu0 %v7752_v0 }
 0x22b   : > { %1053 = vmatpush1.bf16.msra.mxu0 %v6658_v4 }
 0x22c   : > { %1054 = vmatprep.subr.bf16.mxu0 %v7752_v0 }
 0x22f   : > { %1055 = vmatpush1.bf16.msra.mxu0 %v6659_v5  ;;  %v6670_v5 = vld [vmem:[#allocation13 + $0x4] ss:$12 sps:$4 sm:$0xff]  }
 0x230   : > { %1056 = vmatprep.subr.bf16.mxu0 %v7752_v0  ;;  %1511 = vmatprep.subr.bf16.mxu1 %v6670_v5  ;;  %v6700_v5 = vld [vmem:[#allocation13 + $0x98] ss:$12 sps:$4 sm:$0xff]  }
 0x231   : > { %1512 = vmatpush1.bf16.msra.mxu1 %v6672_v6  ;;  %v6701_v6 = vld [vmem:[#allocation13 + $0xb0] ss:$12 sps:$4 sm:$0xff]  }
 0x233   : > { %1057 = vmatpush1.bf16.msra.mxu0 %v6660_v7  ;;  %v6673_v7 = vld [vmem:[#allocation13 + $0x1c] ss:$12 sps:$4 sm:$0xff]  }
 0x234   : > { %1058 = vmatprep.subr.bf16.mxu0 %v7752_v0  ;;  %1513 = vmatprep.subr.bf16.mxu1 %v6673_v7  ;;  %v1368_v7 = vlaneseq }
 0x237   : > { %1059 = vmatpush1.bf16.msra.mxu0 %v6661_v8  ;;  %v6675_v8 = vld [vmem:[#allocation13 + $0x18] ss:$12 sps:$4 sm:$0xff]  }
 0x238   : > { %1060 = vmatprep.subr.bf16.mxu0 %v7752_v0  ;;  %1514 = vmatpush1.bf16.msra.mxu1 %v6675_v8  ;;  %v8433_v8 = vshrl.u32 %v1368_v7, 7 }
 0x23b   : > { %1061 = vmatpush1.bf16.msra.mxu0 %v6662_v9 }
 0x23c   : > { %1062 = vmatprep.subr.bf16.mxu0 %v7752_v0 }
 0x23f   : > { %1063 = vmatpush1.bf16.msra.mxu0 %v6663_v10 }
 0x240   : > { %1064 = vmatprep.subr.bf16.mxu0 %v7752_v0 }
 0x243   : > { %1065 = vmatpush1.bf16.msra.mxu0 %v6664_v11 }
 0x244   : > { %1066 = vmatprep.subr.bf16.mxu0 %v7752_v0 }
 0x247   : > { %1067 = vmatpush1.bf16.msra.mxu0 %v6665_v12 }
 0x248   : > { %1068 = vmatprep.subr.bf16.mxu0 %v7752_v0 }
 0x24b   : > { %1069 = vmatpush1.bf16.msra.mxu0 %v6666_v13 }
 0x24e   : > { %1079 = vmatmul.mubr.bf16.vlgmr.msra.gmra.mrb[0].mxu0 %v6667_v14 }
 0x321   : > { %v1080_v15 = vpop.f32.mrb[0].mxu0 }
 0x322   : > { %v1091_v17 = vrot.slane %v1080_v15, 7  ;;  %v1082_v18 = vpop.f32.mrb[1].mxu0 }
 0x323   : > { %v1083_v20 = vpop.f32.mrb[2].mxu0 }
 0x324   : > { %v1092_v22 = vrot.slane %v1083_v20, 7  ;;  %v1085_v23 = vpop.f32.mrb[3].mxu0  ;;  %v1097_v24 = vsel %vm1090_vm1, %v1087_v16, %v1091_v17 }
 0x325   : > { %v1101_v25 = vadd.f32 %v1098_v19, %v1097_v24  ;;  %v6678_v23 = vld [vmem:[#allocation13 + $0x30] ss:$12 sps:$4 sm:$0xff]   ;;  %v6679_v24 = vld [vmem:[#allocation13 + $0x4c] ss:$12 sps:$4 sm:$0xff]  }
 0x326   : > { %v1103_v26 = vadd.f32 %v1100_v21, %v1092_v22  ;;  %v1093_v27 = vsel %vm1090_vm1, %v1091_v17, %v1092_v22  ;;  %v6676_v22 = vld [vmem:[#allocation13 + $0x34] ss:$12 sps:$4 sm:$0xff]  }
 0x327   : > { %1106 = vadd.xlane.f32.xlu0 %v1101_v25  ;;  %v1102_v30 = vadd.f32 %v1099_v28, %v1093_v27  ;;  %1515 = vmatprep.subr.bf16.mxu1 %v6676_v22  ;;  %v6684_v27 = vld [vmem:[#allocation13 + $0x60] ss:$12 sps:$4 sm:$0xff]   ;;  %v6685_v28 = vld [vmem:[#allocation13 + $0x7c] ss:$12 sps:$4 sm:$0xff]  }
 0x328   : > { %v1110_v29 = vsel %vm1090_vm1, %v1103_v26, 0.0  ;;  %1516 = vmatpush1.bf16.msra.mxu1 %v6678_v23 }
 0x329   : > { %1111 = vadd.xlane.f32.xlu1 %v1110_v29  ;;  %1517 = vmatprep.subr.bf16.mxu1 %v6679_v24  ;;  %v6687_v29 = vld [vmem:[#allocation13 + $0x78] ss:$12 sps:$4 sm:$0xff]  }
 0x32b   : > { %1108 = vadd.xlane.f32.xlu0 %v1102_v30 }
 0x3b4   : > { %v1107_v31 = vpop.xlane.xlu0 %1106 }
 0x3b5   : > { %v1114_v32 = vmul.f32 0.0078125, %v1107_v31  ;;  %v6690_v31 = vld [vmem:[#allocation13 + $0x90] ss:$12 sps:$4 sm:$0xff]  }
 0x3b6   : > { %v1112_v33 = vpop.xlane.xlu1 %1111 }
 0x3b7   : > { %v1116_v34 = vmul.f32 0.0078125, %v1112_v33  ;;  %v1117_v35 = vsub.f32 %v1101_v25, %v1114_v32  ;;  %v6681_v25 = vld [vmem:[#allocation13 + $0x48] ss:$12 sps:$4 sm:$0xff]   ;;  %v6691_v32 = vld [vmem:[#allocation13 + $0xac] ss:$12 sps:$4 sm:$0xff]  }
 0x3b8   : > { %v1109_v36 = vpop.xlane.xlu0 %1108  ;;  %1518 = vmatpush1.bf16.msra.mxu1 %v6681_v25  ;;  %v6693_v33 = vld [vmem:[#allocation13 + $0xa8] ss:$12 sps:$4 sm:$0xff]  }
 0x3b9   : > { %v1119_v37 = vsub.f32 %v1103_v26, %v1116_v34  ;;  %v1115_v38 = vmul.f32 0.0078125, %v1109_v36  ;;  %v1120_v39 = vmul.f32 %v1117_v35, %v1117_v35  ;;  %v6682_v26 = vld [vmem:[#allocation13 + $0x64] ss:$12 sps:$4 sm:$0xff]   ;;  %v6694_v34 = vld [vmem:[#allocation13 + $0x8] ss:$12 sps:$4 sm:$0xff]  }
 0x3ba   : > { %1519 = vmatprep.subr.bf16.mxu1 %v6682_v26 }
 0x3bb   : > { %1123 = vadd.xlane.f32.xlu1 %v1120_v39  ;;  %v1122_v40 = vmul.f32 %v1119_v37, %v1119_v37  ;;  %v1118_v41 = vsub.f32 %v1102_v30, %v1115_v38  ;;  %v6688_v30 = vld [vmem:[#allocation13 + $0x94] ss:$12 sps:$4 sm:$0xff]  }
 0x3bc   : > { %1520 = vmatpush1.bf16.msra.mxu1 %v6684_v27 }
 0x3bd   : > { %v1127_v42 = vsel %vm1090_vm1, %v1122_v40, 0.0  ;;  %v1121_v43 = vmul.f32 %v1118_v41, %v1118_v41  ;;  %1521 = vmatprep.subr.bf16.mxu1 %v6685_v28 }
 0x3bf   : > { %1128 = vadd.xlane.f32.xlu1 %v1127_v42  ;;  %1125 = vadd.xlane.f32.xlu0 %v1121_v43 }
 0x3c0   : > { %1522 = vmatpush1.bf16.msra.mxu1 %v6687_v29 }
 0x3c1   : > { %1523 = vmatprep.subr.bf16.mxu1 %v6688_v30 }
 0x3c4   : > { %1524 = vmatpush1.bf16.msra.mxu1 %v6690_v31 }
 0x3c5   : > { %1525 = vmatprep.subr.bf16.mxu1 %v6691_v32 }
 0x3c8   : > { %1526 = vmatpush1.bf16.msra.mxu1 %v6693_v33 }
 0x3c9   : > { %6157 = vmatprep.subr.bf16.mxu1 %v6694_v34 }
 0x448   : > { %v1124_v44 = vpop.xlane.xlu1 %1123 }
 0x449   : > { %v1130_v45 = vmul.f32 0.0078125, %v1124_v44 }
 0x44b   : > { %v1133_v46 = vadd.f32 1e-05, %v1130_v45 }
 0x44c   : > { %v1129_v47 = vpop.xlane.xlu1 %1128  ;;  %v1126_v48 = vpop.xlane.xlu0 %1125 }
 0x44d   : > { %6918 = vrsqrt.f32 %v1133_v46  ;;  %v1132_v49 = vmul.f32 0.0078125, %v1129_v47  ;;  %v1131_v50 = vmul.f32 0.0078125, %v1126_v48  ;;  %v5658_v46 = vld [vmem:[%s9247_s11] ss:$0 sm:$0xff] }
 0x44f   : > { %v1135_v51 = vadd.f32 1e-05, %v1132_v49  ;;  %v1134_v52 = vadd.f32 1e-05, %v1131_v50 }
 0x451   : > { %6920 = vrsqrt.f32 %v1135_v51  ;;  %v5659_v51 = vld [vmem:[#allocation11] ss:$0 sm:$0xff] }
 0x452   : > { %6922 = vrsqrt.f32 %v1134_v52 }
 0x457   : > { %v6919_v53 = vpop.eup %6918 }
 0x458   : > { %v1139_v55 = vmul.f32 %v6919_v53, %v1117_v35 }
 0x45a   : > { %v1148_v57 = vmul.f32 %v5656_v54, %v1139_v55 }
 0x45b   : > { %v6921_v58 = vpop.eup %6920 }
 0x45c   : > { %v6923_v59 = vpop.eup %6922  ;;  %v8415_v60 = vadd.f32 %v5657_v56, %v1148_v57  ;;  %v1141_v61 = vmul.f32 %v6921_v58, %v1119_v37  ;;  %v6695_v57 = vld [vmem:[#allocation13 + $0x20] ss:$12 sps:$4 sm:$0xff]  }
 0x45d   : > { %v1140_v62 = vmul.f32 %v6923_v59, %v1118_v41  ;;  %v6696_v59 = vld [vmem:[#allocation13 + $0x38] ss:$12 sps:$4 sm:$0xff]  }
 0x45e   : > { %1312 = vadd.xlane.f32.xlu0 %v8415_v60  ;;  %v1150_v63 = vmul.f32 %v5656_v54, %v1141_v61 }
 0x45f   : > { %v1149_v1 = vmul.f32 %v5656_v54, %v1140_v62 }
 0x460   : > { %v8418_v2 = vadd.f32 %v5657_v56, %v1150_v63  ;;  %v6697_v63 = vld [vmem:[#allocation13 + $0x50] ss:$12 sps:$4 sm:$0xff]  }
 0x461   : > { %v8420_v3 = vadd.f32 %v5657_v56, %v1149_v1  ;;  %v6698_v1 = vld [vmem:[#allocation13 + $0x68] ss:$12 sps:$4 sm:$0xff]  }
 0x462   : > { %v1316_v4 = vsel %vm1090_vm1, %v8418_v2, 0.0 }
 0x463   : > { %1314 = vadd.xlane.f32.xlu1 %v8420_v3  ;;  %1317 = vadd.xlane.f32.xlu0 %v1316_v4  ;;  %v6699_v4 = vld [vmem:[#allocation13 + $0x80] ss:$12 sps:$4 sm:$0xff]  }
 0x4eb   : > { %v1313_v9 = vpop.xlane.xlu0 %1312 }
 0x4ec   : > { %v1319_v10 = vmul.f32 0.0078125, %v1313_v9  ;;  %v8436_v9 = vsub.s32 0, %v8433_v8 }
 0x4ee   : > { %v1322_v11 = vsub.f32 %v8415_v60, %v1319_v10  ;;  %v1194_v10 = vld [vmem:[#allocation14] sm:$0x7] }
 0x4f0   : > { %v1315_v12 = vpop.xlane.xlu1 %1314  ;;  %v1318_v13 = vpop.xlane.xlu0 %1317  ;;  %v1325_v14 = vmul.f32 %v1322_v11, %v1322_v11 }
 0x4f1   : > { %v1320_v15 = vmul.f32 0.0078125, %v1315_v12  ;;  %v1321_v16 = vmul.f32 0.0078125, %v1318_v13  ;;  %v1371_v12 = vrot.slane %v1194_v10, %v8436_v9 }
 0x4f2   : > { %1328 = vadd.xlane.f32.xlu1 %v1325_v14 }
 0x4f3   : > { %v1324_v17 = vsub.f32 %v8418_v2, %v1321_v16  ;;  %v1323_v18 = vsub.f32 %v8420_v3, %v1320_v15 }
 0x4f5   : > { %v1326_v19 = vmul.f32 %v1323_v18, %v1323_v18  ;;  %v1327_v20 = vmul.f32 %v1324_v17, %v1324_v17 }
 0x4f7   : > { %1330 = vadd.xlane.f32.xlu0 %v1326_v19  ;;  %v1332_v21 = vsel %vm1090_vm1, %v1327_v20, 0.0 }
 0x4f8   : > { %1333 = vadd.xlane.f32.xlu1 %v1332_v21 }
 0x57f   : > { %v1329_v35 = vpop.xlane.xlu1 %1328 }
 0x580   : > { %v1335_v36 = vmul.f32 0.0078125, %v1329_v35 }
 0x582   : > { %v1338_v37 = vadd.f32 1e-05, %v1335_v36 }
 0x584   : > { %6924 = vrsqrt.f32 %v1338_v37  ;;  %v1331_v38 = vpop.xlane.xlu0 %1330 }
 0x585   : > { %v1336_v39 = vmul.f32 0.0078125, %v1331_v38  ;;  %v1334_v40 = vpop.xlane.xlu1 %1333 }
 0x586   : > { %v1337_v41 = vmul.f32 0.0078125, %v1334_v40 }
 0x587   : > { %v1339_v42 = vadd.f32 1e-05, %v1336_v39 }
 0x588   : > { %v1340_v43 = vadd.f32 1e-05, %v1337_v41 }
 0x589   : > { %6926 = vrsqrt.f32 %v1339_v42 }
 0x58a   : > { %6928 = vrsqrt.f32 %v1340_v43 }
 0x58e   : > { %v6925_v44 = vpop.eup %6924 }
 0x58f   : > { %v1344_v45 = vmul.f32 %v6925_v44, %v1322_v11  ;;  %v8439_v11 = vsub.s32 1, %v8433_v8  ;;  %v8479_v44 = vsel %vm1090_vm1, 65535, %v7752_v0 }
 0x591   : > { %v1353_v50 = vmul.f32 %v5658_v46, %v1344_v45  ;;  %v1375_v14 = vrot.slane %v1194_v10, %v8439_v11 }
 0x593   : > { %v6927_v47 = vpop.eup %6926  ;;  %v1362_v54 = vadd.f32 %v5659_v51, %v1353_v50 }
 0x594   : > { %v6929_v48 = vpop.eup %6928  ;;  %v1345_v49 = vmul.f32 %v6927_v47, %v1323_v18 }
 0x595   : > { %v1346_v53 = vmul.f32 %v6929_v48, %v1324_v17 }
 0x596   : > { %v1354_v52 = vmul.f32 %v5658_v46, %v1345_v49 }
 0x597   : > { %v1355_v58 = vmul.f32 %v5658_v46, %v1346_v53 }
 0x598   : > { %v1363_v55 = vadd.f32 %v5659_v51, %v1354_v52 }
 0x599   : > { %v1364_v61 = vadd.f32 %v5659_v51, %v1355_v58 }
 0x59a   : > { %v1365_v56 = vpack.c.bf16 %v1363_v55, %v1362_v54 }
 0x59b   : > { %v1366_v62 = vpack.c.bf16 %v1364_v61, %v1364_v61 }
 0x59c   : > { %1544 = vmatmul.mubr.bf16.vlgmr.msra.gmra.mrb[0].mxu1 %v1365_v56 }
 0x59d   : > { %6158 = vmatpush3.bf16.msra.mxu1 %v6694_v34  ;;  %1553 = vmatprep.mubr.bf16.mxu1 %v7752_v0  ;;  %v8472_v34 = vsub.s32 2, %v8433_v8 }
 0x59e   : > { %6159 = vmatprep.subr.bf16.mxu1 %v6695_v57 }
 0x59f   : > { %v1379_v35 = vrot.slane %v1194_v10, %v8472_v34 }
 0x5a1   : > { %6160 = vmatpush3.bf16.msra.mxu1 %v6695_v57 }
 0x5a2   : > { %6161 = vmatprep.subr.bf16.mxu1 %v6696_v59 }
 0x5a4   : > { %1554 = vmatmul.mubr.bf16.gmra.mrb[4].mxu1 %v1366_v62 }
 0x5a5   : > { %6162 = vmatpush3.bf16.msra.mxu1 %v6696_v59  ;;  %6173 = vmatprep.mubr.bf16.mxu1 %v1365_v56 }
 0x5a6   : > { %6163 = vmatprep.subr.bf16.mxu1 %v6697_v63 }
 0x5a9   : > { %6164 = vmatpush3.bf16.msra.mxu1 %v6697_v63 }
 0x5aa   : > { %6165 = vmatprep.subr.bf16.mxu1 %v6698_v1 }
 0x5ad   : > { %6166 = vmatpush3.bf16.msra.mxu1 %v6698_v1 }
 0x5ae   : > { %6167 = vmatprep.subr.bf16.mxu1 %v6699_v4 }
 0x5b1   : > { %6168 = vmatpush3.bf16.msra.mxu1 %v6699_v4 }
 0x5b2   : > { %6169 = vmatprep.subr.bf16.mxu1 %v6700_v5 }
 0x5b5   : > { %6170 = vmatpush3.bf16.msra.mxu1 %v6700_v5 }
 0x5b6   : > { %6171 = vmatprep.subr.bf16.mxu1 %v6701_v6 }
 0x5b9   : > { %6172 = vmatpush3.bf16.msra.mxu1 %v6701_v6 }
 0x5bc   : > { %6174 = vmatmul.mubr.bf16.vlgmr.msra.gmra.mrb[8].mxu1 %v1366_v62 }
 0x66f   : > { %v1545_v13 = vpop.f32.mrb[0].mxu1 }
 0x670   : > { %v1547_v15 = vpop.f32.mrb[1].mxu1  ;;  %v1546_v17 = vadd.f32 %v1545_v13, %v1371_v12 }
 0x671   : > { %v1549_v16 = vpop.f32.mrb[2].mxu1  ;;  %v1548_v20 = vadd.f32 %v1547_v15, %v1375_v14 }
 0x672   : > { %v1550_v18 = vadd.f32 %v1549_v16, %v1371_v12  ;;  %v1551_v19 = vpop.f32.mrb[3].mxu1 }
 0x673   : > { %v1552_v21 = vadd.f32 %v1551_v19, %v1375_v14 }
 0x674   : > { %v8443_v22 = vpack.c.bf16 %v1550_v18, %v1546_v17 }
 0x675   : > { %v8445_v23 = vpack.c.bf16 %v1552_v21, %v1548_v20 }
 0x676   : > { %6181 = vmatprep.mubr.msk.bf16.mxu0 %vm1616_vm2, %v8443_v22 }
 0x677   : > { %v1555_v24 = vpop.f32.mrb[4].mxu1  ;;  %1784 = vrot.lane.b32.xlu0 %v8445_v23, %s7753_s13  ;;  %6385 = vmatprep.subr.msk.bf16.mxu0 %vm1616_vm2, %v8445_v23  ;;  %v1624_v25 = vsel %vm1616_vm2, %v8445_v23, 0 }
 0x678   : > { %v1557_v26 = vpop.f32.mrb[5].mxu1  ;;  %6178 = vmatpush3.bf16.xpose.msra.mxu0 %v1624_v25  ;;  %v1556_v31 = vadd.f32 %v1555_v24, %v1371_v12 }
 0x679   : > { %v1558_v27 = vadd.f32 %v1557_v26, %v1375_v14  ;;  %v1559_v28 = vpop.f32.mrb[6].mxu1 }
 0x67a   : > { %v1560_v29 = vpop.f32.mrb[7].mxu1  ;;  %v8465_v33 = vpack.c.bf16 %v1556_v31, %v1556_v31 }
 0x67b   : > { %v8455_v30 = vpack.c.bf16 %v1558_v27, %v1558_v27 }
 0x67d   : > { %1786 = vrot.lane.b32.xlu1 %v8455_v30, %s7753_s13  ;;  %6386 = vmatprep.subr.msk.bf16.mxu0 %vm1616_vm2, %v8455_v30  ;;  %v1627_v32 = vsel %vm1616_vm2, %v8455_v30, 0 }
 0x680   : > { %6180 = vmatpush3.bf16.xpose.msra.mxu0 %v1627_v32 }
 0x681   : > { %1778 = vrot.lane.b32.xlu1 %v8443_v22, %s7753_s13 }
 0x685   : > { %1780 = vrot.lane.b32.xlu1 %v8465_v33, %s7753_s13 }
 0x687   : > { %6182 = vmatmul.mubr.msk.bf16.vlgmr.msra.gmra.mrb[4].mxu0 %vm1616_vm2, %v8465_v33 }
 0x68f   : > { %v6175_v36 = vpop.f32.mrb[8].mxu1 }
 0x690   : > { %v1605_v37 = vadd.f32 %v6175_v36, %v1379_v35  ;;  %v1596_v38 = vpop.f32.mrb[9].mxu1 }
 0x691   : > { %v6176_v39 = vpop.f32.mrb[10].mxu1  ;;  %v1597_v42 = vadd.f32 %v1596_v38, %v1379_v35 }
 0x692   : > { %v1599_v40 = vpop.f32.mrb[11].mxu1  ;;  %v8475_v41 = vpack.c.bf16 %v1605_v37, %v1605_v37 }
 0x693   : > { %v1600_v43 = vadd.f32 %v1599_v40, %v1379_v35 }
 0x694   : > { %v1720_v46 = vand.u32 %v8479_v44, %v8475_v41 }
 0x695   : > { %v8481_v45 = vpack.c.bf16 %v1600_v43, %v1597_v42 }
 0x697   : > { %6185 = vmatprep.subr.bf16.mxu0 %v8481_v45 }
 0x698   : > { %6186 = vmatpush3.bf16.msra.mxu0 %v8481_v45 }
 0x699   : > { %6187 = vmatprep.subr.bf16.mxu0 %v1720_v46 }
 0x69c   : > { %6188 = vmatpush3.bf16.msra.mxu0 %v1720_v46 }
 0x6e9   : > { %v1785_v47 = vpop.permute.xlu0 %1784 }
 0x6ea   : > { %6387 = vmatprep.subr.msk.bf16.mxu1 %vm1616_vm2, %v1785_v47  ;;  %v1795_v48 = vsel %vm1616_vm2, %v1785_v47, 0 }
 0x6eb   : > { %6194 = vmatpush3.bf16.xpose.msra.mxu1 %v1795_v48 }
 0x6ef   : > { %v1787_v49 = vpop.permute.xlu1 %1786 }
 0x6f0   : > { %6388 = vmatprep.subr.msk.bf16.mxu1 %vm1616_vm2, %v1787_v49  ;;  %v1798_v50 = vsel %vm1616_vm2, %v1787_v49, 0 }
 0x6f3   : > { %6196 = vmatpush3.bf16.xpose.msra.mxu1 %v1798_v50  ;;  %v1779_v51 = vpop.permute.xlu1 %1778 }
 0x6f4   : > { %6197 = vmatprep.mubr.msk.bf16.mxu1 %vm1616_vm2, %v1779_v51 }
 0x6f7   : > { %v1781_v52 = vpop.permute.xlu1 %1780 }
 0x6fa   : > { %6198 = vmatmul.mubr.msk.bf16.vlgmr.msra.gmra.mrb[12].mxu1 %vm1616_vm2, %v1781_v52 }
 0x75a   : > { %v6183_v53 = vpop.f32.mrb[4].mxu0 }
 0x75b   : > { %v1679_v54 = vmul.f32 0.17677669, %v6183_v53  ;;  %v1663_v55 = vpop.f32.mrb[5].mxu0 }
 0x75c   : > { %v6184_v56 = vpop.f32.mrb[6].mxu0  ;;  %v1677_v57 = vmul.f32 0.17677669, %v1663_v55 }
 0x75d   : > { %v1666_v58 = vpop.f32.mrb[7].mxu0  ;;  %v1688_v59 = vsel %vm1687_vm3, %v1679_v54, -inf }
 0x75e   : > { %v1678_v61 = vmul.f32 0.17677669, %v1666_v58  ;;  %1689 = vmax.xlane.f32.xlu0 %v1688_v59  ;;  %v1681_v63 = vsel %vm1680_vm4, %v1677_v57, -inf }
 0x760   : > { %v1684_v62 = vsel %vm1680_vm4, %v1678_v61, -inf }
 0x761   : > { %1685 = vmax.xlane.f32.xlu1 %v1684_v62 }
 0x762   : > { %1682 = vmax.xlane.f32.xlu0 %v1681_v63 }
 0x7cd   : > { %v6199_v1 = vpop.f32.mrb[12].mxu1 }
 0x7ce   : > { %v1850_v4 = vmul.f32 0.17677669, %v6199_v1  ;;  %v1834_v5 = vpop.f32.mrb[13].mxu1 }
 0x7cf   : > { %v1848_v6 = vmul.f32 0.17677669, %v1834_v5  ;;  %v6200_v7 = vpop.f32.mrb[14].mxu1 }
 0x7d0   : > { %v1837_v10 = vpop.f32.mrb[15].mxu1  ;;  %v1857_v12 = vsel %vm1687_vm3, %v1850_v4, -inf }
 0x7d1   : > { %v1849_v13 = vmul.f32 0.17677669, %v1837_v10  ;;  %1858 = vmax.xlane.f32.xlu1 %v1857_v12  ;;  %v1851_v14 = vsel %vm1680_vm4, %v1848_v6, -inf }
 0x7d2   : > { %1852 = vmax.xlane.f32.xlu0 %v1851_v14 }
 0x7d3   : > { %v1854_v15 = vsel %vm1680_vm4, %v1849_v13, -inf }
 0x7d6   : > { %1855 = vmax.xlane.f32.xlu0 %v1854_v15 }
 0x7e2   : > { %1884 = vrot.lane.b32.xlu1 %v8475_v41, %s7753_s13 }
 0x7e6   : > { %1954 = vrot.lane.b32.xlu1 %v8445_v23, %s7754_s16 }
 0x7ea   : > { %1956 = vrot.lane.b32.xlu1 %v8455_v30, %s7754_s16 }
 0x7eb   : > { %v1690_v16 = vpop.xlane.xlu0 %1689 }
 0x7ec   : > { %v1693_v17 = vsub.f32 %v1679_v54, %v1690_v16  ;;  %1882 = vrot.lane.b32.xlu0 %v8481_v45, %s7753_s13 }
 0x7ee   : > { %v1698_v18 = vmul.f32 1.442695, %v1693_v17  ;;  %1952 = vrot.lane.b32.xlu1 %v8465_v33, %s7754_s16  ;;  %v1686_v19 = vpop.xlane.xlu1 %1685 }
 0x7ef   : > { %v1692_v20 = vsub.f32 %v1678_v61, %v1686_v19  ;;  %v1683_v21 = vpop.xlane.xlu0 %1682 }
 0x7f0   : > { %v1691_v24 = vsub.f32 %v1677_v57, %v1683_v21  ;;  %1950 = vrot.lane.b32.xlu0 %v8443_v22, %s7754_s16  ;;  %6930 = vpow2.f32 %v1698_v18 }
 0x7f1   : > { %v1696_v25 = vmul.f32 1.442695, %v1692_v20 }
 0x7f2   : > { %v1694_v26 = vmul.f32 1.442695, %v1691_v24  ;;  %2052 = vrot.lane.b32.xlu1 %v8475_v41, %s7754_s16 }
 0x7f3   : > { %6932 = vpow2.f32 %v1696_v25 }
 0x7f4   : > { %6934 = vpow2.f32 %v1694_v26 }
 0x7fa   : > { %v8513_v27 = vpop.eup %6930 }
 0x7fb   : > { %v1710_v32 = vpack.c.bf16 %v8513_v27, %v8513_v27 }
 0x7fd   : > { %v8515_v28 = vpop.eup %6932 }
 0x7fe   : > { %v8517_v29 = vpop.eup %6934 }
 0x7ff   : > { %v1709_v31 = vpack.c.bf16 %v8515_v28, %v8517_v29 }
 0x801   : > { %6189 = vmatprep.mubr.msk.bf16.mxu0 %vm1680_vm4, %v1709_v31 }
 0x802   : > { %6190 = vmatmul.mubr.msk.bf16.vlgmr.msra.gmra.mrb[8].mxu0 %vm1680_vm4, %v1710_v32 }
 0x85e   : > { %v1859_v35 = vpop.xlane.xlu1 %1858 }
 0x85f   : > { %v1862_v36 = vsub.f32 %v1850_v4, %v1859_v35  ;;  %v1853_v37 = vpop.xlane.xlu0 %1852 }
 0x860   : > { %v1860_v38 = vsub.f32 %v1848_v6, %v1853_v37 }
 0x861   : > { %v1867_v39 = vmul.f32 1.442695, %v1862_v36 }
 0x862   : > { %v1863_v40 = vmul.f32 1.442695, %v1860_v38  ;;  %v1885_v46 = vpop.permute.xlu1 %1884 }
 0x863   : > { %v1856_v42 = vpop.xlane.xlu0 %1855  ;;  %6936 = vpow2.f32 %v1867_v39  ;;  %v1894_v49 = vand.u32 %v1885_v46, %v8479_v44 }
 0x864   : > { %v1861_v43 = vsub.f32 %v1849_v13, %v1856_v42  ;;  %6938 = vpow2.f32 %v1863_v40 }
 0x866   : > { %v1865_v47 = vmul.f32 1.442695, %v1861_v43  ;;  %v1955_v50 = vpop.permute.xlu1 %1954 }
 0x867   : > { %v1883_v48 = vpop.permute.xlu0 %1882  ;;  %v1965_v57 = vsel %vm1616_vm2, %v1955_v50, 0 }
 0x868   : > { %6940 = vpow2.f32 %v1865_v47  ;;  %6201 = vmatprep.subr.bf16.mxu0 %v1883_v48 }
 0x869   : > { %6202 = vmatpush3.bf16.msra.mxu0 %v1883_v48 }
 0x86a   : > { %6203 = vmatprep.subr.bf16.mxu0 %v1894_v49  ;;  %v1957_v58 = vpop.permute.xlu1 %1956 }
 0x86b   : > { %v1951_v56 = vpop.permute.xlu0 %1950  ;;  %v1968_v59 = vsel %vm1616_vm2, %v1957_v58, 0 }
 0x86d   : > { %6204 = vmatpush3.bf16.msra.mxu0 %v1894_v49  ;;  %v8527_v51 = vpop.eup %6936 }
 0x86e   : > { %6389 = vmatprep.subr.msk.bf16.mxu0 %vm1616_vm2, %v1955_v50  ;;  %v8529_v52 = vpop.eup %6938  ;;  %v1879_v55 = vpack.c.bf16 %v8527_v51, %v8527_v51  ;;  %v1953_v61 = vpop.permute.xlu1 %1952 }
 0x872   : > { %v8531_v53 = vpop.eup %6940  ;;  %v2053_v24 = vpop.permute.xlu1 %2052 }
 0x873   : > { %v1878_v54 = vpack.c.bf16 %v8531_v53, %v8529_v52  ;;  %v2062_v39 = vand.u32 %v2053_v24, %v8479_v44 }
 0x875   : > { %6205 = vmatprep.mubr.msk.bf16.mxu0 %vm1680_vm4, %v1878_v54 }
 0x876   : > { %6206 = vmatmul.mubr.msk.bf16.vlgmr.msra.gmra.mrb[12].mxu0 %vm1680_vm4, %v1879_v55 }
 0x877   : > { %6210 = vmatpush3.bf16.xpose.msra.mxu0 %v1965_v57  ;;  %6213 = vmatprep.mubr.msk.bf16.mxu0 %vm1616_vm2, %v1951_v56 }
 0x878   : > { %6390 = vmatprep.subr.msk.bf16.mxu0 %vm1616_vm2, %v1957_v58 }
 0x87f   : > { %6212 = vmatpush3.bf16.xpose.msra.mxu0 %v1968_v59 }
 0x886   : > { %6214 = vmatmul.mubr.msk.bf16.vlgmr.msra.gmra.mrb[16].mxu0 %vm1616_vm2, %v1953_v61 }
 0x8d5   : > { %v8544_v62 = vpop.f32.mrb[8].mxu0 }
 0x8d6   : > { %v8546_v63 = vpop.f32.mrb[9].mxu0 }
 0x8d7   : > { %v6192_v1 = vpop.f32.mrb[10].mxu0 }
 0x8d8   : > { %v8548_v4 = vpop.f32.mrb[11].mxu0 }
 0x949   : > { %v8550_v5 = vpop.f32.mrb[12].mxu0 }
 0x94a   : > { %v8552_v6 = vpop.f32.mrb[13].mxu0 }
 0x94b   : > { %v6208_v7 = vpop.f32.mrb[14].mxu0 }
 0x94c   : > { %v8554_v10 = vpop.f32.mrb[15].mxu0 }
 0x959   : > { %v6215_v12 = vpop.f32.mrb[16].mxu0 }
 0x95a   : > { %v2020_v13 = vmul.f32 0.17677669, %v6215_v12  ;;  %v2004_v14 = vpop.f32.mrb[17].mxu0 }
 0x95b   : > { %v6216_v15 = vpop.f32.mrb[18].mxu0  ;;  %v2018_v16 = vmul.f32 0.17677669, %v2004_v14 }
 0x95c   : > { %v2007_v17 = vpop.f32.mrb[19].mxu0  ;;  %v2027_v18 = vsel %vm1687_vm3, %v2020_v13, -inf }
 0x95d   : > { %v2019_v19 = vmul.f32 0.17677669, %v2007_v17  ;;  %2028 = vmax.xlane.f32.xlu0 %v2027_v18  ;;  %v2021_v21 = vsel %vm1680_vm4, %v2018_v16, -inf  ;;  %v1869_v18 = vsel %vm1680_vm4, %v8529_v52, 0.0 }
 0x95f   : > { %v2024_v20 = vsel %vm1680_vm4, %v2019_v19, -inf }
 0x960   : > { %2025 = vmax.xlane.f32.xlu1 %v2024_v20 }
 0x961   : > { %2022 = vmax.xlane.f32.xlu0 %v2021_v21  ;;  %v1875_v21 = vsel %vm1687_vm3, %v8527_v51, 0.0 }
 0x971   : > { %2122 = vrot.lane.b32.xlu1 %v8445_v23, %s7755_s22 }
 0x975   : > { %2118 = vrot.lane.b32.xlu1 %v8443_v22, %s7755_s22 }
 0x977   : > { %2050 = vrot.lane.b32.xlu0 %v8481_v45, %s7754_s16 }
 0x97b   : > { %2124 = vrot.lane.b32.xlu0 %v8455_v30, %s7755_s22 }
 0x97f   : > { %2120 = vrot.lane.b32.xlu0 %v8465_v33, %s7755_s22 }
 0x9ea   : > { %v2029_v25 = vpop.xlane.xlu0 %2028 }
 0x9eb   : > { %v2032_v26 = vsub.f32 %v2020_v13, %v2029_v25 }
 0x9ed   : > { %v2037_v31 = vmul.f32 1.442695, %v2032_v26  ;;  %v2026_v32 = vpop.xlane.xlu1 %2025 }
 0x9ee   : > { %v2031_v35 = vsub.f32 %v2019_v19, %v2026_v32  ;;  %v2023_v36 = vpop.xlane.xlu0 %2022  ;;  %v1872_v19 = vsel %vm1680_vm4, %v8531_v53, 0.0 }
 0x9ef   : > { %v2030_v23 = vsub.f32 %v2018_v16, %v2023_v36  ;;  %6942 = vpow2.f32 %v2037_v31 }
 0x9f0   : > { %v2035_v37 = vmul.f32 1.442695, %v2031_v35 }
 0x9f1   : > { %v2033_v22 = vmul.f32 1.442695, %v2030_v23  ;;  %v2123_v30 = vpop.permute.xlu1 %2122 }
 0x9f2   : > { %6944 = vpow2.f32 %v2035_v37  ;;  %v2051_v38 = vpop.permute.xlu0 %2050  ;;  %v2133_v47 = vsel %vm1616_vm2, %v2123_v30, 0 }
 0x9f3   : > { %6946 = vpow2.f32 %v2033_v22  ;;  %6217 = vmatprep.subr.bf16.mxu1 %v2051_v38 }
 0x9f4   : > { %6218 = vmatpush3.bf16.msra.mxu1 %v2051_v38 }
 0x9f5   : > { %6219 = vmatprep.subr.bf16.mxu1 %v2062_v39  ;;  %v2119_v48 = vpop.permute.xlu1 %2118 }
 0x9f6   : > { %v2125_v49 = vpop.permute.xlu0 %2124 }
 0x9f7   : > { %v2136_v50 = vsel %vm1616_vm2, %v2125_v49, 0 }
 0x9f8   : > { %6220 = vmatpush3.bf16.msra.mxu1 %v2062_v39 }
 0x9f9   : > { %6391 = vmatprep.subr.msk.bf16.mxu1 %vm1616_vm2, %v2123_v30  ;;  %v6943_v33 = vpop.eup %6942 }
 0x9fa   : > { %v2049_v46 = vpack.c.bf16 %v6943_v33, %v6943_v33  ;;  %v2121_v54 = vpop.permute.xlu0 %2120 }
 0x9fc   : > { %v6945_v40 = vpop.eup %6944 }
 0x9fd   : > { %v6947_v42 = vpop.eup %6946 }
 0x9fe   : > { %v2048_v43 = vpack.c.bf16 %v6945_v40, %v6947_v42  ;;  %v2039_v20 = vsel %vm1680_vm4, %v6947_v42, 0.0 }
 0xa00   : > { %6221 = vmatprep.mubr.msk.bf16.mxu1 %vm1680_vm4, %v2048_v43 }
 0xa01   : > { %6222 = vmatmul.mubr.msk.bf16.vlgmr.msra.gmra.mrb[16].mxu1 %vm1680_vm4, %v2049_v46  ;;  %v1700_v46 = vsel %vm1680_vm4, %v8517_v29, 0.0 }
 0xa02   : > { %6226 = vmatpush3.bf16.xpose.msra.mxu1 %v2133_v47  ;;  %6229 = vmatprep.mubr.msk.bf16.mxu1 %vm1616_vm2, %v2119_v48  ;;  %v1703_v47 = vsel %vm1680_vm4, %v8515_v28, 0.0  ;;  %v1706_v48 = vsel %vm1687_vm3, %v8513_v27, 0.0 }
 0xa03   : > { %6392 = vmatprep.subr.msk.bf16.mxu1 %vm1616_vm2, %v2125_v49 }
 0xa0a   : > { %6228 = vmatpush3.bf16.xpose.msra.mxu1 %v2136_v50 }
 0xa11   : > { %6230 = vmatmul.mubr.msk.bf16.vlgmr.msra.gmra.mrb[20].mxu1 %vm1616_vm2, %v2121_v54 }
 0xa12   : > { %2710 = vmatprep.mubr.bf16.mxu1 %v7752_v0 }
 0xad4   : > { %v8579_v55 = vpop.f32.mrb[16].mxu1 }
 0xad5   : > { %v8581_v56 = vpop.f32.mrb[17].mxu1 }
 0xad6   : > { %v6224_v57 = vpop.f32.mrb[18].mxu1 }
 0xad7   : > { %v8583_v58 = vpop.f32.mrb[19].mxu1 }
 0xae4   : > { %v6231_v59 = vpop.f32.mrb[20].mxu1 }
 0xae5   : > { %v2188_v61 = vmul.f32 0.17677669, %v6231_v59  ;;  %v2172_v1 = vpop.f32.mrb[21].mxu1 }
 0xae6   : > { %v2186_v7 = vmul.f32 0.17677669, %v2172_v1  ;;  %v6232_v12 = vpop.f32.mrb[22].mxu1 }
 0xae7   : > { %v2175_v13 = vpop.f32.mrb[23].mxu1  ;;  %v2195_v14 = vsel %vm1687_vm3, %v2188_v61, -inf }
 0xae8   : > { %v2187_v15 = vmul.f32 0.17677669, %v2175_v13  ;;  %2196 = vmax.xlane.f32.xlu0 %v2195_v14  ;;  %v2189_v16 = vsel %vm1680_vm4, %v2186_v7, -inf }
 0xae9   : > { %2190 = vmax.xlane.f32.xlu1 %v2189_v16 }
 0xaea   : > { %v2192_v17 = vsel %vm1680_vm4, %v2187_v15, -inf }
 0xaec   : > { %2193 = vmax.xlane.f32.xlu0 %v2192_v17 }
 0xafa   : > { %2220 = vrot.lane.b32.xlu1 %v8475_v41, %s7755_s22  ;;  %v2045_v41 = vsel %vm1687_vm3, %v6943_v33, 0.0 }
 0xb02   : > { %2218 = vrot.lane.b32.xlu0 %v8481_v45, %s7755_s22  ;;  %v2042_v45 = vsel %vm1680_vm4, %v6945_v40, 0.0 }
 0xb1e   : > { %1870 = vadd.xlane.f32.xlu1 %v1869_v18 }
 0xb21   : > { %1873 = vadd.xlane.f32.xlu0 %v1872_v19 }
 0xb22   : > { %2040 = vadd.xlane.f32.xlu1 %v2039_v20  ;;  %v6703_v20 = vld [vmem:[#allocation16 + $0x8] sm:$0xff]  }
 0xb25   : > { %1876 = vadd.xlane.f32.xlu0 %v1875_v21  ;;  %v6705_v21 = vld [vmem:[#allocation16 + $0x18] sm:$0xff]  }
 0xb26   : > { %2046 = vadd.xlane.f32.xlu1 %v2045_v41 }
 0xb29   : > { %2043 = vadd.xlane.f32.xlu0 %v2042_v45 }
 0xb75   : > { %v2197_v24 = vpop.xlane.xlu0 %2196 }
 0xb76   : > { %v2200_v52 = vsub.f32 %v2188_v61, %v2197_v24  ;;  %v2191_v25 = vpop.xlane.xlu1 %2190  ;;  %v6708_v24 = vld [vmem:[#allocation16 + $0x30] sm:$0xff]  }
 0xb77   : > { %v2198_v26 = vsub.f32 %v2186_v7, %v2191_v25 }
 0xb78   : > { %v2205_v31 = vmul.f32 1.442695, %v2200_v52  ;;  %v6709_v52 = vld [vmem:[#allocation16 + $0x38] sm:$0xff]  }
 0xb79   : > { %v2201_v53 = vmul.f32 1.442695, %v2198_v26  ;;  %v2194_v32 = vpop.xlane.xlu0 %2193 }
 0xb7a   : > { %v2199_v35 = vsub.f32 %v2187_v15, %v2194_v32  ;;  %v2221_v36 = vpop.permute.xlu1 %2220 }
 0xb7b   : > { %6948 = vpow2.f32 %v2201_v53  ;;  %v2230_v37 = vand.u32 %v2221_v36, %v8479_v44 }
 0xb7c   : > { %v2203_v23 = vmul.f32 1.442695, %v2199_v35  ;;  %6950 = vpow2.f32 %v2205_v31 }
 0xb7d   : > { %v2219_v51 = vpop.permute.xlu0 %2218 }
 0xb7e   : > { %6952 = vpow2.f32 %v2203_v23  ;;  %6233 = vmatprep.subr.bf16.mxu0 %v2219_v51 }
 0xb7f   : > { %6234 = vmatpush3.bf16.msra.mxu0 %v2219_v51 }
 0xb80   : > { %6235 = vmatprep.subr.bf16.mxu0 %v2230_v37 }
 0xb83   : > { %6236 = vmatpush3.bf16.msra.mxu0 %v2230_v37 }
 0xb85   : > { %v6949_v22 = vpop.eup %6948 }
 0xb86   : > { %v2207_v38 = vsel %vm1680_vm4, %v6949_v22, 0.0  ;;  %v6951_v39 = vpop.eup %6950 }
 0xb87   : > { %2208 = vadd.xlane.f32.xlu0 %v2207_v38  ;;  %v2213_v42 = vsel %vm1687_vm3, %v6951_v39, 0.0  ;;  %v2217_v43 = vpack.c.bf16 %v6951_v39, %v6951_v39 }
 0xb88   : > { %v6953_v30 = vpop.eup %6952 }
 0xb89   : > { %v2210_v33 = vsel %vm1680_vm4, %v6953_v30, 0.0  ;;  %v2216_v40 = vpack.c.bf16 %v6953_v30, %v6949_v22 }
 0xb8a   : > { %2211 = vadd.xlane.f32.xlu1 %v2210_v33 }
 0xb8b   : > { %2214 = vadd.xlane.f32.xlu0 %v2213_v42  ;;  %6237 = vmatprep.mubr.msk.bf16.mxu0 %vm1680_vm4, %v2216_v40 }
 0xb8c   : > { %6238 = vmatmul.mubr.msk.bf16.vlgmr.msra.gmra.mrb[20].mxu0 %vm1680_vm4, %v2217_v43 }
 0xb8e   : > { %1701 = vadd.xlane.f32.xlu1 %v1700_v46 }
 0xb8f   : > { %1704 = vadd.xlane.f32.xlu0 %v1703_v47 }
 0xb92   : > { %1707 = vadd.xlane.f32.xlu1 %v1706_v48 }
 0xbab   : > { %v1871_v49 = vpop.xlane.xlu1 %1870 }
 0xbac   : > { %6954 = vrcp.f32 %v1871_v49 }
 0xbae   : > { %v1874_v50 = vpop.xlane.xlu0 %1873 }
 0xbaf   : > { %6956 = vrcp.f32 %v1874_v50  ;;  %v2041_v54 = vpop.xlane.xlu1 %2040 }
 0xbb2   : > { %v1877_v57 = vpop.xlane.xlu0 %1876 }
 0xbb3   : > { %6958 = vrcp.f32 %v1877_v57  ;;  %v2047_v29 = vpop.xlane.xlu1 %2046 }
 0xbb4   : > { %6960 = vrcp.f32 %v2041_v54 }
 0xbb6   : > { %v2044_v59 = vpop.xlane.xlu0 %2043  ;;  %v6955_v61 = vpop.eup %6954 }
 0xbb7   : > { %6962 = vrcp.f32 %v2044_v59  ;;  %v1947_v28 = vmul.f32 %v6955_v61, %v8552_v6 }
 0xbb8   : > { %6964 = vrcp.f32 %v2047_v29 }
 0xbb9   : > { %v6957_v1 = vpop.eup %6956 }
 0xbba   : > { %v1948_v7 = vmul.f32 %v6957_v1, %v8554_v10  ;;  %v6702_v10 = vld [vmem:[#allocation16] sm:$0xff]  }
 0xbbb   : > { %6241 = vmatprep.subr.bf16.mxu0 %v6702_v10 }
 0xbbc   : > { %v6625_v27 = vpack.i.bf16 %v1948_v7, %v1947_v28  ;;  %6242 = vmatpush3.bf16.msra.mxu0 %v6702_v10  ;;  %v5708_v10 = vld [vmem:[#allocation17] ss:$0 sm:$0xff] }
 0xbbd   : > { %v6959_v12 = vpop.eup %6958  ;;  %6243 = vmatprep.subr.bf16.mxu0 %v6703_v20 }
 0xbbe   : > { %6626 = vrot.lane.b32.xlu0 %v6625_v27, %s7755_s22  ;;  %v1949_v13 = vmul.f32 %v6959_v12, %v8550_v5  ;;  %v6961_v14 = vpop.eup %6960  ;;  %v6704_v5 = vld [vmem:[#allocation16 + $0x10] sm:$0xff]  }
 0xbbf   : > { %v2115_v16 = vmul.f32 %v6961_v14, %v8581_v56  ;;  %v6706_v56 = vld [vmem:[#allocation16 + $0x20] sm:$0xff]  }
 0xbc0   : > { %2293 = vrot.lane.b32.xlu1 %v1949_v13, %s7755_s22  ;;  %6244 = vmatpush3.bf16.msra.mxu0 %v6703_v20 }
 0xbc1   : > { %v6963_v15 = vpop.eup %6962  ;;  %6245 = vmatprep.subr.bf16.mxu0 %v6704_v5 }
 0xbc2   : > { %v2116_v17 = vmul.f32 %v6963_v15, %v8583_v58  ;;  %v6965_v19 = vpop.eup %6964  ;;  %v6707_v58 = vld [vmem:[#allocation16 + $0x28] sm:$0xff]  }
 0xbc3   : > { %v2117_v6 = vmul.f32 %v6965_v19, %v8579_v55 }
 0xbc4   : > { %v6630_v18 = vpack.i.bf16 %v2116_v17, %v2115_v16  ;;  %6246 = vmatpush3.bf16.msra.mxu0 %v6704_v5 }
 0xbc5   : > { %6247 = vmatprep.subr.bf16.mxu0 %v6705_v21 }
 0xbc6   : > { %6631 = vrot.lane.b32.xlu1 %v6630_v18, %s7754_s16 }
 0xbc8   : > { %6248 = vmatpush3.bf16.msra.mxu0 %v6705_v21 }
 0xbc9   : > { %6249 = vmatprep.subr.bf16.mxu0 %v6706_v56 }
 0xbca   : > { %2305 = vrot.lane.b32.xlu1 %v2117_v6, %s7754_s16 }
 0xbcc   : > { %6250 = vmatpush3.bf16.msra.mxu0 %v6706_v56 }
 0xbcd   : > { %6251 = vmatprep.subr.bf16.mxu0 %v6707_v58 }
 0xbd0   : > { %6252 = vmatpush3.bf16.msra.mxu0 %v6707_v58 }
 0xbd1   : > { %6253 = vmatprep.subr.bf16.mxu0 %v6708_v24 }
 0xbd4   : > { %6254 = vmatpush3.bf16.msra.mxu0 %v6708_v24 }
 0xbd5   : > { %6255 = vmatprep.subr.bf16.mxu0 %v6709_v52 }
 0xbd8   : > { %6256 = vmatpush3.bf16.msra.mxu0 %v6709_v52  ;;  %v6710_v52 = vld [vmem:[#allocation22] ss:$16 sps:$4 sm:$0xff]  }
 0xc14   : > { %v2209_v55 = vpop.xlane.xlu0 %2208 }
 0xc17   : > { %v2212_v45 = vpop.xlane.xlu1 %2211 }
 0xc18   : > { %v2215_v41 = vpop.xlane.xlu0 %2214 }
 0xc19   : > { %6966 = vrcp.f32 %v2215_v41 }
 0xc1a   : > { %6968 = vrcp.f32 %v2209_v55 }
 0xc1b   : > { %6970 = vrcp.f32 %v2212_v45  ;;  %v1702_v38 = vpop.xlane.xlu1 %1701 }
 0xc1c   : > { %v1705_v39 = vpop.xlane.xlu0 %1704 }
 0xc1d   : > { %6972 = vrcp.f32 %v1705_v39 }
 0xc1f   : > { %v1708_v30 = vpop.xlane.xlu1 %1707 }
 0xc20   : > { %6974 = vrcp.f32 %v1708_v30 }
 0xc21   : > { %6976 = vrcp.f32 %v1702_v38 }
 0xc23   : > { %v6967_v25 = vpop.eup %6966 }
 0xc24   : > { %v6969_v32 = vpop.eup %6968 }
 0xc25   : > { %v6971_v36 = vpop.eup %6970 }
 0xc27   : > { %v6973_v43 = vpop.eup %6972 }
 0xc28   : > { %v1774_v54 = vmul.f32 %v6973_v43, %v8548_v4 }
 0xc2a   : > { %v6975_v46 = vpop.eup %6974 }
 0xc2b   : > { %v6977_v48 = vpop.eup %6976  ;;  %v1775_v57 = vmul.f32 %v6975_v46, %v8544_v62  ;;  %v6724_v46 = vld [vmem:[#allocation22 + $0x44] ss:$16 sps:$4 sm:$0xff]  }
 0xc2c   : > { %v1773_v29 = vmul.f32 %v6977_v48, %v8546_v63  ;;  %v6722_v48 = vld [vmem:[#allocation22 + $0x40] ss:$16 sps:$4 sm:$0xff]  }
 0xc30   : > { %v6627_v42 = vpop.permute.xlu0 %6626 }
 0xc31   : > { %v6629_v49 = vunpack.i.h.bf16 %v6627_v42  ;;  %v6628_v50 = vunpack.i.l.bf16 %v6627_v42 }
 0xc32   : > { %v2294_v33 = vpop.permute.xlu1 %2293 }
 0xc33   : > { %v2323_v28 = vsel %vm1616_vm2, %v1774_v54, %v6629_v49  ;;  %v2324_v7 = vsel %vm1616_vm2, %v1775_v57, %v2294_v33  ;;  %v2322_v12 = vsel %vm1616_vm2, %v1773_v29, %v6628_v50  ;;  %v6725_v49 = vld [vmem:[#allocation22 + $0x48] ss:$16 sps:$4 sm:$0xff]   ;;  %v6730_v50 = vld [vmem:[#allocation22 + $0x64] ss:$16 sps:$4 sm:$0xff]   ;;  %v6733_v54 = vld [vmem:[#allocation22 + $0x6c] ss:$16 sps:$4 sm:$0xff]  }
 0xc34   : > { %v6728_v57 = vld [vmem:[#allocation22 + $0x60] ss:$16 sps:$4 sm:$0xff]   ;;  %v6739_v29 = vld [vmem:[#allocation22 + $0x8c] ss:$16 sps:$4 sm:$0xff]  }
 0xc38   : > { %v6632_v40 = vpop.permute.xlu1 %6631 }
 0xc39   : > { %v6634_v59 = vunpack.i.h.bf16 %v6632_v40  ;;  %v6633_v61 = vunpack.i.l.bf16 %v6632_v40 }
 0xc3b   : > { %v2325_v4 = vsel %vm1042_vm0, %v2322_v12, %v6633_v61  ;;  %v2326_v62 = vsel %vm1042_vm0, %v2323_v28, %v6634_v59  ;;  %v6731_v59 = vld [vmem:[#allocation22 + $0x68] ss:$16 sps:$4 sm:$0xff]   ;;  %v6736_v61 = vld [vmem:[#allocation22 + $0x84] ss:$16 sps:$4 sm:$0xff]   ;;  %v6740_v12 = vld [vmem:[#allocation22 + $0xa0] ss:$16 sps:$4 sm:$0xff]  }
 0xc3c   : > { %v2306_v47 = vpop.permute.xlu1 %2305  ;;  %v6737_v28 = vld [vmem:[#allocation22 + $0x88] ss:$16 sps:$4 sm:$0xff]  }
 0xc3d   : > { %v2327_v13 = vsel %vm1042_vm0, %v2324_v7, %v2306_v47  ;;  %v6727_v47 = vld [vmem:[#allocation22 + $0x4c] ss:$16 sps:$4 sm:$0xff]   ;;  %v6742_v7 = vld [vmem:[#allocation22 + $0xa4] ss:$16 sps:$4 sm:$0xff]  }
 0xc5f   : > { %v6239_v26 = vpop.f32.mrb[20].mxu0 }
 0xc60   : > { %v2285_v31 = vmul.f32 %v6967_v25, %v6239_v26  ;;  %v2266_v53 = vpop.f32.mrb[21].mxu0  ;;  %v6713_v25 = vld [vmem:[#allocation22 + $0x8] ss:$16 sps:$4 sm:$0xff]   ;;  %v6715_v26 = vld [vmem:[#allocation22 + $0xc] ss:$16 sps:$4 sm:$0xff]  }
 0xc61   : > { %v6240_v35 = vpop.f32.mrb[22].mxu0  ;;  %v2283_v51 = vmul.f32 %v6969_v32, %v2266_v53  ;;  %v6721_v53 = vld [vmem:[#allocation22 + $0x2c] ss:$16 sps:$4 sm:$0xff]   ;;  %2729 = vmatprep.subr.bf16.mxu0 %v6715_v26  ;;  %v6719_v32 = vld [vmem:[#allocation22 + $0x28] ss:$16 sps:$4 sm:$0xff]  }
 0xc62   : > { %v2269_v23 = vpop.f32.mrb[23].mxu0  ;;  %2317 = vrot.lane.b32.xlu1 %v2285_v31, %s7753_s13  ;;  %v6718_v31 = vld [vmem:[#allocation22 + $0x24] ss:$16 sps:$4 sm:$0xff]  }
 0xc63   : > { %v2284_v37 = vmul.f32 %v6971_v36, %v2269_v23 }
 0xc65   : > { %v6635_v22 = vpack.i.bf16 %v2284_v37, %v2283_v51 }
 0xc67   : > { %6636 = vrot.lane.b32.xlu0 %v6635_v22, %s7753_s13 }
 0xcd4   : > { %v2318_v1 = vpop.permute.xlu1 %2317 }
 0xcd5   : > { %v2331_v16 = vsel %vm2328_vm5, %v2327_v13, %v2318_v1  ;;  %v6734_v1 = vld [vmem:[#allocation22 + $0x80] ss:$16 sps:$4 sm:$0xff]   ;;  %v6743_v13 = vld [vmem:[#allocation22 + $0xa8] ss:$16 sps:$4 sm:$0xff]  }
 0xcd6   : > { %v2333_v19 = vpack.c.bf16 %v2331_v16, %v2331_v16  ;;  %v6754_v16 = vld [vmem:[#allocation22 + $0xe4] ss:$16 sps:$4 sm:$0xff]  }
 0xcd9   : > { %v6637_v27 = vpop.permute.xlu0 %6636 }
 0xcda   : > { %v6639_v14 = vunpack.i.h.bf16 %v6637_v27  ;;  %v6638_v15 = vunpack.i.l.bf16 %v6637_v27  ;;  %v6745_v27 = vld [vmem:[#allocation22 + $0xac] ss:$16 sps:$4 sm:$0xff]  }
 0xcdc   : > { %v2329_v63 = vsel %vm2328_vm5, %v2325_v4, %v6638_v15  ;;  %v2330_v17 = vsel %vm2328_vm5, %v2326_v62, %v6639_v14  ;;  %v6748_v14 = vld [vmem:[#allocation22 + $0xc4] ss:$16 sps:$4 sm:$0xff]   ;;  %v6751_v15 = vld [vmem:[#allocation22 + $0xcc] ss:$16 sps:$4 sm:$0xff]   ;;  %v6746_v4 = vld [vmem:[#allocation22 + $0xc0] ss:$16 sps:$4 sm:$0xff]  }
 0xcdd   : > { %v2332_v18 = vpack.c.bf16 %v2330_v17, %v2329_v63  ;;  %v6749_v62 = vld [vmem:[#allocation22 + $0xc8] ss:$16 sps:$4 sm:$0xff]   ;;  %v6752_v63 = vld [vmem:[#allocation22 + $0xe0] ss:$16 sps:$4 sm:$0xff]  }
 0xcde   : > { %v6755_v17 = vld [vmem:[#allocation22 + $0xe8] ss:$16 sps:$4 sm:$0xff]  }
 0xcdf   : > { %6257 = vmatprep.mubr.bf16.mxu0 %v2332_v18  ;;  %v6757_v18 = vld [vmem:[#allocation22 + $0xec] ss:$16 sps:$4 sm:$0xff]  }
 0xce0   : > { %6258 = vmatmul.mubr.bf16.vlgmr.msra.gmra.mrb[24].mxu0 %v2333_v19 }
 0xce1   : > { %2761 = vmatprep.mubr.bf16.mxu0 %v7752_v0  ;;  %2730 = vmatpush1.bf16.msra.mxu0 %v6713_v25 }
 0xce2   : > { %2731 = vmatprep.subr.bf16.mxu0 %v6721_v53 }
 0xce5   : > { %2732 = vmatpush1.bf16.msra.mxu0 %v6719_v32 }
 0xce6   : > { %2733 = vmatprep.subr.bf16.mxu0 %v6727_v47  ;;  %v6765_v47 = vld [vmem:[#allocation23 + $0x88] sm:$0xff]  }
 0xce9   : > { %2734 = vmatpush1.bf16.msra.mxu0 %v6725_v49  ;;  %v6767_v49 = vld [vmem:[#allocation23 + $0xd0] sm:$0xff]  }
 0xcea   : > { %2735 = vmatprep.subr.bf16.mxu0 %v6733_v54  ;;  %v6769_v54 = vld [vmem:[#allocation23 + $0x90] sm:$0xff]  }
 0xced   : > { %2736 = vmatpush1.bf16.msra.mxu0 %v6731_v59  ;;  %v6771_v59 = vld [vmem:[#allocation23 + $0xd8] sm:$0xff]  }
 0xcee   : > { %2737 = vmatprep.subr.bf16.mxu0 %v6739_v29  ;;  %v6773_v29 = vld [vmem:[#allocation23 + $0x98] sm:$0xff]  }
 0xcf1   : > { %2738 = vmatpush1.bf16.msra.mxu0 %v6737_v28  ;;  %v6775_v28 = vld [vmem:[#allocation23 + $0xe0] sm:$0xff]  }
 0xcf2   : > { %2739 = vmatprep.subr.bf16.mxu0 %v6745_v27  ;;  %v6777_v27 = vld [vmem:[#allocation23 + $0xa0] sm:$0xff]  }
 0xcf5   : > { %2740 = vmatpush1.bf16.msra.mxu0 %v6743_v13  ;;  %v6779_v13 = vld [vmem:[#allocation23 + $0xe8] sm:$0xff]  }
 0xcf6   : > { %2741 = vmatprep.subr.bf16.mxu0 %v6751_v15  ;;  %v6781_v15 = vld [vmem:[#allocation23 + $0xa8] sm:$0xff]  }
 0xcf9   : > { %2742 = vmatpush1.bf16.msra.mxu0 %v6749_v62  ;;  %v6783_v62 = vld [vmem:[#allocation23 + $0xf0] sm:$0xff]  }
 0xcfa   : > { %2743 = vmatprep.subr.bf16.mxu0 %v6757_v18  ;;  %v6787_v18 = vld [vmem:[#allocation23 + $0xf8] sm:$0xff]  }
 0xcfd   : > { %2744 = vmatpush1.bf16.msra.mxu0 %v6755_v17  ;;  %v6786_v17 = vld [vmem:[#allocation23 + $0x78] sm:$0xff]  }
 0xdb3   : > { %v6259_v6 = vpop.f32.mrb[24].mxu0 }
 0xdb4   : > { %v2432_v20 = vadd.f32 %v6259_v6, %v8418_v2  ;;  %v2416_v5 = vpop.f32.mrb[25].mxu0 }
 0xdb5   : > { %v2430_v21 = vadd.f32 %v2416_v5, %v8415_v60  ;;  %v6260_v56 = vpop.f32.mrb[26].mxu0  ;;  %v6712_v60 = vld [vmem:[#allocation22 + $0x4] ss:$16 sps:$4 sm:$0xff]  }
 0xdb6   : > { %v2419_v58 = vpop.f32.mrb[27].mxu0  ;;  %v8643_v45 = vadd.f32 %v5708_v10, %v2432_v20  ;;  %2678 = vmatprep.subr.bf16.mxu1 %v6712_v60  ;;  %v5709_v60 = vld [vmem:[#allocation19] ss:$0 sm:$0xff] }
 0xdb7   : > { %v8640_v55 = vadd.f32 %v5708_v10, %v2430_v21  ;;  %v2431_v41 = vadd.f32 %v2419_v58, %v8420_v3  ;;  %2679 = vmatpush1.bf16.msra.mxu1 %v6710_v52  ;;  %v6716_v3 = vld [vmem:[#allocation22 + $0x20] ss:$16 sps:$4 sm:$0xff]  }
 0xdb8   : > { %v2446_v2 = vsel %vm1090_vm1, %v8643_v45, 0.0  ;;  %2680 = vmatprep.subr.bf16.mxu1 %v6718_v31 }
 0xdb9   : > { %v8645_v24 = vadd.f32 %v5708_v10, %v2431_v41  ;;  %2442 = vadd.xlane.f32.xlu0 %v8640_v55 }
 0xdbb   : > { %2444 = vadd.xlane.f32.xlu1 %v8645_v24  ;;  %2681 = vmatpush1.bf16.msra.mxu1 %v6716_v3  ;;  %v5710_v3 = vld [vmem:[#allocation20] ss:$0 sm:$0xff] }
 0xdbc   : > { %2682 = vmatprep.subr.bf16.mxu1 %v6724_v46  ;;  %v6764_v46 = vld [vmem:[#allocation23 + $0x8] sm:$0xff]  }
 0xdbd   : > { %2447 = vadd.xlane.f32.xlu0 %v2446_v2 }
 0xdbf   : > { %2683 = vmatpush1.bf16.msra.mxu1 %v6722_v48  ;;  %v6766_v48 = vld [vmem:[#allocation23 + $0x50] sm:$0xff]  }
 0xdc0   : > { %2684 = vmatprep.subr.bf16.mxu1 %v6730_v50  ;;  %v6768_v50 = vld [vmem:[#allocation23 + $0x10] sm:$0xff]  }
 0xdc3   : > { %2685 = vmatpush1.bf16.msra.mxu1 %v6728_v57  ;;  %v6770_v57 = vld [vmem:[#allocation23 + $0x58] sm:$0xff]  }
 0xdc4   : > { %2686 = vmatprep.subr.bf16.mxu1 %v6736_v61  ;;  %v6772_v61 = vld [vmem:[#allocation23 + $0x18] sm:$0xff]  }
 0xdc7   : > { %2687 = vmatpush1.bf16.msra.mxu1 %v6734_v1  ;;  %v6774_v1 = vld [vmem:[#allocation23 + $0x60] sm:$0xff]  }
 0xdc8   : > { %2688 = vmatprep.subr.bf16.mxu1 %v6742_v7  ;;  %v6776_v7 = vld [vmem:[#allocation23 + $0x20] sm:$0xff]  }
 0xdcb   : > { %2689 = vmatpush1.bf16.msra.mxu1 %v6740_v12  ;;  %v6778_v12 = vld [vmem:[#allocation23 + $0x68] sm:$0xff]  }
 0xdcc   : > { %2690 = vmatprep.subr.bf16.mxu1 %v6748_v14  ;;  %v6780_v14 = vld [vmem:[#allocation23 + $0x28] sm:$0xff]  }
 0xdcf   : > { %2691 = vmatpush1.bf16.msra.mxu1 %v6746_v4  ;;  %v6782_v4 = vld [vmem:[#allocation23 + $0x70] sm:$0xff]  }
 0xdd0   : > { %2692 = vmatprep.subr.bf16.mxu1 %v6754_v16  ;;  %v6784_v16 = vld [vmem:[#allocation23 + $0x30] sm:$0xff]  }
 0xdd3   : > { %2693 = vmatpush1.bf16.msra.mxu1 %v6752_v63  ;;  %v6785_v63 = vld [vmem:[#allocation23 + $0xb0] sm:$0xff]  }
 0xe46   : > { %v2443_v35 = vpop.xlane.xlu0 %2442 }
 0xe47   : > { %v2449_v36 = vmul.f32 0.0078125, %v2443_v35 }
 0xe48   : > { %v2445_v23 = vpop.xlane.xlu1 %2444 }
 0xe49   : > { %v8652_v51 = vsub.f32 %v8640_v55, %v2449_v36  ;;  %v2450_v37 = vmul.f32 0.0078125, %v2445_v23 }
 0xe4a   : > { %v2448_v22 = vpop.xlane.xlu0 %2447 }
 0xe4b   : > { %v8655_v38 = vsub.f32 %v8645_v24, %v2450_v37  ;;  %v2451_v39 = vmul.f32 0.0078125, %v2448_v22  ;;  %v2455_v30 = vmul.f32 %v8652_v51, %v8652_v51 }
 0xe4d   : > { %v8660_v33 = vsub.f32 %v8643_v45, %v2451_v39  ;;  %2458 = vadd.xlane.f32.xlu0 %v2455_v30  ;;  %v2456_v40 = vmul.f32 %v8655_v38, %v8655_v38  ;;  %v6759_v30 = vld [vmem:[#allocation23 + $0xc0] sm:$0xff]  }
 0xe4e   : > { %6012 = vmatprep.subr.bf16.mxu0 %v6759_v30 }
 0xe4f   : > { %v2457_v42 = vmul.f32 %v8660_v33, %v8660_v33 }
 0xe51   : > { %2460 = vadd.xlane.f32.xlu0 %v2456_v40  ;;  %v2462_v43 = vsel %vm1090_vm1, %v2457_v42, 0.0  ;;  %v6760_v40 = vld [vmem:[#allocation23] sm:$0xff]  }
 0xe52   : > { %2463 = vadd.xlane.f32.xlu1 %v2462_v43  ;;  %v6761_v42 = vld [vmem:[#allocation23 + $0x80] sm:$0xff]   ;;  %v6763_v43 = vld [vmem:[#allocation23 + $0xc8] sm:$0xff]  }
 0xeda   : > { %v2459_v19 = vpop.xlane.xlu0 %2458 }
 0xedb   : > { %v2465_v6 = vmul.f32 0.0078125, %v2459_v19  ;;  %v6788_v19 = vld [vmem:[#allocation23 + $0x38] sm:$0xff]  }
 0xedd   : > { %v2468_v10 = vadd.f32 1e-05, %v2465_v6  ;;  %v6789_v6 = vld [vmem:[#allocation23 + $0xb8] sm:$0xff]  }
 0xede   : > { %v2461_v20 = vpop.xlane.xlu0 %2460 }
 0xedf   : > { %6978 = vrsqrt.f32 %v2468_v10  ;;  %v2466_v5 = vmul.f32 0.0078125, %v2461_v20  ;;  %v2464_v21 = vpop.xlane.xlu1 %2463  ;;  %v1246_v10 = vld [vmem:[%s9248_s5] sm:$0xf]  ;;  %v2512_v20 = vsub.s32 3, %v8433_v8 }
 0xee0   : > { %v2467_v56 = vmul.f32 0.0078125, %v2464_v21  ;;  %v2509_v21 = vrot.slane %v1246_v10, %v8472_v34 }
 0xee1   : > { %v2469_v58 = vadd.f32 1e-05, %v2466_v5  ;;  %v2501_v5 = vrot.slane %v1246_v10, %v8436_v9 }
 0xee2   : > { %v2470_v41 = vadd.f32 1e-05, %v2467_v56  ;;  %v2505_v56 = vrot.slane %v1246_v10, %v8439_v11 }
 0xee3   : > { %6980 = vrsqrt.f32 %v2469_v58  ;;  %v2513_v58 = vrot.slane %v1246_v10, %v2512_v20 }
 0xee4   : > { %6982 = vrsqrt.f32 %v2470_v41 }
 0xee9   : > { %v6979_v2 = vpop.eup %6978 }
 0xeea   : > { %v2474_v52 = vmul.f32 %v6979_v2, %v8652_v51 }
 0xeec   : > { %v2483_v53 = vmul.f32 %v5709_v60, %v2474_v52 }
 0xeed   : > { %v6981_v25 = vpop.eup %6980 }
 0xeee   : > { %v6983_v26 = vpop.eup %6982  ;;  %v2475_v31 = vmul.f32 %v6981_v25, %v8655_v38  ;;  %v2492_v36 = vadd.f32 %v5710_v3, %v2483_v53  ;;  %v6758_v38 = vld [vmem:[#allocation23 + $0x40] sm:$0xff]  }
 0xeef   : > { %v2476_v35 = vmul.f32 %v6983_v26, %v8660_v33  ;;  %5984 = vmatprep.subr.bf16.mxu1 %v6758_v38  ;;  %v6762_v33 = vld [vmem:[#allocation23 + $0x48] sm:$0xff]  }
 0xef0   : > { %v2484_v32 = vmul.f32 %v5709_v60, %v2475_v31 }
 0xef1   : > { %v2485_v22 = vmul.f32 %v5709_v60, %v2476_v35 }
 0xef2   : > { %v2493_v23 = vadd.f32 %v5710_v3, %v2484_v32 }
 0xef3   : > { %v2494_v51 = vadd.f32 %v5710_v3, %v2485_v22 }
 0xef4   : > { %v2495_v37 = vpack.c.bf16 %v2493_v23, %v2492_v36 }
 0xef5   : > { %v2496_v39 = vpack.c.bf16 %v2494_v51, %v2494_v51 }
 0xef6   : > { %2711 = vmatmul.mubr.bf16.vlgmr.msra.gmra.mrb[24].mxu1 %v2495_v37  ;;  %2762 = vmatmul.mubr.bf16.vlgmr.msra.gmra.mrb[28].mxu0 %v2495_v37 }
 0xef7   : > { %2720 = vmatprep.mubr.bf16.mxu1 %v7752_v0  ;;  %2771 = vmatprep.mubr.bf16.mxu0 %v7752_v0 }
 0xef8   : > { %5985 = vmatpush3.bf16.msra.mxu1 %v6760_v40  ;;  %6013 = vmatpush3.bf16.msra.mxu0 %v6761_v42 }
 0xef9   : > { %5986 = vmatprep.subr.bf16.mxu1 %v6762_v33  ;;  %6014 = vmatprep.subr.bf16.mxu0 %v6763_v43 }
 0xefc   : > { %5987 = vmatpush3.bf16.msra.mxu1 %v6764_v46  ;;  %6015 = vmatpush3.bf16.msra.mxu0 %v6765_v47 }
 0xefd   : > { %5988 = vmatprep.subr.bf16.mxu1 %v6766_v48  ;;  %6016 = vmatprep.subr.bf16.mxu0 %v6767_v49 }
 0xefe   : > { %2721 = vmatmul.mubr.bf16.gmra.mrb[28].mxu1 %v2496_v39  ;;  %2772 = vmatmul.mubr.bf16.gmra.mrb[32].mxu0 %v2496_v39 }
 0xf00   : > { %5989 = vmatpush3.bf16.msra.mxu1 %v6768_v50  ;;  %6017 = vmatpush3.bf16.msra.mxu0 %v6769_v54 }
 0xf01   : > { %5990 = vmatprep.subr.bf16.mxu1 %v6770_v57  ;;  %6018 = vmatprep.subr.bf16.mxu0 %v6771_v59 }
 0xf04   : > { %5991 = vmatpush3.bf16.msra.mxu1 %v6772_v61  ;;  %6019 = vmatpush3.bf16.msra.mxu0 %v6773_v29 }
 0xf05   : > { %5992 = vmatprep.subr.bf16.mxu1 %v6774_v1  ;;  %6020 = vmatprep.subr.bf16.mxu0 %v6775_v28 }
 0xf08   : > { %5993 = vmatpush3.bf16.msra.mxu1 %v6776_v7  ;;  %6021 = vmatpush3.bf16.msra.mxu0 %v6777_v27 }
 0xf09   : > { %5994 = vmatprep.subr.bf16.mxu1 %v6778_v12  ;;  %6022 = vmatprep.subr.bf16.mxu0 %v6779_v13 }
 0xf0c   : > { %5995 = vmatpush3.bf16.msra.mxu1 %v6780_v14  ;;  %6023 = vmatpush3.bf16.msra.mxu0 %v6781_v15 }
 0xf0d   : > { %5996 = vmatprep.subr.bf16.mxu1 %v6782_v4  ;;  %6024 = vmatprep.subr.bf16.mxu0 %v6783_v62 }
 0xf10   : > { %5997 = vmatpush3.bf16.msra.mxu1 %v6784_v16  ;;  %6025 = vmatpush3.bf16.msra.mxu0 %v6785_v63 }
 0xf11   : > { %5998 = vmatprep.subr.bf16.mxu1 %v6786_v17  ;;  %6026 = vmatprep.subr.bf16.mxu0 %v6787_v18 }
 0xf14   : > { %5999 = vmatpush3.bf16.msra.mxu1 %v6788_v19  ;;  %6027 = vmatpush3.bf16.msra.mxu0 %v6789_v6 }
 0xfc9   : > { %v2712_v41 = vpop.f32.mrb[24].mxu1  ;;  %v2763_v2 = vpop.f32.mrb[28].mxu0 }
 0xfca   : > { %v8681_v52 = vadd.f32 %v2712_v41, %v2501_v5  ;;  %v8683_v60 = vadd.f32 %v2763_v2, %v2509_v21  ;;  %v2714_v25 = vpop.f32.mrb[25].mxu1  ;;  %v2765_v26 = vpop.f32.mrb[29].mxu0 }
 0xfcb   : > { %v8685_v31 = vadd.f32 %v2714_v25, %v2505_v56  ;;  %v8687_v53 = vadd.f32 %v2765_v26, %v2513_v58  ;;  %v2716_v3 = vpop.f32.mrb[26].mxu1  ;;  %v2767_v32 = vpop.f32.mrb[30].mxu0 }
 0xfcc   : > { %v5743_v35 = vmul.f32 -1.702, %v8681_v52  ;;  %v5745_v36 = vmul.f32 -1.702, %v8683_v60  ;;  %v8691_v23 = vadd.f32 %v2716_v3, %v2501_v5  ;;  %v8693_v37 = vadd.f32 %v2767_v32, %v2509_v21  ;;  %v2718_v22 = vpop.f32.mrb[27].mxu1  ;;  %v2769_v51 = vpop.f32.mrb[31].mxu0 }
 0xfcd   : > { %v5744_v39 = vmul.f32 -1.702, %v8685_v31  ;;  %v5746_v38 = vmul.f32 -1.702, %v8687_v53  ;;  %v8697_v30 = vadd.f32 %v2718_v22, %v2505_v56  ;;  %v8699_v40 = vadd.f32 %v2769_v51, %v2513_v58 }
 0xfce   : > { %v2804_v42 = vmul.f32 1.442695, %v5743_v35  ;;  %v2808_v33 = vmul.f32 1.442695, %v5745_v36  ;;  %v5747_v43 = vmul.f32 -1.702, %v8691_v23 }
 0xfcf   : > { %v2806_v46 = vmul.f32 1.442695, %v5744_v39  ;;  %v2810_v47 = vmul.f32 1.442695, %v5746_v38  ;;  %v5749_v48 = vmul.f32 -1.702, %v8693_v37 }
 0xfd0   : > { %6984 = vpow2.f32 %v2804_v42  ;;  %v2812_v49 = vmul.f32 1.442695, %v5747_v43  ;;  %v5748_v50 = vmul.f32 -1.702, %v8697_v30  ;;  %v5750_v54 = vmul.f32 -1.702, %v8699_v40 }
 0xfd1   : > { %6986 = vpow2.f32 %v2808_v33  ;;  %v2816_v57 = vmul.f32 1.442695, %v5749_v48  ;;  %v2722_v59 = vpop.f32.mrb[28].mxu1  ;;  %v2773_v61 = vpop.f32.mrb[32].mxu0 }
 0xfd2   : > { %6988 = vpow2.f32 %v2806_v46  ;;  %v2814_v29 = vmul.f32 1.442695, %v5748_v50  ;;  %v2818_v1 = vmul.f32 1.442695, %v5750_v54  ;;  %v8705_v28 = vadd.f32 %v2722_v59, %v2501_v5  ;;  %v2724_v7 = vpop.f32.mrb[29].mxu1  ;;  %v2775_v27 = vpop.f32.mrb[33].mxu0 }
 0xfd3   : > { %6990 = vpow2.f32 %v2810_v47  ;;  %v8707_v12 = vadd.f32 %v2773_v61, %v2509_v21  ;;  %v8709_v13 = vadd.f32 %v2724_v7, %v2505_v56  ;;  %v8711_v14 = vadd.f32 %v2775_v27, %v2513_v58  ;;  %v2726_v15 = vpop.f32.mrb[30].mxu1  ;;  %v2777_v4 = vpop.f32.mrb[34].mxu0 }
 0xfd4   : > { %6992 = vpow2.f32 %v2812_v49  ;;  %v5751_v62 = vmul.f32 -1.702, %v8705_v28  ;;  %v2727_v16 = vpop.f32.mrb[31].mxu1  ;;  %v2778_v63 = vpop.f32.mrb[35].mxu0 }
 0xfd5   : > { %6994 = vpow2.f32 %v2816_v57  ;;  %v5753_v17 = vmul.f32 -1.702, %v8707_v12  ;;  %v5752_v18 = vmul.f32 -1.702, %v8709_v13  ;;  %v5754_v19 = vmul.f32 -1.702, %v8711_v14 }
 0xfd6   : > { %6996 = vpow2.f32 %v2814_v29  ;;  %v2820_v6 = vmul.f32 1.442695, %v5751_v62 }
 0xfd7   : > { %6998 = vpow2.f32 %v2818_v1  ;;  %v2824_v10 = vmul.f32 1.442695, %v5753_v17  ;;  %v2822_v5 = vmul.f32 1.442695, %v5752_v18  ;;  %v2826_v21 = vmul.f32 1.442695, %v5754_v19 }
 0xfd8   : > { %7000 = vpow2.f32 %v2820_v6 }
 0xfd9   : > { %7002 = vpow2.f32 %v2824_v10 }
 0xfda   : > { %v6985_v56 = vpop.eup %6984  ;;  %7004 = vpow2.f32 %v2822_v5 }
 0xfdb   : > { %v6987_v58 = vpop.eup %6986  ;;  %v2828_v41 = vadd.f32 1.0, %v6985_v56  ;;  %7006 = vpow2.f32 %v2826_v21 }
 0xfdc   : > { %v6989_v2 = vpop.eup %6988  ;;  %v2830_v25 = vadd.f32 1.0, %v6987_v58 }
 0xfdd   : > { %v6991_v26 = vpop.eup %6990  ;;  %7008 = vrcp.f32 %v2828_v41  ;;  %v2829_v3 = vadd.f32 1.0, %v6989_v2 }
 0xfde   : > { %v6993_v32 = vpop.eup %6992  ;;  %7010 = vrcp.f32 %v2830_v25  ;;  %v2831_v35 = vadd.f32 1.0, %v6991_v26 }
 0xfdf   : > { %v6995_v36 = vpop.eup %6994  ;;  %7012 = vrcp.f32 %v2829_v3  ;;  %v2832_v22 = vadd.f32 1.0, %v6993_v32 }
 0xfe0   : > { %v6997_v51 = vpop.eup %6996  ;;  %7014 = vrcp.f32 %v2831_v35  ;;  %v2834_v39 = vadd.f32 1.0, %v6995_v36 }
 0xfe1   : > { %v6999_v38 = vpop.eup %6998  ;;  %7016 = vrcp.f32 %v2832_v22  ;;  %v2833_v42 = vadd.f32 1.0, %v6997_v51 }
 0xfe2   : > { %v7001_v33 = vpop.eup %7000  ;;  %7018 = vrcp.f32 %v2834_v39  ;;  %v2835_v43 = vadd.f32 1.0, %v6999_v38 }
 0xfe3   : > { %v7003_v46 = vpop.eup %7002  ;;  %7020 = vrcp.f32 %v2833_v42  ;;  %v2836_v47 = vadd.f32 1.0, %v7001_v33  ;;  %v5787_v33 = vld [vmem:[#allocation25] ss:$0 sm:$0xff] }
 0xfe4   : > { %v7005_v48 = vpop.eup %7004  ;;  %7022 = vrcp.f32 %v2835_v43  ;;  %v2838_v50 = vadd.f32 1.0, %v7003_v46 }
 0xfe5   : > { %v7007_v49 = vpop.eup %7006  ;;  %v2837_v54 = vadd.f32 1.0, %v7005_v48  ;;  %7024 = vrcp.f32 %v2836_v47 }
 0xfe6   : > { %v2839_v57 = vadd.f32 1.0, %v7007_v49 }
 0xfe7   : > { %v7009_v59 = vpop.eup %7008  ;;  %7026 = vrcp.f32 %v2837_v54 }
 0xfe8   : > { %v7011_v61 = vpop.eup %7010  ;;  %7028 = vrcp.f32 %v2839_v57  ;;  %v2864_v15 = vmul.f32 %v7009_v59, %v8681_v52 }
 0xfe9   : > { %v7013_v29 = vpop.eup %7012  ;;  %7030 = vrcp.f32 %v2838_v50  ;;  %v2866_v16 = vmul.f32 %v7011_v61, %v8683_v60 }
 0xfea   : > { %v7015_v1 = vpop.eup %7014  ;;  %v2865_v18 = vmul.f32 %v7013_v29, %v8685_v31 }
 0xfeb   : > { %v7017_v7 = vpop.eup %7016  ;;  %v2867_v10 = vmul.f32 %v7015_v1, %v8687_v53 }
 0xfec   : > { %v7019_v27 = vpop.eup %7018  ;;  %v2868_v4 = vmul.f32 %v7017_v7, %v8691_v23 }
 0xfed   : > { %v7021_v62 = vpop.eup %7020  ;;  %v2870_v63 = vmul.f32 %v7019_v27, %v8693_v37 }
 0xfee   : > { %v7023_v17 = vpop.eup %7022  ;;  %v2876_v19 = vpack.c.bf16 %v2868_v4, %v2864_v15  ;;  %v2869_v6 = vmul.f32 %v7021_v62, %v8697_v30 }
 0xfef   : > { %v2878_v5 = vpack.c.bf16 %v2870_v63, %v2866_v16  ;;  %v2871_v21 = vmul.f32 %v7023_v17, %v8699_v40  ;;  %v7025_v56 = vpop.eup %7024  ;;  %v6790_v16 = vld [vmem:[#allocation13 + $0xc0] ss:$12 sps:$4 sm:$0xff]   ;;  %v6792_v63 = vld [vmem:[#allocation13 + $0xc4] ss:$12 sps:$4 sm:$0xff]   ;;  %v6795_v17 = vld [vmem:[#allocation13 + $0xdc] ss:$12 sps:$4 sm:$0xff]  }
 0xff0   : > { %v2877_v52 = vpack.c.bf16 %v2869_v6, %v2865_v18  ;;  %v2872_v53 = vmul.f32 %v7025_v56, %v8705_v28  ;;  %3547 = vmatprep.subr.bf16.mxu1 %v6792_v63  ;;  %v6793_v18 = vld [vmem:[#allocation13 + $0xd8] ss:$12 sps:$4 sm:$0xff]  }
 0xff1   : > { %v7027_v58 = vpop.eup %7026  ;;  %v2879_v23 = vpack.c.bf16 %v2871_v21, %v2867_v10 }
 0xff2   : > { %v7029_v41 = vpop.eup %7028  ;;  %v2873_v60 = vmul.f32 %v7027_v58, %v8709_v13  ;;  %3108 = vmatprep.mubr.bf16.mxu1 %v2877_v52  ;;  %v2880_v25 = vpack.c.bf16 %v2872_v53, %v2872_v53  ;;  %v6796_v53 = vld [vmem:[#allocation13 + $0xf0] ss:$12 sps:$4 sm:$0xff]  }
 0xff3   : > { %v7031_v37 = vpop.eup %7030  ;;  %v2875_v2 = vmul.f32 %v7029_v41, %v8711_v14  ;;  %3156 = vmatprep.mubr.bf16.mxu0 %v2879_v23  ;;  %3109 = vmatmul.mubr.bf16.vlgmr.msra.gmra.mrb[32].mxu1 %v2876_v19 }
 0xff4   : > { %v2881_v31 = vpack.c.bf16 %v2873_v60, %v2873_v60  ;;  %3157 = vmatmul.mubr.bf16.vlgmr.msra.gmra.mrb[36].mxu0 %v2878_v5  ;;  %v2874_v40 = vmul.f32 %v7031_v37, %v8707_v12  ;;  %3548 = vmatpush1.bf16.msra.mxu1 %v6790_v16 }
 0xff5   : > { %v2883_v30 = vpack.c.bf16 %v2875_v2, %v2875_v2  ;;  %3549 = vmatprep.subr.bf16.mxu1 %v6795_v17  ;;  %v6798_v2 = vld [vmem:[#allocation13 + $0xf4] ss:$12 sps:$4 sm:$0xff]  }
 0xff6   : > { %3116 = vmatprep.mubr.bf16.mxu1 %v2881_v31  ;;  %v2882_v26 = vpack.c.bf16 %v2874_v40, %v2874_v40  ;;  %v6799_v31 = vld [vmem:[#allocation13 + $0xc8] ss:$12 sps:$4 sm:$0xff]   ;;  %v6803_v40 = vld [vmem:[#allocation13 + $0xe0] ss:$12 sps:$4 sm:$0xff]  }
 0xff7   : > { %3164 = vmatprep.mubr.bf16.mxu0 %v2883_v30  ;;  %6261 = vmatprep.subr.bf16.mxu0 %v6799_v31  ;;  %v6802_v30 = vld [vmem:[#allocation13 + $0x10c] ss:$12 sps:$4 sm:$0xff]  }
 0xff8   : > { %3550 = vmatpush1.bf16.msra.mxu1 %v6793_v18  ;;  %6262 = vmatpush3.bf16.msra.mxu0 %v6799_v31 }
 0xff9   : > { %3551 = vmatprep.subr.bf16.mxu1 %v6798_v2  ;;  %6263 = vmatprep.subr.bf16.mxu0 %v6803_v40 }
 0xffb   : > { %3117 = vmatmul.mubr.bf16.gmra.mrb[36].mxu1 %v2880_v25  ;;  %v6800_v25 = vld [vmem:[#allocation13 + $0x108] ss:$12 sps:$4 sm:$0xff]  }
 0xffc   : > { %3165 = vmatmul.mubr.bf16.gmra.mrb[40].mxu0 %v2882_v26  ;;  %3579 = vmatprep.mubr.bf16.mxu1 %v7752_v0  ;;  %v6806_v26 = vld [vmem:[#allocation13 + $0x124] ss:$12 sps:$4 sm:$0xff]  }
 0xffd   : > { %3552 = vmatpush1.bf16.msra.mxu1 %v6796_v53  ;;  %6264 = vmatpush3.bf16.msra.mxu0 %v6803_v40 }
 0xffe   : > { %3553 = vmatprep.subr.bf16.mxu1 %v6802_v30 }
0x1001   : > { %3554 = vmatpush1.bf16.msra.mxu1 %v6800_v25 }
0x1002   : > { %3555 = vmatprep.subr.bf16.mxu1 %v6806_v26 }
0x10c6   : > { %v6000_v13 = vpop.f32.mrb[32].mxu1 }
0x10c7   : > { %v6028_v3 = vpop.f32.mrb[36].mxu0  ;;  %v6001_v14 = vpop.f32.mrb[33].mxu1 }
0x10c8   : > { %v6002_v32 = vadd.f32 %v6001_v14, %v6000_v13  ;;  %v6029_v35 = vpop.f32.mrb[37].mxu0  ;;  %v6003_v36 = vpop.f32.mrb[34].mxu1  ;;  %v6807_v13 = vld [vmem:[#allocation13 + $0xf8] ss:$12 sps:$4 sm:$0xff]   ;;  %v6810_v14 = vld [vmem:[#allocation13 + $0x13c] ss:$12 sps:$4 sm:$0xff]  }
0x10c9   : > { %v6030_v22 = vadd.f32 %v6029_v35, %v6028_v3  ;;  %v6031_v51 = vpop.f32.mrb[38].mxu0  ;;  %v6004_v28 = vpop.f32.mrb[35].mxu1  ;;  %v6804_v3 = vld [vmem:[#allocation13 + $0x120] ss:$12 sps:$4 sm:$0xff]   ;;  %6265 = vmatprep.subr.bf16.mxu0 %v6807_v13  ;;  %v6808_v35 = vld [vmem:[#allocation13 + $0x138] ss:$12 sps:$4 sm:$0xff]  }
0x10ca   : > { %v6005_v39 = vadd.f32 %v6004_v28, %v6003_v36  ;;  %v6032_v38 = vpop.f32.mrb[39].mxu0  ;;  %3556 = vmatpush1.bf16.msra.mxu1 %v6804_v3  ;;  %6266 = vmatpush3.bf16.msra.mxu0 %v6807_v13  ;;  %v6814_v36 = vld [vmem:[#allocation13 + $0x154] ss:$12 sps:$4 sm:$0xff]  }
0x10cb   : > { %v3159_v12 = vadd.f32 %v6030_v22, %v6002_v32  ;;  %v6033_v42 = vadd.f32 %v6032_v38, %v6031_v51  ;;  %v6811_v32 = vld [vmem:[#allocation13 + $0x110] ss:$12 sps:$4 sm:$0xff]   ;;  %3557 = vmatprep.subr.bf16.mxu1 %v6810_v14  ;;  %v6815_v22 = vld [vmem:[#allocation13 + $0x128] ss:$12 sps:$4 sm:$0xff]   ;;  %v6819_v38 = vld [vmem:[#allocation13 + $0x140] ss:$12 sps:$4 sm:$0xff]  }
0x10cc   : > { %6267 = vmatprep.subr.bf16.mxu0 %v6811_v32  ;;  %v6812_v51 = vld [vmem:[#allocation13 + $0x150] ss:$12 sps:$4 sm:$0xff]   ;;  %v6816_v28 = vld [vmem:[#allocation13 + $0x168] ss:$12 sps:$4 sm:$0xff]  }
0x10cd   : > { %v3172_v43 = vadd.f32 %v3159_v12, %v8640_v55  ;;  %v3162_v46 = vadd.f32 %v6033_v42, %v6005_v39  ;;  %v6818_v39 = vld [vmem:[#allocation13 + $0x16c] ss:$12 sps:$4 sm:$0xff]   ;;  %v6821_v42 = vld [vmem:[#allocation13 + $0x170] ss:$12 sps:$4 sm:$0xff]  }
0x10ce   : > { %v6006_v47 = vpop.f32.mrb[36].mxu1  ;;  %3558 = vmatpush1.bf16.msra.mxu1 %v6808_v35  ;;  %6268 = vmatpush3.bf16.msra.mxu0 %v6811_v32  ;;  %v6820_v12 = vld [vmem:[#allocation13 + $0x158] ss:$12 sps:$4 sm:$0xff]  }
0x10cf   : > { %v3173_v48 = vadd.f32 %v3162_v46, %v8645_v24  ;;  %v6034_v49 = vpop.f32.mrb[40].mxu0  ;;  %v6007_v50 = vpop.f32.mrb[37].mxu1  ;;  %v8732_v54 = vadd.f32 %v5787_v33, %v3172_v43  ;;  %3559 = vmatprep.subr.bf16.mxu1 %v6814_v36  ;;  %6269 = vmatprep.subr.bf16.mxu0 %v6815_v22 }
0x10d0   : > { %v6008_v57 = vadd.f32 %v6007_v50, %v6006_v47  ;;  %v6035_v59 = vpop.f32.mrb[41].mxu0  ;;  %v6009_v61 = vpop.f32.mrb[38].mxu1 }
0x10d1   : > { %v6036_v29 = vadd.f32 %v6035_v59, %v6034_v49  ;;  %v6037_v1 = vpop.f32.mrb[42].mxu0  ;;  %3348 = vadd.xlane.f32.xlu0 %v8732_v54  ;;  %v6010_v7 = vpop.f32.mrb[39].mxu1  ;;  %v8735_v27 = vadd.f32 %v5787_v33, %v3173_v48 }
0x10d2   : > { %v6038_v15 = vpop.f32.mrb[43].mxu0  ;;  %3560 = vmatpush1.bf16.msra.mxu1 %v6812_v51  ;;  %6270 = vmatpush3.bf16.msra.mxu0 %v6815_v22 }
0x10d3   : > { %v3167_v55 = vadd.f32 %v6036_v29, %v6008_v57  ;;  %3350 = vadd.xlane.f32.xlu1 %v8735_v27  ;;  %3561 = vmatprep.subr.bf16.mxu1 %v6818_v39  ;;  %v5790_v29 = vld [vmem:[%s9247_s11 + $0x1] ss:$0 sm:$0xff] }
0x10d4   : > { %6271 = vmatprep.subr.bf16.mxu0 %v6819_v38 }
0x10d5   : > { %v3174_v24 = vadd.f32 %v3167_v55, %v8643_v45 }
0x10d6   : > { %3562 = vmatpush1.bf16.msra.mxu1 %v6816_v28  ;;  %6272 = vmatpush3.bf16.msra.mxu0 %v6819_v38 }
0x10d7   : > { %v8739_v4 = vadd.f32 %v5787_v33, %v3174_v24  ;;  %6273 = vmatprep.subr.bf16.mxu0 %v6820_v12  ;;  %v5791_v24 = vld [vmem:[#allocation11 + $0x1] ss:$0 sm:$0xff] }
0x10d9   : > { %v3352_v62 = vsel %vm1090_vm1, %v8739_v4, 0.0 }
0x10da   : > { %3353 = vadd.xlane.f32.xlu0 %v3352_v62  ;;  %6274 = vmatpush3.bf16.msra.mxu0 %v6820_v12 }
0x10db   : > { %6275 = vmatprep.subr.bf16.mxu0 %v6821_v42 }
0x10de   : > { %6276 = vmatpush3.bf16.msra.mxu0 %v6821_v42 }
0x115e   : > { %v3349_v19 = vpop.xlane.xlu0 %3348 }
0x115f   : > { %v3355_v6 = vmul.f32 0.0078125, %v3349_v19 }
0x1160   : > { %v3351_v10 = vpop.xlane.xlu1 %3350 }
0x1161   : > { %v8744_v5 = vsub.f32 %v8732_v54, %v3355_v6  ;;  %v3356_v45 = vmul.f32 0.0078125, %v3351_v10 }
0x1163   : > { %v8747_v21 = vsub.f32 %v8735_v27, %v3356_v45  ;;  %v3361_v56 = vmul.f32 %v8744_v5, %v8744_v5 }
0x1165   : > { %3364 = vadd.xlane.f32.xlu1 %v3361_v56  ;;  %v3362_v52 = vmul.f32 %v8747_v21, %v8747_v21 }
0x1167   : > { %3366 = vadd.xlane.f32.xlu0 %v3362_v52  ;;  %v3354_v58 = vpop.xlane.xlu0 %3353 }
0x1168   : > { %v3357_v23 = vmul.f32 0.0078125, %v3354_v58 }
0x116a   : > { %v8754_v41 = vsub.f32 %v8739_v4, %v3357_v23 }
0x116c   : > { %v3363_v60 = vmul.f32 %v8754_v41, %v8754_v41 }
0x116e   : > { %v3368_v37 = vsel %vm1090_vm1, %v3363_v60, 0.0 }
0x116f   : > { %3369 = vadd.xlane.f32.xlu1 %v3368_v37 }
0x11f2   : > { %v3365_v33 = vpop.xlane.xlu1 %3364 }
0x11f3   : > { %v3371_v43 = vmul.f32 0.0078125, %v3365_v33 }
0x11f4   : > { %v3367_v46 = vpop.xlane.xlu0 %3366 }
0x11f5   : > { %v3374_v47 = vadd.f32 1e-05, %v3371_v43  ;;  %v3372_v48 = vmul.f32 0.0078125, %v3367_v46 }
0x11f7   : > { %7032 = vrsqrt.f32 %v3374_v47  ;;  %v3375_v49 = vadd.f32 1e-05, %v3372_v48 }
0x11f9   : > { %7034 = vrsqrt.f32 %v3375_v49 }
0x11fc   : > { %v3370_v50 = vpop.xlane.xlu1 %3369 }
0x11fd   : > { %v3373_v57 = vmul.f32 0.0078125, %v3370_v50 }
0x11ff   : > { %v3376_v59 = vadd.f32 1e-05, %v3373_v57 }
0x1201   : > { %v7033_v61 = vpop.eup %7032  ;;  %7036 = vrsqrt.f32 %v3376_v59 }
0x1202   : > { %v3380_v1 = vmul.f32 %v7033_v61, %v8744_v5  ;;  %v3222_v5 = vld [vmem:[#allocation14 + $0x3] sm:$0x7] }
0x1203   : > { %v7035_v7 = vpop.eup %7034  ;;  %v3411_v52 = vrot.slane %v3222_v5, %v8439_v11  ;;  %v3415_v25 = vrot.slane %v3222_v5, %v8472_v34 }
0x1204   : > { %v3389_v15 = vmul.f32 %v5790_v29, %v3380_v1  ;;  %v3381_v55 = vmul.f32 %v7035_v7, %v8747_v21  ;;  %v3407_v21 = vrot.slane %v3222_v5, %v8436_v9 }
0x1206   : > { %v3390_v62 = vmul.f32 %v5790_v29, %v3381_v55  ;;  %v3398_v16 = vadd.f32 %v5791_v24, %v3389_v15 }
0x1208   : > { %v3399_v63 = vadd.f32 %v5791_v24, %v3390_v62 }
0x120a   : > { %v3401_v17 = vpack.c.bf16 %v3399_v63, %v3398_v16 }
0x120b   : > { %v7037_v18 = vpop.eup %7036 }
0x120c   : > { %3580 = vmatmul.mubr.bf16.vlgmr.msra.gmra.mrb[40].mxu1 %v3401_v17  ;;  %6277 = vmatprep.mubr.bf16.mxu0 %v3401_v17  ;;  %v3382_v19 = vmul.f32 %v7037_v18, %v8754_v41 }
0x120d   : > { %3589 = vmatprep.mubr.bf16.mxu1 %v7752_v0 }
0x120e   : > { %v3391_v6 = vmul.f32 %v5790_v29, %v3382_v19 }
0x1210   : > { %v3400_v10 = vadd.f32 %v5791_v24, %v3391_v6 }
0x1212   : > { %v3402_v45 = vpack.c.bf16 %v3400_v10, %v3400_v10 }
0x1214   : > { %3590 = vmatmul.mubr.bf16.gmra.mrb[44].mxu1 %v3402_v45  ;;  %6278 = vmatmul.mubr.bf16.vlgmr.msra.gmra.mrb[44].mxu0 %v3402_v45 }
0x12df   : > { %v3581_v56 = vpop.f32.mrb[40].mxu1 }
0x12e0   : > { %v3583_v58 = vpop.f32.mrb[41].mxu1  ;;  %v3582_v60 = vadd.f32 %v3581_v56, %v3407_v21 }
0x12e1   : > { %v3585_v23 = vpop.f32.mrb[42].mxu1  ;;  %v3584_v31 = vadd.f32 %v3583_v58, %v3411_v52 }
0x12e2   : > { %v3586_v37 = vadd.f32 %v3585_v23, %v3407_v21  ;;  %v3587_v2 = vpop.f32.mrb[43].mxu1 }
0x12e3   : > { %v3588_v41 = vadd.f32 %v3587_v2, %v3411_v52 }
0x12e4   : > { %v8768_v53 = vpack.c.bf16 %v3586_v37, %v3582_v60 }
0x12e5   : > { %v8770_v30 = vpack.c.bf16 %v3588_v41, %v3584_v31 }
0x12e6   : > { %6285 = vmatprep.mubr.msk.bf16.mxu1 %vm1616_vm2, %v8768_v53 }
0x12e7   : > { %v3591_v40 = vpop.f32.mrb[44].mxu1  ;;  %v6279_v26 = vpop.f32.mrb[44].mxu0  ;;  %6393 = vmatprep.subr.msk.bf16.mxu1 %vm1616_vm2, %v8770_v30  ;;  %v3659_v13 = vsel %vm1616_vm2, %v8770_v30, 0 }
0x12e8   : > { %v3593_v3 = vpop.f32.mrb[45].mxu1  ;;  %v3632_v14 = vpop.f32.mrb[45].mxu0  ;;  %6282 = vmatpush3.bf16.xpose.msra.mxu1 %v3659_v13  ;;  %v3641_v42 = vadd.f32 %v6279_v26, %v3415_v25  ;;  %v3592_v43 = vadd.f32 %v3591_v40, %v3407_v21 }
0x12e9   : > { %v3594_v32 = vadd.f32 %v3593_v3, %v3411_v52  ;;  %v3595_v35 = vpop.f32.mrb[46].mxu1  ;;  %v6280_v36 = vpop.f32.mrb[46].mxu0  ;;  %v3633_v39 = vadd.f32 %v3632_v14, %v3415_v25 }
0x12ea   : > { %v3596_v22 = vpop.f32.mrb[47].mxu1  ;;  %v3635_v51 = vpop.f32.mrb[47].mxu0  ;;  %v8788_v46 = vpack.c.bf16 %v3641_v42, %v3641_v42  ;;  %v8790_v47 = vpack.c.bf16 %v3592_v43, %v3592_v43 }
0x12eb   : > { %v8779_v28 = vpack.c.bf16 %v3594_v32, %v3594_v32  ;;  %v3636_v38 = vadd.f32 %v3635_v51, %v3415_v25 }
0x12ec   : > { %v3751_v48 = vand.u32 %v8788_v46, %v8479_v44 }
0x12ed   : > { %v8781_v12 = vpack.c.bf16 %v3636_v38, %v3633_v39  ;;  %6394 = vmatprep.subr.msk.bf16.mxu1 %vm1616_vm2, %v8779_v28  ;;  %v3662_v33 = vsel %vm1616_vm2, %v8779_v28, 0 }
0x12f0   : > { %6284 = vmatpush3.bf16.xpose.msra.mxu1 %v3662_v33 }
0x12f1   : > { %6289 = vmatprep.subr.bf16.mxu1 %v8781_v12 }
0x12f7   : > { %6286 = vmatmul.mubr.msk.bf16.vlgmr.msra.gmra.mrb[48].mxu1 %vm1616_vm2, %v8790_v47 }
0x12f8   : > { %6290 = vmatpush3.bf16.msra.mxu1 %v8781_v12 }
0x12f9   : > { %6291 = vmatprep.subr.bf16.mxu1 %v3751_v48 }
0x12fc   : > { %6292 = vmatpush3.bf16.msra.mxu1 %v3751_v48 }
0x13ca   : > { %v6287_v49 = vpop.f32.mrb[48].mxu1 }
0x13cb   : > { %v3698_v50 = vpop.f32.mrb[49].mxu1  ;;  %v3714_v29 = vmul.f32 0.17677669, %v6287_v49 }
0x13cc   : > { %v3712_v57 = vmul.f32 0.17677669, %v3698_v50  ;;  %v6288_v59 = vpop.f32.mrb[50].mxu1 }
0x13cd   : > { %v3701_v61 = vpop.f32.mrb[51].mxu1  ;;  %v3721_v55 = vsel %vm1687_vm3, %v3714_v29, -inf }
0x13ce   : > { %v3713_v1 = vmul.f32 0.17677669, %v3701_v61  ;;  %v3715_v7 = vsel %vm1680_vm4, %v3712_v57, -inf }
0x13cf   : > { %3716 = vmax.xlane.f32.xlu0 %v3715_v7 }
0x13d0   : > { %v3718_v15 = vsel %vm1680_vm4, %v3713_v1, -inf }
0x13d1   : > { %3719 = vmax.xlane.f32.xlu1 %v3718_v15 }
0x13d3   : > { %3722 = vmax.xlane.f32.xlu0 %v3721_v55 }
0x13e2   : > { %3815 = vrot.lane.b32.xlu1 %v8770_v30, %s7753_s13 }
0x13e6   : > { %3809 = vrot.lane.b32.xlu1 %v8768_v53, %s7753_s13 }
0x13e9   : > { %3817 = vrot.lane.b32.xlu0 %v8779_v28, %s7753_s13 }
0x13ea   : > { %3811 = vrot.lane.b32.xlu1 %v8790_v47, %s7753_s13 }
0x145c   : > { %v3717_v24 = vpop.xlane.xlu0 %3716 }
0x145d   : > { %v3724_v62 = vsub.f32 %v3712_v57, %v3717_v24 }
0x145e   : > { %v3720_v16 = vpop.xlane.xlu1 %3719 }
0x145f   : > { %v3727_v63 = vmul.f32 1.442695, %v3724_v62  ;;  %v3725_v17 = vsub.f32 %v3713_v1, %v3720_v16 }
0x1460   : > { %v3723_v18 = vpop.xlane.xlu0 %3722 }
0x1461   : > { %v3729_v19 = vmul.f32 1.442695, %v3725_v17  ;;  %v3726_v6 = vsub.f32 %v3714_v29, %v3723_v18  ;;  %7038 = vpow2.f32 %v3727_v63 }
0x1462   : > { %v3816_v10 = vpop.permute.xlu1 %3815 }
0x1463   : > { %7040 = vpow2.f32 %v3729_v19  ;;  %v3731_v45 = vmul.f32 1.442695, %v3726_v6  ;;  %6395 = vmatprep.subr.msk.bf16.mxu1 %vm1616_vm2, %v3816_v10  ;;  %v3826_v23 = vsel %vm1616_vm2, %v3816_v10, 0 }
0x1464   : > { %v3818_v37 = vpop.permute.xlu0 %3817 }
0x1465   : > { %7042 = vpow2.f32 %v3731_v45  ;;  %v3829_v2 = vsel %vm1616_vm2, %v3818_v37, 0 }
0x1466   : > { %v3810_v60 = vpop.permute.xlu1 %3809 }
0x146a   : > { %v3812_v31 = vpop.permute.xlu1 %3811 }
0x146b   : > { %v8809_v5 = vpop.eup %7038 }
0x146d   : > { %v8811_v21 = vpop.eup %7040 }
0x146e   : > { %v3742_v56 = vpack.c.bf16 %v8811_v21, %v8809_v5 }
0x146f   : > { %v8815_v52 = vpop.eup %7042 }
0x1470   : > { %6293 = vmatprep.mubr.msk.bf16.mxu1 %vm1680_vm4, %v3742_v56  ;;  %v3743_v58 = vpack.c.bf16 %v8815_v52, %v8815_v52 }
0x1472   : > { %6294 = vmatmul.mubr.msk.bf16.vlgmr.msra.gmra.mrb[52].mxu1 %vm1680_vm4, %v3743_v58 }
0x1473   : > { %6298 = vmatpush3.bf16.xpose.msra.mxu1 %v3826_v23  ;;  %6301 = vmatprep.mubr.msk.bf16.mxu1 %vm1616_vm2, %v3810_v60 }
0x1474   : > { %6396 = vmatprep.subr.msk.bf16.mxu1 %vm1616_vm2, %v3818_v37 }
0x147b   : > { %6300 = vmatpush3.bf16.xpose.msra.mxu1 %v3829_v2 }
0x1482   : > { %6302 = vmatmul.mubr.msk.bf16.vlgmr.msra.gmra.mrb[56].mxu1 %vm1616_vm2, %v3812_v31 }
0x1545   : > { %v8826_v41 = vpop.f32.mrb[52].mxu1 }
0x1546   : > { %v8828_v40 = vpop.f32.mrb[53].mxu1 }
0x1547   : > { %v6296_v25 = vpop.f32.mrb[54].mxu1 }
0x1548   : > { %v8830_v26 = vpop.f32.mrb[55].mxu1 }
0x1555   : > { %v6303_v13 = vpop.f32.mrb[56].mxu1 }
0x1556   : > { %v3881_v3 = vmul.f32 0.17677669, %v6303_v13  ;;  %v3865_v14 = vpop.f32.mrb[57].mxu1 }
0x1557   : > { %v3879_v32 = vmul.f32 0.17677669, %v3865_v14  ;;  %v6304_v35 = vpop.f32.mrb[58].mxu1 }
0x1558   : > { %v3868_v36 = vpop.f32.mrb[59].mxu1  ;;  %v3888_v22 = vsel %vm1687_vm3, %v3881_v3, -inf }
0x1559   : > { %v3880_v51 = vmul.f32 0.17677669, %v3868_v36  ;;  %3889 = vmax.xlane.f32.xlu0 %v3888_v22  ;;  %v3882_v39 = vsel %vm1680_vm4, %v3879_v32, -inf }
0x155a   : > { %3883 = vmax.xlane.f32.xlu1 %v3882_v39 }
0x155b   : > { %v3885_v38 = vsel %vm1680_vm4, %v3880_v51, -inf }
0x155d   : > { %3886 = vmax.xlane.f32.xlu0 %v3885_v38 }
0x156b   : > { %3915 = vrot.lane.b32.xlu1 %v8788_v46, %s7753_s13 }
0x156f   : > { %3985 = vrot.lane.b32.xlu1 %v8770_v30, %s7754_s16 }
0x1573   : > { %3987 = vrot.lane.b32.xlu1 %v8779_v28, %s7754_s16  ;;  %3913 = vrot.lane.b32.xlu0 %v8781_v12, %s7753_s13 }
0x1577   : > { %3983 = vrot.lane.b32.xlu1 %v8790_v47, %s7754_s16  ;;  %3981 = vrot.lane.b32.xlu0 %v8768_v53, %s7754_s16 }
0x157b   : > { %4083 = vrot.lane.b32.xlu1 %v8788_v46, %s7754_s16 }
0x15e6   : > { %v3890_v42 = vpop.xlane.xlu0 %3889 }
0x15e7   : > { %v3893_v33 = vsub.f32 %v3881_v3, %v3890_v42  ;;  %v3884_v43 = vpop.xlane.xlu1 %3883 }
0x15e8   : > { %v3891_v48 = vsub.f32 %v3879_v32, %v3884_v43 }
0x15e9   : > { %v3898_v49 = vmul.f32 1.442695, %v3893_v33 }
0x15ea   : > { %v3894_v50 = vmul.f32 1.442695, %v3891_v48  ;;  %v3887_v57 = vpop.xlane.xlu0 %3886 }
0x15eb   : > { %v3892_v59 = vsub.f32 %v3880_v51, %v3887_v57  ;;  %v3916_v61 = vpop.permute.xlu1 %3915  ;;  %7044 = vpow2.f32 %v3898_v49 }
0x15ec   : > { %7046 = vpow2.f32 %v3894_v50  ;;  %v3925_v7 = vand.u32 %v3916_v61, %v8479_v44 }
0x15ed   : > { %v3896_v29 = vmul.f32 1.442695, %v3892_v59 }
0x15ee   : > { %v3914_v1 = vpop.permute.xlu0 %3913 }
0x15ef   : > { %7048 = vpow2.f32 %v3896_v29  ;;  %6305 = vmatprep.subr.bf16.mxu0 %v3914_v1  ;;  %v3986_v15 = vpop.permute.xlu1 %3985 }
0x15f0   : > { %6306 = vmatpush3.bf16.msra.mxu0 %v3914_v1  ;;  %v3996_v17 = vsel %vm1616_vm2, %v3986_v15, 0 }
0x15f1   : > { %6307 = vmatprep.subr.bf16.mxu0 %v3925_v7 }
0x15f2   : > { %v3982_v18 = vpop.permute.xlu0 %3981 }
0x15f3   : > { %v3988_v19 = vpop.permute.xlu1 %3987 }
0x15f4   : > { %6308 = vmatpush3.bf16.msra.mxu0 %v3925_v7  ;;  %v3999_v6 = vsel %vm1616_vm2, %v3988_v19, 0 }
0x15f5   : > { %6397 = vmatprep.subr.msk.bf16.mxu0 %vm1616_vm2, %v3986_v15  ;;  %v8851_v55 = vpop.eup %7044 }
0x15f6   : > { %v8853_v24 = vpop.eup %7046  ;;  %v3910_v63 = vpack.c.bf16 %v8851_v55, %v8851_v55 }
0x15f7   : > { %v3984_v10 = vpop.permute.xlu1 %3983 }
0x15f9   : > { %v8855_v62 = vpop.eup %7048 }
0x15fa   : > { %v3909_v16 = vpack.c.bf16 %v8855_v62, %v8853_v24 }
0x15fb   : > { %v4084_v36 = vpop.permute.xlu1 %4083 }
0x15fc   : > { %6309 = vmatprep.mubr.msk.bf16.mxu0 %vm1680_vm4, %v3909_v16  ;;  %v4093_v49 = vand.u32 %v4084_v36, %v8479_v44  ;;  %v3906_v36 = vsel %vm1687_vm3, %v8851_v55, 0.0 }
0x15fd   : > { %6310 = vmatmul.mubr.msk.bf16.vlgmr.msra.gmra.mrb[48].mxu0 %vm1680_vm4, %v3910_v63 }
0x15fe   : > { %6314 = vmatpush3.bf16.xpose.msra.mxu0 %v3996_v17  ;;  %6317 = vmatprep.mubr.msk.bf16.mxu0 %vm1616_vm2, %v3982_v18 }
0x15ff   : > { %6398 = vmatprep.subr.msk.bf16.mxu0 %vm1616_vm2, %v3988_v19 }
0x1606   : > { %6316 = vmatpush3.bf16.xpose.msra.mxu0 %v3999_v6 }
0x160d   : > { %6318 = vmatmul.mubr.msk.bf16.vlgmr.msra.gmra.mrb[52].mxu0 %vm1616_vm2, %v3984_v10 }
0x16d0   : > { %v8868_v45 = vpop.f32.mrb[48].mxu0 }
0x16d1   : > { %v8870_v56 = vpop.f32.mrb[49].mxu0 }
0x16d2   : > { %v6312_v58 = vpop.f32.mrb[50].mxu0 }
0x16d3   : > { %v8872_v23 = vpop.f32.mrb[51].mxu0 }
0x16e0   : > { %v6319_v60 = vpop.f32.mrb[52].mxu0 }
0x16e1   : > { %v4051_v37 = vmul.f32 0.17677669, %v6319_v60  ;;  %v4035_v2 = vpop.f32.mrb[53].mxu0 }
0x16e2   : > { %v6320_v31 = vpop.f32.mrb[54].mxu0  ;;  %v4049_v25 = vmul.f32 0.17677669, %v4035_v2 }
0x16e3   : > { %v4038_v13 = vpop.f32.mrb[55].mxu0  ;;  %v4058_v3 = vsel %vm1687_vm3, %v4051_v37, -inf }
0x16e4   : > { %v4050_v14 = vmul.f32 0.17677669, %v4038_v13  ;;  %4059 = vmax.xlane.f32.xlu0 %v4058_v3  ;;  %v4052_v35 = vsel %vm1680_vm4, %v4049_v25, -inf }
0x16e6   : > { %v4055_v32 = vsel %vm1680_vm4, %v4050_v14, -inf }
0x16e7   : > { %4056 = vmax.xlane.f32.xlu1 %v4055_v32  ;;  %v3903_v32 = vsel %vm1680_vm4, %v8855_v62, 0.0 }
0x16e8   : > { %4053 = vmax.xlane.f32.xlu0 %v4052_v35 }
0x16f8   : > { %4153 = vrot.lane.b32.xlu1 %v8770_v30, %s7755_s22 }
0x16fc   : > { %4149 = vrot.lane.b32.xlu1 %v8768_v53, %s7755_s22 }
0x16fe   : > { %4081 = vrot.lane.b32.xlu0 %v8781_v12, %s7754_s16 }
0x1702   : > { %4155 = vrot.lane.b32.xlu0 %v8779_v28, %s7755_s22 }
0x1706   : > { %4151 = vrot.lane.b32.xlu0 %v8790_v47, %s7755_s22 }
0x1771   : > { %v4060_v22 = vpop.xlane.xlu0 %4059 }
0x1772   : > { %v4063_v51 = vsub.f32 %v4051_v37, %v4060_v22 }
0x1774   : > { %v4068_v39 = vmul.f32 1.442695, %v4063_v51  ;;  %v4057_v38 = vpop.xlane.xlu1 %4056 }
0x1775   : > { %v4062_v42 = vsub.f32 %v4050_v14, %v4057_v38  ;;  %v4054_v33 = vpop.xlane.xlu0 %4053  ;;  %v3900_v14 = vsel %vm1680_vm4, %v8853_v24, 0.0 }
0x1776   : > { %v4061_v30 = vsub.f32 %v4049_v25, %v4054_v33  ;;  %7050 = vpow2.f32 %v4068_v39 }
0x1777   : > { %v4066_v43 = vmul.f32 1.442695, %v4062_v42 }
0x1778   : > { %v4064_v53 = vmul.f32 1.442695, %v4061_v30  ;;  %v4154_v28 = vpop.permute.xlu1 %4153 }
0x1779   : > { %7052 = vpow2.f32 %v4066_v43  ;;  %v4082_v48 = vpop.permute.xlu0 %4081  ;;  %v4164_v29 = vsel %vm1616_vm2, %v4154_v28, 0 }
0x177a   : > { %7054 = vpow2.f32 %v4064_v53  ;;  %6321 = vmatprep.subr.bf16.mxu1 %v4082_v48 }
0x177b   : > { %6322 = vmatpush3.bf16.msra.mxu1 %v4082_v48 }
0x177c   : > { %6323 = vmatprep.subr.bf16.mxu1 %v4093_v49  ;;  %v4150_v1 = vpop.permute.xlu1 %4149 }
0x177d   : > { %v4156_v7 = vpop.permute.xlu0 %4155 }
0x177e   : > { %v4167_v15 = vsel %vm1616_vm2, %v4156_v7, 0 }
0x177f   : > { %6324 = vmatpush3.bf16.msra.mxu1 %v4093_v49 }
0x1780   : > { %6399 = vmatprep.subr.msk.bf16.mxu1 %vm1616_vm2, %v4154_v28  ;;  %v7051_v47 = vpop.eup %7050 }
0x1781   : > { %v4080_v61 = vpack.c.bf16 %v7051_v47, %v7051_v47  ;;  %v4152_v16 = vpop.permute.xlu0 %4151 }
0x1783   : > { %v7053_v50 = vpop.eup %7052 }
0x1784   : > { %v7055_v57 = vpop.eup %7054 }
0x1785   : > { %v4079_v59 = vpack.c.bf16 %v7053_v50, %v7055_v57  ;;  %v4070_v35 = vsel %vm1680_vm4, %v7055_v57, 0.0 }
0x1787   : > { %6325 = vmatprep.mubr.msk.bf16.mxu1 %vm1680_vm4, %v4079_v59 }
0x1788   : > { %6326 = vmatmul.mubr.msk.bf16.vlgmr.msra.gmra.mrb[60].mxu1 %vm1680_vm4, %v4080_v61 }
0x1789   : > { %6330 = vmatpush3.bf16.xpose.msra.mxu1 %v4164_v29  ;;  %6333 = vmatprep.mubr.msk.bf16.mxu1 %vm1616_vm2, %v4150_v1  ;;  %v3736_v29 = vsel %vm1680_vm4, %v8811_v21, 0.0  ;;  %v3739_v1 = vsel %vm1687_vm3, %v8815_v52, 0.0 }
0x178a   : > { %6400 = vmatprep.subr.msk.bf16.mxu1 %vm1616_vm2, %v4156_v7 }
0x1791   : > { %6332 = vmatpush3.bf16.xpose.msra.mxu1 %v4167_v15 }
0x1798   : > { %6334 = vmatmul.mubr.msk.bf16.vlgmr.msra.gmra.mrb[64].mxu1 %vm1616_vm2, %v4152_v16 }
0x1799   : > { %4740 = vmatprep.mubr.bf16.mxu1 %v7752_v0 }
0x185b   : > { %v8897_v63 = vpop.f32.mrb[60].mxu1 }
0x185c   : > { %v8899_v17 = vpop.f32.mrb[61].mxu1 }
0x185d   : > { %v6328_v18 = vpop.f32.mrb[62].mxu1 }
0x185e   : > { %v8901_v19 = vpop.f32.mrb[63].mxu1 }
0x186b   : > { %v6335_v6 = vpop.f32.mrb[64].mxu1 }
0x186c   : > { %v4219_v10 = vmul.f32 0.17677669, %v6335_v6  ;;  %v4203_v58 = vpop.f32.mrb[65].mxu1 }
0x186d   : > { %v4217_v60 = vmul.f32 0.17677669, %v4203_v58  ;;  %v6336_v37 = vpop.f32.mrb[66].mxu1 }
0x186e   : > { %v4206_v2 = vpop.f32.mrb[67].mxu1  ;;  %v4226_v31 = vsel %vm1687_vm3, %v4219_v10, -inf }
0x186f   : > { %v4218_v25 = vmul.f32 0.17677669, %v4206_v2  ;;  %4227 = vmax.xlane.f32.xlu0 %v4226_v31  ;;  %v4220_v13 = vsel %vm1680_vm4, %v4217_v60, -inf }
0x1870   : > { %4221 = vmax.xlane.f32.xlu1 %v4220_v13 }
0x1871   : > { %v4223_v3 = vsel %vm1680_vm4, %v4218_v25, -inf }
0x1873   : > { %4224 = vmax.xlane.f32.xlu0 %v4223_v3 }
0x1881   : > { %4251 = vrot.lane.b32.xlu1 %v8788_v46, %s7755_s22  ;;  %v4076_v46 = vsel %vm1687_vm3, %v7051_v47, 0.0 }
0x1889   : > { %4249 = vrot.lane.b32.xlu0 %v8781_v12, %s7755_s22  ;;  %v4073_v12 = vsel %vm1680_vm4, %v7053_v50, 0.0 }
0x18a5   : > { %3901 = vadd.xlane.f32.xlu1 %v3900_v14 }
0x18a8   : > { %3904 = vadd.xlane.f32.xlu0 %v3903_v32 }
0x18a9   : > { %4071 = vadd.xlane.f32.xlu1 %v4070_v35  ;;  %v6823_v35 = vld [vmem:[#allocation16 + $0x48] sm:$0xff]  }
0x18ac   : > { %3907 = vadd.xlane.f32.xlu0 %v3906_v36  ;;  %v6825_v36 = vld [vmem:[#allocation16 + $0x58] sm:$0xff]  }
0x18ad   : > { %4077 = vadd.xlane.f32.xlu1 %v4076_v46 }
0x18b0   : > { %4074 = vadd.xlane.f32.xlu0 %v4073_v12 }
0x18fc   : > { %v4228_v22 = vpop.xlane.xlu0 %4227 }
0x18fd   : > { %v4231_v24 = vsub.f32 %v4219_v10, %v4228_v22  ;;  %v4222_v51 = vpop.xlane.xlu1 %4221  ;;  %v6828_v22 = vld [vmem:[#allocation16 + $0x70] sm:$0xff]  }
0x18fe   : > { %v4229_v39 = vsub.f32 %v4217_v60, %v4222_v51 }
0x18ff   : > { %v4236_v38 = vmul.f32 1.442695, %v4231_v24  ;;  %v6829_v24 = vld [vmem:[#allocation16 + $0x78] sm:$0xff]  }
0x1900   : > { %v4232_v62 = vmul.f32 1.442695, %v4229_v39  ;;  %v4225_v42 = vpop.xlane.xlu0 %4224 }
0x1901   : > { %v4230_v33 = vsub.f32 %v4218_v25, %v4225_v42  ;;  %v4252_v30 = vpop.permute.xlu1 %4251 }
0x1902   : > { %7056 = vpow2.f32 %v4232_v62  ;;  %v4261_v53 = vand.u32 %v4252_v30, %v8479_v44  ;;  %v3733_v44 = vsel %vm1680_vm4, %v8809_v5, 0.0 }
0x1903   : > { %v4234_v43 = vmul.f32 1.442695, %v4230_v33  ;;  %7058 = vpow2.f32 %v4236_v38 }
0x1904   : > { %v4250_v55 = vpop.permute.xlu0 %4249 }
0x1905   : > { %7060 = vpow2.f32 %v4234_v43  ;;  %6337 = vmatprep.subr.bf16.mxu0 %v4250_v55 }
0x1906   : > { %6338 = vmatpush3.bf16.msra.mxu0 %v4250_v55 }
0x1907   : > { %6339 = vmatprep.subr.bf16.mxu0 %v4261_v53 }
0x190a   : > { %6340 = vmatpush3.bf16.msra.mxu0 %v4261_v53 }
0x190c   : > { %v7057_v48 = vpop.eup %7056 }
0x190d   : > { %v4238_v49 = vsel %vm1680_vm4, %v7057_v48, 0.0  ;;  %v7059_v28 = vpop.eup %7058 }
0x190e   : > { %4239 = vadd.xlane.f32.xlu0 %v4238_v49  ;;  %v4244_v59 = vsel %vm1687_vm3, %v7059_v28, 0.0  ;;  %v4248_v61 = vpack.c.bf16 %v7059_v28, %v7059_v28 }
0x190f   : > { %v7061_v47 = vpop.eup %7060 }
0x1910   : > { %v4241_v50 = vsel %vm1680_vm4, %v7061_v47, 0.0  ;;  %v4247_v57 = vpack.c.bf16 %v7061_v47, %v7057_v48 }
0x1911   : > { %4242 = vadd.xlane.f32.xlu1 %v4241_v50 }
0x1912   : > { %4245 = vadd.xlane.f32.xlu0 %v4244_v59  ;;  %6341 = vmatprep.mubr.msk.bf16.mxu0 %vm1680_vm4, %v4247_v57 }
0x1913   : > { %6342 = vmatmul.mubr.msk.bf16.vlgmr.msra.gmra.mrb[56].mxu0 %vm1680_vm4, %v4248_v61 }
0x1915   : > { %3734 = vadd.xlane.f32.xlu1 %v3733_v44 }
0x1916   : > { %3737 = vadd.xlane.f32.xlu0 %v3736_v29 }
0x1919   : > { %3740 = vadd.xlane.f32.xlu1 %v3739_v1 }
0x1932   : > { %v3902_v7 = vpop.xlane.xlu1 %3901 }
0x1933   : > { %7062 = vrcp.f32 %v3902_v7 }
0x1935   : > { %v3905_v15 = vpop.xlane.xlu0 %3904 }
0x1936   : > { %7064 = vrcp.f32 %v3905_v15  ;;  %v4072_v16 = vpop.xlane.xlu1 %4071 }
0x1939   : > { %v3908_v18 = vpop.xlane.xlu0 %3907 }
0x193a   : > { %7066 = vrcp.f32 %v3908_v18  ;;  %v4078_v5 = vpop.xlane.xlu1 %4077 }
0x193b   : > { %7068 = vrcp.f32 %v4072_v16 }
0x193d   : > { %v4075_v6 = vpop.xlane.xlu0 %4074  ;;  %v7063_v10 = vpop.eup %7062 }
0x193e   : > { %7070 = vrcp.f32 %v4075_v6  ;;  %v3978_v21 = vmul.f32 %v7063_v10, %v8870_v56 }
0x193f   : > { %7072 = vrcp.f32 %v4078_v5 }
0x1940   : > { %v7065_v58 = vpop.eup %7064 }
0x1941   : > { %v3979_v60 = vmul.f32 %v7065_v58, %v8872_v23  ;;  %v6822_v23 = vld [vmem:[#allocation16 + $0x40] sm:$0xff]  }
0x1942   : > { %6345 = vmatprep.subr.bf16.mxu0 %v6822_v23 }
0x1943   : > { %v6640_v52 = vpack.i.bf16 %v3979_v60, %v3978_v21  ;;  %6346 = vmatpush3.bf16.msra.mxu0 %v6822_v23 }
0x1944   : > { %v7067_v37 = vpop.eup %7066  ;;  %6347 = vmatprep.subr.bf16.mxu0 %v6823_v35 }
0x1945   : > { %6641 = vrot.lane.b32.xlu0 %v6640_v52, %s7755_s22  ;;  %v3980_v2 = vmul.f32 %v7067_v37, %v8868_v45  ;;  %v7069_v31 = vpop.eup %7068  ;;  %v6824_v45 = vld [vmem:[#allocation16 + $0x50] sm:$0xff]  }
0x1946   : > { %v4146_v13 = vmul.f32 %v7069_v31, %v8899_v17  ;;  %v6826_v17 = vld [vmem:[#allocation16 + $0x60] sm:$0xff]  }
0x1947   : > { %4324 = vrot.lane.b32.xlu1 %v3980_v2, %s7755_s22  ;;  %6348 = vmatpush3.bf16.msra.mxu0 %v6823_v35  ;;  %s7624_s22 = scalar_lea.vmem %s9080_s2, 16 }
0x1948   : > { %v7071_v25 = vpop.eup %7070  ;;  %6349 = vmatprep.subr.bf16.mxu0 %v6824_v45  ;;  %p7625_p3 = scmp.ne.s32.totalorder %s9080_s2, %s7624_s22 }
0x1949   : > { %v4147_v3 = vmul.f32 %v7071_v25, %v8901_v19  ;;  %v7073_v32 = vpop.eup %7072  ;;  %v6827_v19 = vld [vmem:[#allocation16 + $0x68] sm:$0xff]  }
0x194a   : > { %v4148_v56 = vmul.f32 %v7073_v32, %v8897_v63  ;;  %p7626_p9 = pnand %p7625_p3, %p9252_p5 }
0x194b   : > { %v6645_v14 = vpack.i.bf16 %v4147_v3, %v4146_v13  ;;  %6350 = vmatpush3.bf16.msra.mxu0 %v6824_v45 }
0x194c   : > { %6351 = vmatprep.subr.bf16.mxu0 %v6825_v36  ;;  %p7627_p7 = pneg %p7626_p9 }
0x194d   : > { %6646 = vrot.lane.b32.xlu1 %v6645_v14, %s7754_s16 }
0x194f   : > { %6352 = vmatpush3.bf16.msra.mxu0 %v6825_v36 }
0x1950   : > { %6353 = vmatprep.subr.bf16.mxu0 %v6826_v17 }
0x1951   : > { %4336 = vrot.lane.b32.xlu1 %v4148_v56, %s7754_s16  ;;  %v5840_v56 = vld [vmem:[#allocation17 + $0x1] ss:$0 sm:$0xff]  ;;  %s932_s16 = scalar_select %p931_p11, %s9229_s26, 1 }
0x1952   : > { %s7758_s26 = smov [#allocation29]  }
0x1953   : > { %6354 = vmatpush3.bf16.msra.mxu0 %v6826_v17  ;;  %s933_s4 = scalar_lea.vmem %s9250_s24, %s932_s16  ;;  %s5346_s16 = scalar_lea.sflag [#allocation4], %s8350_s23 }
0x1954   : > { %6355 = vmatprep.subr.bf16.mxu0 %v6827_v19  ;;  %s7628_s3 = sshll.u32 %s7758_s26, 4  ;;  %s7629_s3 = int_to_ptr.vmem [resolvable:$false] %s7628_s3 }
0x1955   : > { %s7630_s24 = scalar_lea.vmem %s7629_s3, 32  ;;  %p7631_p4 = scmp.lt.s32.totalorder %s9080_s2, %s7629_s3 }
0x1956   : > { %p7632_p12 = scmp.lt.s32.totalorder %s7630_s24, %s7624_s22 }
0x1957   : > { %6356 = vmatpush3.bf16.msra.mxu0 %v6827_v19 }
0x1958   : > { %6357 = vmatprep.subr.bf16.mxu0 %v6828_v22  ;;  %p7633_p1 = por %p7632_p12, %p7631_p4 }
0x195a   : > { %p7634_p13 = pnand %p7633_p1, %p7627_p7 }
0x195b   : > { %6358 = vmatpush3.bf16.msra.mxu0 %v6828_v22 }
0x195c   : > { %6359 = vmatprep.subr.bf16.mxu0 %v6829_v24 }
0x195f   : > { %6360 = vmatpush3.bf16.msra.mxu0 %v6829_v24  ;;  %v6830_v24 = vld [vmem:[#allocation22 + $0x100] ss:$16 sps:$4 sm:$0xff]  }
0x199b   : > { %v4240_v63 = vpop.xlane.xlu0 %4239 }
0x199e   : > { %v4243_v12 = vpop.xlane.xlu1 %4242 }
0x199f   : > { %v4246_v46 = vpop.xlane.xlu0 %4245 }
0x19a0   : > { %7074 = vrcp.f32 %v4246_v46 }
0x19a1   : > { %7076 = vrcp.f32 %v4240_v63 }
0x19a2   : > { %7078 = vrcp.f32 %v4243_v12  ;;  %v3735_v49 = vpop.xlane.xlu1 %3734 }
0x19a3   : > { %v3738_v28 = vpop.xlane.xlu0 %3737 }
0x19a4   : > { %7080 = vrcp.f32 %v3738_v28 }
0x19a6   : > { %v3741_v47 = vpop.xlane.xlu1 %3740 }
0x19a7   : > { %7082 = vrcp.f32 %v3741_v47  ;;  %v6844_v47 = vld [vmem:[#allocation22 + $0x144] ss:$16 sps:$4 sm:$0xff]  }
0x19a8   : > { %7084 = vrcp.f32 %v3735_v49 }
0x19aa   : > { %v7075_v51 = vpop.eup %7074 }
0x19ab   : > { %v7077_v42 = vpop.eup %7076 }
0x19ac   : > { %v7079_v30 = vpop.eup %7078 }
0x19ae   : > { %v7081_v61 = vpop.eup %7080 }
0x19af   : > { %v3805_v16 = vmul.f32 %v7081_v61, %v8830_v26  ;;  %v6850_v61 = vld [vmem:[#allocation22 + $0x164] ss:$16 sps:$4 sm:$0xff]  }
0x19b1   : > { %v7083_v44 = vpop.eup %7082 }
0x19b2   : > { %v7085_v1 = vpop.eup %7084  ;;  %v3806_v18 = vmul.f32 %v7083_v44, %v8826_v41  ;;  %v6853_v44 = vld [vmem:[#allocation22 + $0x16c] ss:$16 sps:$4 sm:$0xff]  }
0x19b3   : > { %v3804_v5 = vmul.f32 %v7085_v1, %v8828_v40  ;;  %v6851_v1 = vld [vmem:[#allocation22 + $0x168] ss:$16 sps:$4 sm:$0xff]  }
0x19b7   : > { %v6642_v59 = vpop.permute.xlu0 %6641 }
0x19b8   : > { %v6644_v7 = vunpack.i.h.bf16 %v6642_v59  ;;  %v6643_v15 = vunpack.i.l.bf16 %v6642_v59  ;;  %v6845_v59 = vld [vmem:[#allocation22 + $0x148] ss:$16 sps:$4 sm:$0xff]  }
0x19b9   : > { %v4325_v50 = vpop.permute.xlu1 %4324 }
0x19ba   : > { %v4354_v21 = vsel %vm1616_vm2, %v3805_v16, %v6644_v7  ;;  %v4355_v60 = vsel %vm1616_vm2, %v3806_v18, %v4325_v50  ;;  %v4353_v37 = vsel %vm1616_vm2, %v3804_v5, %v6643_v15  ;;  %v6847_v50 = vld [vmem:[#allocation22 + $0x14c] ss:$16 sps:$4 sm:$0xff]   ;;  %v6856_v7 = vld [vmem:[#allocation22 + $0x184] ss:$16 sps:$4 sm:$0xff]   ;;  %v6854_v16 = vld [vmem:[#allocation22 + $0x180] ss:$16 sps:$4 sm:$0xff]  }
0x19bb   : > { %v6859_v15 = vld [vmem:[#allocation22 + $0x18c] ss:$16 sps:$4 sm:$0xff]   ;;  %v6857_v18 = vld [vmem:[#allocation22 + $0x188] ss:$16 sps:$4 sm:$0xff]   ;;  %v6860_v5 = vld [vmem:[#allocation22 + $0x1a0] ss:$16 sps:$4 sm:$0xff]  }
0x19bf   : > { %v6647_v57 = vpop.permute.xlu1 %6646 }
0x19c0   : > { %v6649_v6 = vunpack.i.h.bf16 %v6647_v57  ;;  %v6648_v10 = vunpack.i.l.bf16 %v6647_v57  ;;  %v6842_v57 = vld [vmem:[#allocation22 + $0x140] ss:$16 sps:$4 sm:$0xff]  }
0x19c2   : > { %v4356_v26 = vsel %vm1042_vm0, %v4353_v37, %v6648_v10  ;;  %v4357_v41 = vsel %vm1042_vm0, %v4354_v21, %v6649_v6  ;;  %v6862_v6 = vld [vmem:[#allocation22 + $0x1a4] ss:$16 sps:$4 sm:$0xff]   ;;  %v6865_v10 = vld [vmem:[#allocation22 + $0x1ac] ss:$16 sps:$4 sm:$0xff]   ;;  %v6869_v37 = vld [vmem:[#allocation22 + $0x1c8] ss:$16 sps:$4 sm:$0xff]  }
0x19c3   : > { %v4337_v29 = vpop.permute.xlu1 %4336  ;;  %v6868_v21 = vld [vmem:[#allocation22 + $0x1c4] ss:$16 sps:$4 sm:$0xff]  }
0x19c4   : > { %v4358_v2 = vsel %vm1042_vm0, %v4355_v60, %v4337_v29  ;;  %v6848_v29 = vld [vmem:[#allocation22 + $0x160] ss:$16 sps:$4 sm:$0xff]   ;;  %v6871_v60 = vld [vmem:[#allocation22 + $0x1cc] ss:$16 sps:$4 sm:$0xff]  }
0x19e6   : > { %v6343_v39 = vpop.f32.mrb[56].mxu0 }
0x19e7   : > { %v4316_v38 = vmul.f32 %v7075_v51, %v6343_v39  ;;  %v4297_v62 = vpop.f32.mrb[57].mxu0  ;;  %v6832_v51 = vld [vmem:[#allocation22 + $0x104] ss:$16 sps:$4 sm:$0xff]   ;;  %v6833_v39 = vld [vmem:[#allocation22 + $0x108] ss:$16 sps:$4 sm:$0xff]  }
0x19e8   : > { %v6344_v33 = vpop.f32.mrb[58].mxu0  ;;  %v4314_v55 = vmul.f32 %v7077_v42, %v4297_v62  ;;  %4708 = vmatprep.subr.bf16.mxu1 %v6832_v51  ;;  %v6841_v62 = vld [vmem:[#allocation22 + $0x12c] ss:$16 sps:$4 sm:$0xff]   ;;  %v6839_v42 = vld [vmem:[#allocation22 + $0x128] ss:$16 sps:$4 sm:$0xff]  }
0x19e9   : > { %v4300_v43 = vpop.f32.mrb[59].mxu0  ;;  %4348 = vrot.lane.b32.xlu1 %v4316_v38, %s7753_s13  ;;  %v6835_v38 = vld [vmem:[#allocation22 + $0x10c] ss:$16 sps:$4 sm:$0xff]   ;;  %4709 = vmatpush1.bf16.msra.mxu1 %v6830_v24 }
0x19ea   : > { %v4315_v53 = vmul.f32 %v7079_v30, %v4300_v43  ;;  %4759 = vmatprep.subr.bf16.mxu0 %v6835_v38 }
0x19ec   : > { %v6650_v48 = vpack.i.bf16 %v4315_v53, %v4314_v55 }
0x19ee   : > { %6651 = vrot.lane.b32.xlu0 %v6650_v48, %s7753_s13  ;;  %s9078_s13 = scalar_lea.hbm %s9251_s18, %s5928_s1 }
0x1a5b   : > { %v4349_v58 = vpop.permute.xlu1 %4348 }
0x1a5c   : > { %v4361_v13 = vsel %vm2328_vm5, %v4358_v2, %v4349_v58  ;;  %v6863_v58 = vld [vmem:[#allocation22 + $0x1a8] ss:$16 sps:$4 sm:$0xff]   ;;  %v6874_v2 = vld [vmem:[#allocation22 + $0x1e4] ss:$16 sps:$4 sm:$0xff]  }
0x1a5d   : > { %v4363_v32 = vpack.c.bf16 %v4361_v13, %v4361_v13 }
0x1a60   : > { %v6652_v52 = vpop.permute.xlu0 %6651 }
0x1a61   : > { %v6654_v31 = vunpack.i.h.bf16 %v6652_v52  ;;  %v6653_v25 = vunpack.i.l.bf16 %v6652_v52  ;;  %v6866_v52 = vld [vmem:[#allocation22 + $0x1c0] ss:$16 sps:$4 sm:$0xff]  }
0x1a63   : > { %v4359_v40 = vsel %vm2328_vm5, %v4356_v26, %v6653_v25  ;;  %v4360_v3 = vsel %vm2328_vm5, %v4357_v41, %v6654_v31  ;;  %v6872_v31 = vld [vmem:[#allocation22 + $0x1e0] ss:$16 sps:$4 sm:$0xff]   ;;  %v6875_v25 = vld [vmem:[#allocation22 + $0x1e8] ss:$16 sps:$4 sm:$0xff]   ;;  %v6877_v26 = vld [vmem:[#allocation22 + $0x1ec] ss:$16 sps:$4 sm:$0xff]  }
0x1a64   : > { %v4362_v14 = vpack.c.bf16 %v4360_v3, %v4359_v40 }
0x1a66   : > { %6361 = vmatprep.mubr.bf16.mxu0 %v4362_v14 }
0x1a67   : > { %6362 = vmatmul.mubr.bf16.vlgmr.msra.gmra.mrb[60].mxu0 %v4363_v32 }
0x1a68   : > { %4791 = vmatprep.mubr.bf16.mxu0 %v7752_v0  ;;  %4760 = vmatpush1.bf16.msra.mxu0 %v6833_v39  ;;  %v8986_v39 = vld [vmem:[#allocation20 + $0x1] ss:$0 sm:$0xff] }
0x1a69   : > { %4761 = vmatprep.subr.bf16.mxu0 %v6841_v62 }
0x1a6c   : > { %4762 = vmatpush1.bf16.msra.mxu0 %v6839_v42  ;;  %v6879_v42 = vld [vmem:[#allocation23 + $0x1c0] sm:$0xff]  }
0x1a6d   : > { %4763 = vmatprep.subr.bf16.mxu0 %v6847_v50  ;;  %v6891_v50 = vld [vmem:[#allocation23 + $0x1d8] sm:$0xff]  }
0x1a70   : > { %4764 = vmatpush1.bf16.msra.mxu0 %v6845_v59  ;;  %v6893_v59 = vld [vmem:[#allocation23 + $0x198] sm:$0xff]  }
0x1a71   : > { %4765 = vmatprep.subr.bf16.mxu0 %v6853_v44  ;;  %v6895_v44 = vld [vmem:[#allocation23 + $0x1e0] sm:$0xff]  }
0x1a74   : > { %4766 = vmatpush1.bf16.msra.mxu0 %v6851_v1  ;;  %v6897_v1 = vld [vmem:[#allocation23 + $0x1a0] sm:$0xff]  }
0x1a75   : > { %4767 = vmatprep.subr.bf16.mxu0 %v6859_v15  ;;  %v6899_v15 = vld [vmem:[#allocation23 + $0x1e8] sm:$0xff]  }
0x1a78   : > { %4768 = vmatpush1.bf16.msra.mxu0 %v6857_v18  ;;  %v6901_v18 = vld [vmem:[#allocation23 + $0x1a8] sm:$0xff]  }
0x1a79   : > { %4769 = vmatprep.subr.bf16.mxu0 %v6865_v10  ;;  %v6903_v10 = vld [vmem:[#allocation23 + $0x1f0] sm:$0xff]  }
0x1a7c   : > { %4770 = vmatpush1.bf16.msra.mxu0 %v6863_v58  ;;  %v6905_v58 = vld [vmem:[#allocation23 + $0x1b0] sm:$0xff]  }
0x1a7d   : > { %4771 = vmatprep.subr.bf16.mxu0 %v6871_v60  ;;  %v6907_v60 = vld [vmem:[#allocation23 + $0x1f8] sm:$0xff]  }
0x1a80   : > { %4772 = vmatpush1.bf16.msra.mxu0 %v6869_v37  ;;  %v6909_v37 = vld [vmem:[#allocation23 + $0x1b8] sm:$0xff]  }
0x1a81   : > { %4773 = vmatprep.subr.bf16.mxu0 %v6877_v26 }
0x1a84   : > { %4774 = vmatpush1.bf16.msra.mxu0 %v6875_v25 }
0x1a85   : > { %6120 = vmatprep.subr.bf16.mxu0 %v6879_v42 }
0x1b3a   : > { %v6363_v23 = vpop.f32.mrb[60].mxu0 }
0x1b3b   : > { %v4462_v35 = vadd.f32 %v6363_v23, %v8739_v4  ;;  %v4446_v45 = vpop.f32.mrb[61].mxu0  ;;  %v6838_v4 = vld [vmem:[#allocation22 + $0x124] ss:$16 sps:$4 sm:$0xff]  }
0x1b3c   : > { %v4460_v36 = vadd.f32 %v4446_v45, %v8732_v54  ;;  %v6364_v17 = vpop.f32.mrb[62].mxu0  ;;  %v6836_v54 = vld [vmem:[#allocation22 + $0x120] ss:$16 sps:$4 sm:$0xff]   ;;  %4710 = vmatprep.subr.bf16.mxu1 %v6838_v4 }
0x1b3d   : > { %v8958_v19 = vadd.f32 %v5840_v56, %v4462_v35  ;;  %v4449_v63 = vpop.f32.mrb[63].mxu0  ;;  %4711 = vmatpush1.bf16.msra.mxu1 %v6836_v54  ;;  %v6878_v54 = vld [vmem:[#allocation23 + $0x140] sm:$0xff]  }
0x1b3e   : > { %v8960_v46 = vadd.f32 %v5840_v56, %v4460_v36  ;;  %v4461_v12 = vadd.f32 %v4449_v63, %v8735_v27  ;;  %4712 = vmatprep.subr.bf16.mxu1 %v6844_v47  ;;  %v6890_v47 = vld [vmem:[#allocation23 + $0x158] sm:$0xff]  }
0x1b3f   : > { %v4476_v28 = vsel %vm1090_vm1, %v8958_v19, 0.0 }
0x1b40   : > { %v4470_v22 = vadd.f32 %v5840_v56, %v4461_v12  ;;  %4472 = vadd.xlane.f32.xlu0 %v8960_v46  ;;  %v8982_v12 = vld [vmem:[#allocation19 + $0x1] ss:$0 sm:$0xff] }
0x1b41   : > { %4713 = vmatpush1.bf16.msra.mxu1 %v6842_v57  ;;  %v6892_v57 = vld [vmem:[#allocation23 + $0x118] sm:$0xff]  }
0x1b42   : > { %4474 = vadd.xlane.f32.xlu1 %v4470_v22  ;;  %4714 = vmatprep.subr.bf16.mxu1 %v6850_v61  ;;  %v6894_v61 = vld [vmem:[#allocation23 + $0x160] sm:$0xff]  }
0x1b45   : > { %4715 = vmatpush1.bf16.msra.mxu1 %v6848_v29  ;;  %v6896_v29 = vld [vmem:[#allocation23 + $0x120] sm:$0xff]  }
0x1b46   : > { %4716 = vmatprep.subr.bf16.mxu1 %v6856_v7  ;;  %v6898_v7 = vld [vmem:[#allocation23 + $0x168] sm:$0xff]  }
0x1b49   : > { %4717 = vmatpush1.bf16.msra.mxu1 %v6854_v16  ;;  %v6900_v16 = vld [vmem:[#allocation23 + $0x128] sm:$0xff]  }
0x1b4a   : > { %4718 = vmatprep.subr.bf16.mxu1 %v6862_v6  ;;  %v6902_v6 = vld [vmem:[#allocation23 + $0x170] sm:$0xff]  }
0x1b4d   : > { %4719 = vmatpush1.bf16.msra.mxu1 %v6860_v5  ;;  %v6904_v5 = vld [vmem:[#allocation23 + $0x130] sm:$0xff]  }
0x1b4e   : > { %4720 = vmatprep.subr.bf16.mxu1 %v6868_v21  ;;  %v6906_v21 = vld [vmem:[#allocation23 + $0x178] sm:$0xff]  }
0x1b51   : > { %4721 = vmatpush1.bf16.msra.mxu1 %v6866_v52  ;;  %v6908_v52 = vld [vmem:[#allocation23 + $0x138] sm:$0xff]  }
0x1b52   : > { %4722 = vmatprep.subr.bf16.mxu1 %v6874_v2 }
0x1b55   : > { %4723 = vmatpush1.bf16.msra.mxu1 %v6872_v31 }
0x1b56   : > { %6092 = vmatprep.subr.bf16.mxu1 %v6878_v54 }
0x1bcd   : > { %v4473_v27 = vpop.xlane.xlu0 %4472 }
0x1bce   : > { %v4479_v33 = vmul.f32 0.0078125, %v4473_v27  ;;  %v6880_v27 = vld [vmem:[#allocation23 + $0x100] sm:$0xff]  }
0x1bcf   : > { %v4475_v30 = vpop.xlane.xlu1 %4474 }
0x1bd0   : > { %v8965_v43 = vsub.f32 %v8960_v46, %v4479_v33  ;;  %v4480_v55 = vmul.f32 0.0078125, %v4475_v30  ;;  %v6881_v33 = vld [vmem:[#allocation23 + $0x180] sm:$0xff]   ;;  %v6882_v30 = vld [vmem:[#allocation23 + $0x148] sm:$0xff]  }
0x1bd2   : > { %v8967_v53 = vsub.f32 %v4470_v22, %v4480_v55  ;;  %v4485_v48 = vmul.f32 %v8965_v43, %v8965_v43  ;;  %v6884_v55 = vld [vmem:[#allocation23 + $0x108] sm:$0xff]  }
0x1bd4   : > { %4488 = vadd.xlane.f32.xlu0 %v4485_v48  ;;  %v4486_v49 = vmul.f32 %v8967_v53, %v8967_v53  ;;  %v6886_v48 = vld [vmem:[#allocation23 + $0x150] sm:$0xff]  }
0x1bd8   : > { %4490 = vadd.xlane.f32.xlu0 %v4486_v49  ;;  %v6887_v49 = vld [vmem:[#allocation23 + $0x1d0] sm:$0xff]  }
0x1bdc   : > { %4477 = vadd.xlane.f32.xlu0 %v4476_v28  ;;  %v6888_v28 = vld [vmem:[#allocation23 + $0x110] sm:$0xff]  }
0x1c61   : > { %v4489_v41 = vpop.xlane.xlu0 %4488 }
0x1c62   : > { %v4495_v13 = vmul.f32 0.0078125, %v4489_v41 }
0x1c64   : > { %v4498_v40 = vadd.f32 1e-05, %v4495_v13 }
0x1c65   : > { %v4491_v3 = vpop.xlane.xlu0 %4490 }
0x1c66   : > { %7086 = vrsqrt.f32 %v4498_v40  ;;  %v4496_v14 = vmul.f32 0.0078125, %v4491_v3 }
0x1c68   : > { %v4499_v32 = vadd.f32 1e-05, %v4496_v14  ;;  %v5789_v14 = vld [vmem:[%s9248_s5 + $0x4] sm:$0xf] }
0x1c69   : > { %v4478_v56 = vpop.xlane.xlu0 %4477 }
0x1c6a   : > { %7088 = vrsqrt.f32 %v4499_v32  ;;  %v4481_v23 = vmul.f32 0.0078125, %v4478_v56  ;;  %v9000_v32 = vrot.slane %v5789_v14, %v8436_v9  ;;  %v9003_v56 = vrot.slane %v5789_v14, %v8472_v34 }
0x1c6c   : > { %v8976_v35 = vsub.f32 %v8958_v19, %v4481_v23  ;;  %v9006_v23 = vrot.slane %v5789_v14, %v8439_v11 }
0x1c6e   : > { %v4487_v45 = vmul.f32 %v8976_v35, %v8976_v35 }
0x1c70   : > { %v7087_v36 = vpop.eup %7086  ;;  %v4492_v17 = vsel %vm1090_vm1, %v4487_v45, 0.0 }
0x1c71   : > { %v4504_v63 = vmul.f32 %v7087_v36, %v8965_v43  ;;  %4493 = vadd.xlane.f32.xlu1 %v4492_v17  ;;  %v6883_v43 = vld [vmem:[#allocation23 + $0x1c8] sm:$0xff]  }
0x1c73   : > { %v4513_v51 = vmul.f32 %v8982_v12, %v4504_v63 }
0x1c74   : > { %v7089_v22 = vpop.eup %7088 }
0x1c75   : > { %v4505_v24 = vmul.f32 %v7089_v22, %v8967_v53  ;;  %v4522_v38 = vadd.f32 %v8986_v39, %v4513_v51  ;;  %v6885_v53 = vld [vmem:[#allocation23 + $0x188] sm:$0xff]  }
0x1c77   : > { %v4514_v19 = vmul.f32 %v8982_v12, %v4505_v24 }
0x1c79   : > { %v4523_v4 = vadd.f32 %v8986_v39, %v4514_v19 }
0x1c7b   : > { %v4525_v62 = vpack.c.bf16 %v4523_v4, %v4522_v38 }
0x1c7d   : > { %4741 = vmatmul.mubr.bf16.vlgmr.msra.gmra.mrb[68].mxu1 %v4525_v62  ;;  %4792 = vmatmul.mubr.bf16.vlgmr.msra.gmra.mrb[64].mxu0 %v4525_v62 }
0x1c7e   : > { %4750 = vmatprep.mubr.bf16.mxu1 %v7752_v0  ;;  %4801 = vmatprep.mubr.bf16.mxu0 %v7752_v0  ;;  %v6889_v0 = vld [vmem:[#allocation23 + $0x190] sm:$0xff]  }
0x1c7f   : > { %6093 = vmatpush3.bf16.msra.mxu1 %v6880_v27  ;;  %6121 = vmatpush3.bf16.msra.mxu0 %v6881_v33 }
0x1c80   : > { %6094 = vmatprep.subr.bf16.mxu1 %v6882_v30  ;;  %6122 = vmatprep.subr.bf16.mxu0 %v6883_v43 }
0x1c83   : > { %6095 = vmatpush3.bf16.msra.mxu1 %v6884_v55  ;;  %6123 = vmatpush3.bf16.msra.mxu0 %v6885_v53 }
0x1c84   : > { %6096 = vmatprep.subr.bf16.mxu1 %v6886_v48  ;;  %6124 = vmatprep.subr.bf16.mxu0 %v6887_v49 }
0x1c87   : > { %6097 = vmatpush3.bf16.msra.mxu1 %v6888_v28  ;;  %6125 = vmatpush3.bf16.msra.mxu0 %v6889_v0 }
0x1c88   : > { %6098 = vmatprep.subr.bf16.mxu1 %v6890_v47  ;;  %6126 = vmatprep.subr.bf16.mxu0 %v6891_v50 }
0x1c8b   : > { %6099 = vmatpush3.bf16.msra.mxu1 %v6892_v57  ;;  %6127 = vmatpush3.bf16.msra.mxu0 %v6893_v59 }
0x1c8c   : > { %6100 = vmatprep.subr.bf16.mxu1 %v6894_v61  ;;  %6128 = vmatprep.subr.bf16.mxu0 %v6895_v44 }
0x1c8f   : > { %6101 = vmatpush3.bf16.msra.mxu1 %v6896_v29  ;;  %6129 = vmatpush3.bf16.msra.mxu0 %v6897_v1 }
0x1c90   : > { %6102 = vmatprep.subr.bf16.mxu1 %v6898_v7  ;;  %6130 = vmatprep.subr.bf16.mxu0 %v6899_v15 }
0x1c93   : > { %6103 = vmatpush3.bf16.msra.mxu1 %v6900_v16  ;;  %6131 = vmatpush3.bf16.msra.mxu0 %v6901_v18 }
0x1c94   : > { %6104 = vmatprep.subr.bf16.mxu1 %v6902_v6  ;;  %6132 = vmatprep.subr.bf16.mxu0 %v6903_v10 }
0x1c97   : > { %6105 = vmatpush3.bf16.msra.mxu1 %v6904_v5  ;;  %6133 = vmatpush3.bf16.msra.mxu0 %v6905_v58 }
0x1c98   : > { %6106 = vmatprep.subr.bf16.mxu1 %v6906_v21  ;;  %6134 = vmatprep.subr.bf16.mxu0 %v6907_v60 }
0x1c9b   : > { %6107 = vmatpush3.bf16.msra.mxu1 %v6908_v52  ;;  %6135 = vmatpush3.bf16.msra.mxu0 %v6909_v37 }
0x1cfe   : > { %v4494_v2 = vpop.xlane.xlu1 %4493 }
0x1cff   : > { %v4497_v31 = vmul.f32 0.0078125, %v4494_v2 }
0x1d01   : > { %v4500_v25 = vadd.f32 1e-05, %v4497_v31 }
0x1d03   : > { %7090 = vrsqrt.f32 %v4500_v25 }
0x1d0d   : > { %v7091_v26 = vpop.eup %7090 }
0x1d0e   : > { %v4506_v41 = vmul.f32 %v7091_v26, %v8976_v35  ;;  %v9010_v35 = vrot.slane %v5789_v14, %v2512_v20 }
0x1d10   : > { %v4515_v13 = vmul.f32 %v8982_v12, %v4506_v41 }
0x1d12   : > { %v4524_v40 = vadd.f32 %v8986_v39, %v4515_v13 }
0x1d14   : > { %v4526_v3 = vpack.c.bf16 %v4524_v40, %v4524_v40 }
0x1d16   : > { %4751 = vmatmul.mubr.bf16.gmra.mrb[72].mxu1 %v4526_v3  ;;  %4802 = vmatmul.mubr.bf16.gmra.mrb[68].mxu0 %v4526_v3 }
0x1d50   : > { %v4742_v45 = vpop.f32.mrb[68].mxu1  ;;  %v4793_v36 = vpop.f32.mrb[64].mxu0 }
0x1d51   : > { %v9013_v17 = vadd.f32 %v4742_v45, %v9000_v32  ;;  %v9016_v63 = vadd.f32 %v4793_v36, %v9003_v56  ;;  %v4744_v9 = vpop.f32.mrb[69].mxu1  ;;  %v4795_v12 = vpop.f32.mrb[65].mxu0 }
0x1d52   : > { %v9019_v34 = vadd.f32 %v4744_v9, %v9006_v23  ;;  %v9022_v11 = vadd.f32 %v4795_v12, %v9010_v35  ;;  %v4746_v22 = vpop.f32.mrb[70].mxu1  ;;  %v4797_v8 = vpop.f32.mrb[66].mxu0 }
0x1d53   : > { %v5875_v20 = vmul.f32 -1.702, %v9013_v17  ;;  %v5877_v24 = vmul.f32 -1.702, %v9016_v63  ;;  %v4747_v51 = vadd.f32 %v4746_v22, %v9000_v32  ;;  %v4798_v39 = vadd.f32 %v4797_v8, %v9003_v56  ;;  %v4748_v19 = vpop.f32.mrb[71].mxu1  ;;  %v4799_v38 = vpop.f32.mrb[67].mxu0 }
0x1d54   : > { %v5876_v4 = vmul.f32 -1.702, %v9019_v34  ;;  %v5878_v62 = vmul.f32 -1.702, %v9022_v11  ;;  %v4749_v54 = vadd.f32 %v4748_v19, %v9006_v23  ;;  %v4800_v42 = vadd.f32 %v4799_v38, %v9010_v35 }
0x1d55   : > { %v4834_v27 = vmul.f32 1.442695, %v5875_v20  ;;  %v4838_v33 = vmul.f32 1.442695, %v5877_v24  ;;  %v5879_v30 = vmul.f32 -1.702, %v4747_v51 }
0x1d56   : > { %v4836_v43 = vmul.f32 1.442695, %v5876_v4  ;;  %v4840_v55 = vmul.f32 1.442695, %v5878_v62  ;;  %v5881_v53 = vmul.f32 -1.702, %v4798_v39 }
0x1d57   : > { %7092 = vpow2.f32 %v4834_v27  ;;  %v4842_v48 = vmul.f32 1.442695, %v5879_v30  ;;  %v5880_v49 = vmul.f32 -1.702, %v4749_v54  ;;  %v5882_v28 = vmul.f32 -1.702, %v4800_v42 }
0x1d58   : > { %7094 = vpow2.f32 %v4838_v33  ;;  %v4846_v0 = vmul.f32 1.442695, %v5881_v53 }
0x1d59   : > { %7096 = vpow2.f32 %v4836_v43  ;;  %v4844_v47 = vmul.f32 1.442695, %v5880_v49  ;;  %v4848_v50 = vmul.f32 1.442695, %v5882_v28 }
0x1d5a   : > { %7098 = vpow2.f32 %v4840_v55 }
0x1d5b   : > { %7100 = vpow2.f32 %v4842_v48 }
0x1d5c   : > { %7102 = vpow2.f32 %v4846_v0 }
0x1d5d   : > { %7104 = vpow2.f32 %v4844_v47 }
0x1d5e   : > { %7106 = vpow2.f32 %v4848_v50 }
0x1d61   : > { %v7093_v57 = vpop.eup %7092 }
0x1d62   : > { %v7095_v59 = vpop.eup %7094  ;;  %v4858_v61 = vadd.f32 1.0, %v7093_v57 }
0x1d63   : > { %v7097_v44 = vpop.eup %7096  ;;  %v4860_v29 = vadd.f32 1.0, %v7095_v59 }
0x1d64   : > { %v7099_v1 = vpop.eup %7098  ;;  %7108 = vrcp.f32 %v4858_v61  ;;  %v4859_v7 = vadd.f32 1.0, %v7097_v44 }
0x1d65   : > { %v7101_v15 = vpop.eup %7100  ;;  %7110 = vrcp.f32 %v4860_v29  ;;  %v4861_v16 = vadd.f32 1.0, %v7099_v1 }
0x1d66   : > { %v7103_v18 = vpop.eup %7102  ;;  %7112 = vrcp.f32 %v4859_v7  ;;  %v4862_v6 = vadd.f32 1.0, %v7101_v15 }
0x1d67   : > { %v7105_v10 = vpop.eup %7104  ;;  %7114 = vrcp.f32 %v4861_v16  ;;  %v4864_v5 = vadd.f32 1.0, %v7103_v18 }
0x1d68   : > { %v7107_v58 = vpop.eup %7106  ;;  %7116 = vrcp.f32 %v4862_v6  ;;  %v4863_v21 = vadd.f32 1.0, %v7105_v10 }
0x1d69   : > { %7118 = vrcp.f32 %v4864_v5  ;;  %v4865_v60 = vadd.f32 1.0, %v7107_v58 }
0x1d6a   : > { %7120 = vrcp.f32 %v4863_v21 }
0x1d6b   : > { %7122 = vrcp.f32 %v4865_v60 }
0x1d6e   : > { %v7109_v52 = vpop.eup %7108 }
0x1d6f   : > { %v7111_v37 = vpop.eup %7110  ;;  %v4894_v41 = vmul.f32 %v7109_v52, %v9013_v17 }
0x1d70   : > { %v7113_v2 = vpop.eup %7112  ;;  %v4896_v3 = vmul.f32 %v7111_v37, %v9016_v63 }
0x1d71   : > { %v7115_v31 = vpop.eup %7114  ;;  %v4895_v36 = vmul.f32 %v7113_v2, %v9019_v34 }
0x1d72   : > { %v7117_v25 = vpop.eup %7116  ;;  %v4897_v22 = vmul.f32 %v7115_v31, %v9022_v11 }
0x1d73   : > { %v7119_v26 = vpop.eup %7118  ;;  %v4898_v13 = vmul.f32 %v7117_v25, %v4747_v51 }
0x1d74   : > { %v7121_v40 = vpop.eup %7120  ;;  %v4900_v14 = vmul.f32 %v7119_v26, %v4798_v39 }
0x1d75   : > { %v7123_v45 = vpop.eup %7122  ;;  %v4906_v9 = vpack.c.bf16 %v4898_v13, %v4894_v41  ;;  %v4899_v12 = vmul.f32 %v7121_v40, %v4749_v54  ;;  %v5919_v40 = vld [vmem:[#allocation25 + $0x1] ss:$0 sm:$0xff] }
0x1d76   : > { %v4908_v8 = vpack.c.bf16 %v4900_v14, %v4896_v3  ;;  %v4901_v20 = vmul.f32 %v7123_v45, %v4800_v42 }
0x1d77   : > { %v4907_v24 = vpack.c.bf16 %v4899_v12, %v4895_v36  ;;  %v6910_v36 = vld [vmem:[%s9249_s21] sm:$0xff]   ;;  %v6911_v12 = vld [vmem:[%s9249_s21 + $0x8] sm:$0xff]  }
0x1d78   : > { %v4909_v19 = vpack.c.bf16 %v4901_v20, %v4897_v22 }
0x1d79   : > { %5138 = vmatprep.mubr.bf16.mxu1 %v4907_v24 }
0x1d7a   : > { %5184 = vmatprep.mubr.bf16.mxu0 %v4909_v19  ;;  %5139 = vmatmul.mubr.bf16.vlgmr.msra.gmra.mrb[76].mxu1 %v4906_v9  ;;  %v7756_v9 = vmov 0.0  }
0x1d7b   : > { %5185 = vmatmul.mubr.bf16.vlgmr.msra.gmra.mrb[72].mxu0 %v4908_v8  ;;  %6365 = vmatprep.subr.bf16.mxu1 %v7756_v9 }
0x1d7c   : > { %6366 = vmatpush3.bf16.msra.mxu1 %v6910_v36 }
0x1d7d   : > { %6367 = vmatprep.subr.bf16.mxu1 %v7756_v9 }
0x1d80   : > { %6368 = vmatpush3.bf16.msra.mxu1 %v6911_v12 }
0x1d81   : > { %6369 = vmatprep.subr.bf16.mxu1 %v7756_v9 }
0x1de9   : > { %v4752_v17 = vpop.f32.mrb[72].mxu1  ;;  %v4803_v51 = vpop.f32.mrb[68].mxu0 }
0x1dea   : > { %v4753_v63 = vadd.f32 %v4752_v17, %v9000_v32  ;;  %v4804_v39 = vadd.f32 %v4803_v51, %v9003_v56  ;;  %v4754_v38 = vpop.f32.mrb[73].mxu1  ;;  %v4805_v34 = vpop.f32.mrb[69].mxu0 }
0x1deb   : > { %v4755_v4 = vadd.f32 %v4754_v38, %v9006_v23  ;;  %v4806_v11 = vadd.f32 %v4805_v34, %v9010_v35  ;;  %v4756_v62 = vpop.f32.mrb[74].mxu1  ;;  %v4807_v54 = vpop.f32.mrb[70].mxu0 }
0x1dec   : > { %v5883_v42 = vmul.f32 -1.702, %v4753_v63  ;;  %v5885_v27 = vmul.f32 -1.702, %v4804_v39  ;;  %v4757_v33 = vpop.f32.mrb[75].mxu1  ;;  %v4808_v30 = vpop.f32.mrb[71].mxu0 }
0x1ded   : > { %v5884_v43 = vmul.f32 -1.702, %v4755_v4  ;;  %v5886_v55 = vmul.f32 -1.702, %v4806_v11  ;;  %v6913_v62 = vld [vmem:[%s9249_s21 + $0x18] sm:$0xff]   ;;  %v6914_v54 = vld [vmem:[%s9249_s21 + $0x20] sm:$0xff]  }
0x1dee   : > { %v4850_v53 = vmul.f32 1.442695, %v5883_v42  ;;  %v4854_v48 = vmul.f32 1.442695, %v5885_v27  ;;  %v6915_v42 = vld [vmem:[%s9249_s21 + $0x28] sm:$0xff]   ;;  %v6916_v27 = vld [vmem:[%s9249_s21 + $0x30] sm:$0xff]  }
0x1def   : > { %v4852_v49 = vmul.f32 1.442695, %v5884_v43  ;;  %v4856_v32 = vmul.f32 1.442695, %v5886_v55  ;;  %v6917_v33 = vld [vmem:[%s9249_s21 + $0x38] sm:$0xff]  }
0x1df0   : > { %7124 = vpow2.f32 %v4850_v53 }
0x1df1   : > { %7126 = vpow2.f32 %v4854_v48  ;;  %v5206_v48 = vld [vmem:[#allocation26] sm:$0x1] }
0x1df2   : > { %7128 = vpow2.f32 %v4852_v49 }
0x1df3   : > { %7130 = vpow2.f32 %v4856_v32  ;;  %v5207_v32 = vld [vmem:[#allocation28] sm:$0x1] }
0x1dfa   : > { %v7125_v56 = vpop.eup %7124 }
0x1dfb   : > { %v7127_v23 = vpop.eup %7126  ;;  %v4866_v28 = vadd.f32 1.0, %v7125_v56 }
0x1dfc   : > { %v7129_v35 = vpop.eup %7128  ;;  %v4868_v0 = vadd.f32 1.0, %v7127_v23 }
0x1dfd   : > { %v7131_v47 = vpop.eup %7130  ;;  %7132 = vrcp.f32 %v4866_v28  ;;  %v4867_v50 = vadd.f32 1.0, %v7129_v35 }
0x1dfe   : > { %7134 = vrcp.f32 %v4868_v0  ;;  %v4869_v57 = vadd.f32 1.0, %v7131_v47 }
0x1dff   : > { %7136 = vrcp.f32 %v4867_v50 }
0x1e00   : > { %7138 = vrcp.f32 %v4869_v57 }
0x1e07   : > { %v7133_v59 = vpop.eup %7132 }
0x1e08   : > { %v7135_v61 = vpop.eup %7134  ;;  %v4902_v29 = vmul.f32 %v7133_v59, %v4753_v63 }
0x1e09   : > { %v7137_v44 = vpop.eup %7136  ;;  %v4904_v7 = vmul.f32 %v7135_v61, %v4804_v39 }
0x1e0a   : > { %v7139_v1 = vpop.eup %7138  ;;  %v4903_v15 = vmul.f32 %v7137_v44, %v4755_v4  ;;  %v4910_v6 = vpack.c.bf16 %v4902_v29, %v4902_v29 }
0x1e0b   : > { %v4905_v16 = vmul.f32 %v7139_v1, %v4806_v11  ;;  %v4912_v5 = vpack.c.bf16 %v4904_v7, %v4904_v7  ;;  %v6912_v11 = vld [vmem:[%s9249_s21 + $0x10] sm:$0xff]  }
0x1e0c   : > { %v4911_v18 = vpack.c.bf16 %v4903_v15, %v4903_v15  ;;  %6370 = vmatpush3.bf16.msra.mxu1 %v6912_v11 }
0x1e0d   : > { %v4913_v10 = vpack.c.bf16 %v4905_v16, %v4905_v16  ;;  %6371 = vmatprep.subr.bf16.mxu1 %v7756_v9 }
0x1e0e   : > { %5145 = vmatprep.mubr.bf16.mxu1 %v4911_v18 }
0x1e0f   : > { %5191 = vmatprep.mubr.bf16.mxu0 %v4913_v10  ;;  %5146 = vmatmul.mubr.bf16.gmra.mrb[80].mxu1 %v4910_v6 }
0x1e10   : > { %5192 = vmatmul.mubr.bf16.gmra.mrb[76].mxu0 %v4912_v5  ;;  %6372 = vmatpush3.bf16.msra.mxu1 %v6913_v62 }
0x1e11   : > { %6373 = vmatprep.subr.bf16.mxu1 %v7756_v9  ;;  %6381 = vmatprep.mubr.msk.bf16.mxu1 %vm7757_vm6, %v7756_v9 }
0x1e14   : > { %6374 = vmatpush3.bf16.msra.mxu1 %v6914_v54 }
0x1e15   : > { %6375 = vmatprep.subr.bf16.mxu1 %v7756_v9 }
0x1e18   : > { %6376 = vmatpush3.bf16.msra.mxu1 %v6915_v42 }
0x1e19   : > { %6377 = vmatprep.subr.bf16.mxu1 %v7756_v9 }
0x1e1c   : > { %6378 = vmatpush3.bf16.msra.mxu1 %v6916_v27 }
0x1e1d   : > { %6379 = vmatprep.subr.bf16.mxu1 %v7756_v9 }
0x1e20   : > { %6380 = vmatpush3.bf16.msra.mxu1 %v6917_v33 }
0x1e4d   : > { %v6108_v58 = vpop.f32.mrb[76].mxu1 }
0x1e4e   : > { %v6136_v21 = vpop.f32.mrb[72].mxu0  ;;  %v6109_v60 = vpop.f32.mrb[77].mxu1 }
0x1e4f   : > { %v6110_v52 = vadd.f32 %v6109_v60, %v6108_v58  ;;  %v6137_v37 = vpop.f32.mrb[73].mxu0  ;;  %v6111_v2 = vpop.f32.mrb[78].mxu1 }
0x1e50   : > { %v6138_v31 = vadd.f32 %v6137_v37, %v6136_v21  ;;  %v6139_v25 = vpop.f32.mrb[74].mxu0  ;;  %v6112_v26 = vpop.f32.mrb[79].mxu1 }
0x1e51   : > { %v6140_v41 = vpop.f32.mrb[75].mxu0 }
0x1e52   : > { %v5187_v13 = vadd.f32 %v6138_v31, %v6110_v52 }
0x1e54   : > { %v5198_v3 = vadd.f32 %v5187_v13, %v8960_v46 }
0x1e56   : > { %v5205_v14 = vadd.f32 %v5919_v40, %v5198_v3 }
0x1e58   : > { %v5208_v45 = vsel %vm1090_vm1, %v5205_v14, 0.0 }
0x1e59   : > { %5209 = vadd.xlane.f32.xlu0 %v5208_v45 }
0x1ee2   : > { %v6114_v22 = vpop.f32.mrb[80].mxu1 }
0x1ee3   : > { %v6142_v46 = vpop.f32.mrb[76].mxu0  ;;  %v6115_v8 = vpop.f32.mrb[81].mxu1 }
0x1ee4   : > { %v6143_v20 = vpop.f32.mrb[77].mxu0  ;;  %v6117_v24 = vpop.f32.mrb[82].mxu1 }
0x1ee5   : > { %v6145_v19 = vpop.f32.mrb[78].mxu0  ;;  %v6118_v17 = vpop.f32.mrb[83].mxu1 }
0x1ee6   : > { %v5210_v51 = vpop.xlane.xlu0 %5209  ;;  %v6146_v63 = vpop.f32.mrb[79].mxu0 }
0x1ee7   : > { %v5211_v39 = vmul.f32 0.0078125, %v5210_v51 }
0x1ee9   : > { %v5212_v38 = vsub.f32 %v5205_v14, %v5211_v39 }
0x1eeb   : > { %v5213_v34 = vmul.f32 %v5212_v38, %v5212_v38 }
0x1eed   : > { %v5214_v4 = vsel %vm1090_vm1, %v5213_v34, 0.0 }
0x1eee   : > { %5215 = vadd.xlane.f32.xlu1 %v5214_v4 }
0x1f7b   : > { %v5216_v30 = vpop.xlane.xlu1 %5215 }
0x1f7c   : > { %v5217_v43 = vmul.f32 0.0078125, %v5216_v30 }
0x1f7e   : > { %v5218_v55 = vadd.f32 1e-05, %v5217_v43 }
0x1f80   : > { %7140 = vrsqrt.f32 %v5218_v55 }
0x1f8a   : > { %v7141_v53 = vpop.eup %7140 }
0x1f8b   : > { %v5220_v49 = vmul.f32 %v7141_v53, %v5212_v38 }
0x1f8d   : > { %v5221_v56 = vmul.f32 %v5220_v49, %v5206_v48 }
0x1f8f   : > { %v5222_v23 = vadd.f32 %v5221_v56, %v5207_v32 }
0x1f91   : > { %v5223_v28 = vpack.c.bf16 %v5222_v23, %v5222_v23 }
0x1f93   : > { %6382 = vmatmul.mubr.bf16.vlgmr.msra.gmra.mrb[84].mxu1 %v5223_v28 }
0x2066   : > { %v5322_v35 = vpop.f32.mrb[84].mxu1 }
0x2067   : > { %v5328_v0 = vmul.f32 %v5322_v35, %v5322_v35  ;;  %v6383_v47 = vpop.f32.mrb[85].mxu1 }
0x2068   : > { %v5325_v50 = vpop.f32.mrb[86].mxu1 }
0x2069   : > { %v6384_v57 = vpop.f32.mrb[87].mxu1  ;;  %v5329_v59 = vsel %vm1090_vm1, %v5328_v0, 0.0 }
0x206a   : > { %5330 = vadd.xlane.f32.xlu0 %v5329_v59 }
0x20f7   : > { %v5331_v61 = vpop.xlane.xlu0 %5330 }
0x20f8   : > { %7142 = vrsqrt.f32 %v5331_v61  ;;  %vm5334_vm8 = vcmp.eq.f32.partialorder %v5331_v61, inf  ;;  %v5337_v1 = vand.u32 2147483648, %v5331_v61  ;;  %vm5336_vm9 = vcmp.eq.f32.partialorder %v5331_v61, 0.0 }
0x2102   : > { %v7143_v44 = vpop.eup %7142 }
0x2103   : > { %v5333_v29 = vmul.f32 %v7143_v44, %v5331_v61 }
0x2105   : > { %v5335_v7 = vsel %vm5334_vm8, %v5331_v61, %v5333_v29 }
0x2106   : > { %v5338_v15 = vsel %vm5336_vm9, %v5337_v1, %v5335_v7 }
0x2107   : > { %v5339_v16 = vmax.f32 %v5338_v15, 1e-12  ;;  %5344 = vst.msk [vmem:[%s933_s4] sm:$0x1] %vm5343_vm7, %v5338_v15 }
0x2109   : > { %7144 = vrcp.f32 %v5339_v16 }
0x2113   : > { %v7145_v18 = vpop.eup %7144 }
0x2114   : > { %v5341_v6 = vmul.f32 %v7145_v18, %v5322_v35 }
0x2116   : > { %5342 = vst [vmem:[%s925_s29] sm:$0x1] %v5341_v6 }
0x2117   : > { %7637 = shalt.err (!%p7634_p13)
}
0x2118   : > { %s7638_s23 = scalar_lea.hbm %s9078_s13, 16  ;;  %s7642_s29 = scalar_lea.hbm %s9251_s18, 32 }
0x2119   : > { %p7639_p0 = scmp.ne.s32.totalorder %s9078_s13, %s7638_s23  ;;  %p7643_p6 = scmp.lt.u32.totalorder %s9078_s13, %s9251_s18 }
0x211a   : > { %p7644_p10 = scmp.lt.u32.totalorder %s7642_s29, %s7638_s23  ;;  %p7646_p3 = scmp.lt.u32.totalorder %s7638_s23, %s9078_s13 }
0x211b   : > { %p7640_p2 = pnand %p7639_p0, %p9252_p5 }
0x211c   : > { %p7645_p11 = por %p7644_p10, %p7643_p6 }
0x211d   : > { %p7641_p8 = pneg %p7640_p2 }
0x211e   : > { %p7647_p9 = por %p7646_p3, %p7645_p11 }
0x2120   : > { %p7648_p7 = pnand %p7647_p9, %p7641_p8 }
0x2122   : > { %7651 = shalt.err (!%p7648_p7)
}
0x2123   : > { %6467 = dma.vmem_to_hbm [thread:$0]  (%p9252_p5), %s9080_s2, 16, %s9078_s13, %s5346_s16  }
0x2124 PF: > { %s9253_s22 = sld [smem:[#allocation40_spill]]  ;;  %p9254_p4 = scmp.ne.s32.totalorder %s9221_s7, 0 }
0x2125   : > { %p9255_p12 = scmp.ge.s32.totalorder %s7722_s30, 2 }
0x2127   : > { %p6523_p1 = pnand %p9255_p12, %p9254_p4 }
0x212a   : > { %s5376_s26 = sand.u32 1, %s9253_s22  }
0x212b   : > { %s5377_s3 = scalar_lea.sflag [#allocation4], %s5376_s26 }
0x212c   : > { %7705 = dma.done.wait (!%p6523_p1), %s5377_s3, 16  }
0x212d   : > { %7707 = vsyncadd (!%p6523_p1), %s5377_s3, 4294967280  ;;  %s9256_s3 = sld [smem:[#allocation41_spill]]  ;;  %s9257_s28 = sld [smem:[#allocation42_spill]] }
0x212e   : > { %p44_p13 = scmp.ge.s32.totalorder %s8274_s6, 4   ;;  %s9258_s29 = smov %s8286_s27 }
0x212f   : > { %s9259_s30 = smov %s8274_s6 }
0x2130   :  { %46 = sbr.rel (!%p44_p13) target bundleno = 31 (0x1f), region = 237 }
0x2137   :  { %5387 = vsyncpa [#allocation3], 1 }
0x2138   :  { %5389 = vsyncpa [#allocation3 + $0x1], 1 }
0x2139   :  { %5390 = vsyncpa [#allocation6], 1 }
0x213a   :  { %5391 = vsyncpa [#allocation9], 1 }
0x213b   :  { %5392 = vsyncpa [#allocation12], 1 }
0x213c   :  { %5393 = vsyncpa [#allocation15], 1 }
0x213d   :  { %5394 = vsyncpa [#allocation18], 1 }
0x213e   :  { %5395 = vsyncpa [#allocation21], 1 }
0x213f   :  { %5396 = vsyncpa [#allocation24], 1 }
0x2140   :  { %5397 = vsyncpa [#allocation27], 1 }
0x2141   :  { %5398 = vsyncpa [#allocation4], 1 }
0x2142   :  { %5400 = vsyncpa [#allocation4 + $0x1], 1 }

</bundles_post_ra>
